<compile_context>
chip_gen: v7x
topology: tpu7x:2x2x1
jax: 0.10.0
libtpu: 0.0.40
codegen_flags: <defaults>
</compile_context>

<pallas_src>
import jax
import jax.numpy as jnp
from jax import lax
from jax.experimental import pallas as pl
from jax.experimental.pallas import tpu as pltpu

# ---------------- model hyperparameters (small synthetic analog) -------------
B = 4        # batch
S = 64       # padded sequence length
D = 128      # representation dimension (AVAILABLE_MODELS analog)
F = 256      # FFN hidden dimension
C = 128      # head output dimension
VOCAB = 32   # amino-acid-ish vocabulary


def _pick_tb(batch, seq, target_rows=256):
    """Batch block so the weight matmuls see ~target_rows MXU rows per step,
    while keeping GRID_B >= 2 (pipeline overlap / v7x dual-TC sharding)."""
    cap = max(1, target_rows // seq)
    if batch >= 2:
        cap = min(cap, batch // 2)
    cap = max(1, min(cap, batch))
    for tb in range(cap, 0, -1):
        if batch % tb == 0:
            return tb
    return 1


TB = _pick_tb(B, S)          # B=4, S=64 -> TB=2 (128 rows/step), GRID_B=2
GRID_B = B // TB
assert B % TB == 0

_GELU_C = 0.7978845608028654


# ---------------------------- Pallas kernel ----------------------------------
def _encoder_kernel(
    lens_ref,                      # SMEM (B,) int32 — scalar prefetch
    x_ref,                         # (TB, S, D) bf16 token embeddings
    wqkv_ref,                      # (D, 3D) bf16 fused QKV projection
    wo_ref,                        # (D, D)  bf16
    g1_ref, b1_ref,                # (1, D)  f32 layernorm 1
    w1_ref, w2_ref,                # (D, F), (F, D) bf16 FFN
    g2_ref, b2_ref,                # (1, D)  f32 layernorm 2
    wh_ref, bh_ref,                # (D, C) bf16, (1, C) f32 head
    hid_ref,                       # (TB, S, D) bf16 last_hidden_state
    sum_ref,                       # (TB, 2, D) f32: row0 = masked mean, row1 = CLS
    head_ref,                      # (TB, S, C) bf16 head(last_hidden_state)
):
    base = pl.program_id(0) * TB

    # ---- per-sequence lengths as a tiny (TB,1,1) vector (one vreg) ----
    # O(TB) scalar SMEM reads into a 1-vreg tensor; all downstream masking is
    # a single broadcast compare (no per-batch full-tensor selects).
    b_idx = lax.broadcasted_iota(jnp.int32, (TB, 1, 1), 0)
    Ls = jnp.zeros((TB, 1, 1), jnp.int32)
    for b in range(TB):                                  # TB is static & tiny
        Ls = jnp.where(b_idx == b, lens_ref[base + b], Ls)

    x_bf = x_ref[...]                                    # (TB, S, D) bf16
    x2 = x_bf.reshape(TB * S, D)                         # fold batch into rows

    # ---- fused QKV projection: one MXU pass with N = 3D ----
    qkv = jnp.dot(x2, wqkv_ref[...],
                  preferred_element_type=jnp.float32)            # (TB*S, 3D)
    q = qkv[:, 0 * D:1 * D].reshape(TB, S, D)
    k = qkv[:, 1 * D:2 * D].reshape(TB, S, D)
    v = qkv[:, 2 * D:3 * D].reshape(TB, S, D)

    # ---- attention scores: batched, contract on last axes (no k.T temp) ----
    scale = 1.0 / jnp.sqrt(jnp.float32(D))
    s = jnp.einsum("bqd,bkd->bqk",
                   q.astype(jnp.bfloat16), k.astype(jnp.bfloat16),
                   preferred_element_type=jnp.float32) * scale    # (TB, S, S)

    # key mask: single broadcast compare (TB,1,S) applied with one select
    pos = lax.broadcasted_iota(jnp.int32, (1, 1, S), 2)           # (1,1,S)
    key_valid = pos < Ls                                          # (TB,1,S)
    s = jnp.where(key_valid, s, -1e9)

    # softmax; reciprocal goes to the (otherwise idle) EUP slot.
    # approx=True -> rows sum to 1 only to ~1e-3 rel (OK for embeddings).
    s = s - jnp.max(s, axis=-1, keepdims=True)
    p = jnp.exp(s)
    p = p * pl.reciprocal(jnp.sum(p, axis=-1, keepdims=True), approx=True)

    a = jnp.einsum("bqk,bkd->bqd",
                   p.astype(jnp.bfloat16), v.astype(jnp.bfloat16),
                   preferred_element_type=jnp.float32)            # (TB, S, D)

    o = jnp.dot(a.reshape(TB * S, D).astype(jnp.bfloat16), wo_ref[...],
                preferred_element_type=jnp.float32)               # (TB*S, D)

    # ---- residual + LayerNorm 1 (f32 epilogue) ----
    h = x2.astype(jnp.float32) + o
    mu = jnp.mean(h, axis=-1, keepdims=True)
    var = jnp.mean((h - mu) * (h - mu), axis=-1, keepdims=True)
    h = (h - mu) * lax.rsqrt(var + 1e-5) * g1_ref[...] + b1_ref[...]

    # ---- FFN with tanh-GELU ----
    f = jnp.dot(h.astype(jnp.bfloat16), w1_ref[...],
                preferred_element_type=jnp.float32)               # (TB*S, F)
    f = 0.5 * f * (1.0 + jnp.tanh(_GELU_C * (f + 0.044715 * f * f * f)))
    f = jnp.dot(f.astype(jnp.bfloat16), w2_ref[...],
                preferred_element_type=jnp.float32)               # (TB*S, D)

    # ---- residual + LayerNorm 2 ----
    y = h + f
    mu2 = jnp.mean(y, axis=-1, keepdims=True)
    var2 = jnp.mean((y - mu2) * (y - mu2), axis=-1, keepdims=True)
    y = (y - mu2) * lax.rsqrt(var2 + 1e-5) * g2_ref[...] + b2_ref[...]

    y3 = y.reshape(TB, S, D)                                      # f32
    hid_ref[...] = y3.astype(jnp.bfloat16)                        # last_hidden_state

    # ---- masked mean pool (embd[:L].mean(0)) + CLS (embd[0]) on the MXU ----
    # (TB,2,S) selection matrix: row0 = 1/L over valid positions (guarded for
    # L==0), row1 = one-hot at position 0. One batched matmul replaces the
    # sublane reduce + full-slab selects; output is a lane-dense (TB,2,D).
    inv_L = 1.0 / jnp.maximum(Ls, 1).astype(jnp.float32)          # exact, tiny
    pool_row = jnp.where(key_valid, inv_L, 0.0)                   # (TB,1,S)
    cls_row = (pos == 0).astype(jnp.float32)                      # (1,1,S)
    o_idx = lax.broadcasted_iota(jnp.int32, (1, 2, 1), 1)
    sel = jnp.where(o_idx == 0, pool_row, cls_row)                # (TB,2,S)
    sum_ref[...] = jnp.einsum("bos,bsd->bod", sel, y3,
                              preferred_element_type=jnp.float32)  # (TB,2,D)

    # ---- optional linear head on last_hidden_state ----
    head = jnp.dot(y.astype(jnp.bfloat16), wh_ref[...],
                   preferred_element_type=jnp.float32) + bh_ref[...]
    head_ref[...] = head.reshape(TB, S, C).astype(jnp.bfloat16)


def _rep(shape):
    """BlockSpec for a weight replicated across the batch grid.
    TODO(synk): at real ESM2 sizes add pipeline_mode=pl.Buffered(1) (or K-tile)
    so grid-invariant weights are not double-buffered in VMEM."""
    nd = len(shape)
    return pl.BlockSpec(shape, lambda g, lens, _nd=nd: (0,) * _nd)


@jax.jit
def representation_engine_forward(input_ids, lens, params):
    """Synthetic RepresentationEngine forward.

    input_ids: (B, S) int32 token ids
    lens:      (B,)   int32 original sequence lengths (for :seq_len pooling)
    Returns dict with last_hidden_state (B,S,D) bf16, mean_pooled (B,D) f32,
    cls (B,D) f32, head_out (B,S,C) bf16.
    """
    # glue: embedding gather (tokenizer/string handling is out of scope).
    # embedding table is stored in bf16 -> x arrives in bf16 (half the DMA).
    x = jnp.take(params["embedding"], input_ids, axis=0)          # (B,S,D) bf16

    out_shapes = (
        jax.ShapeDtypeStruct((B, S, D), jnp.bfloat16),   # last_hidden_state
        jax.ShapeDtypeStruct((B, 2, D), jnp.float32),    # summary (pooled / cls)
        jax.ShapeDtypeStruct((B, S, C), jnp.bfloat16),   # head output
    )

    in_specs = [
        pl.BlockSpec((TB, S, D), lambda g, lens: (g, 0, 0)),   # x (batch-blocked)
        _rep((D, 3 * D)),                                      # fused Wqkv (pre-cast bf16)
        _rep((D, D)),                                          # Wo
        _rep((1, D)), _rep((1, D)),                            # ln1 gamma/beta
        _rep((D, F)), _rep((F, D)),                            # FFN
        _rep((1, D)), _rep((1, D)),                            # ln2 gamma/beta
        _rep((D, C)), _rep((1, C)),                            # head W, b
    ]
    out_specs = (
        pl.BlockSpec((TB, S, D), lambda g, lens: (g, 0, 0)),
        pl.BlockSpec((TB, 2, D), lambda g, lens: (g, 0, 0)),
        pl.BlockSpec((TB, S, C), lambda g, lens: (g, 0, 0)),
    )

    hid, summary, head_out = pl.pallas_call(
        _encoder_kernel,
        out_shape=out_shapes,
        grid_spec=pltpu.PrefetchScalarGridSpec(
            num_scalar_prefetch=1,          # lens -> SMEM
            grid=(GRID_B,),
            in_specs=in_specs,
            out_specs=out_specs,
        ),
        compiler_params=pltpu.CompilerParams(
            dimension_semantics=("parallel",),   # independent batch blocks
            vmem_limit_bytes=32 * 1024 * 1024,   # explicit (v5e default is 16 MiB)
        ),
    )(
        lens.astype(jnp.int32),
        x,
        params["wqkv"], params["wo"],
        params["ln1_g"], params["ln1_b"],
        params["w1"], params["w2"],
        params["ln2_g"], params["ln2_b"],
        params["head_w"], params["head_b"],
    )

    return {
        "last_hidden_state": hid,
        "mean_pooled": summary[:, 0, :],
        "cls": summary[:, 1, :],
        "head_out": head_out,
    }


def init_params(key):
    """Weights pre-fused (QKV) and pre-cast to bf16 ONCE here, so the forward
    pass does no per-call weight preprocessing (no extra HBM round-trips)."""
    ks = jax.random.split(key, 8)
    sd = 0.02
    wq = sd * jax.random.normal(ks[1], (D, D), jnp.float32)
    wk = sd * jax.random.normal(ks[2], (D, D), jnp.float32)
    wv = sd * jax.random.normal(ks[3], (D, D), jnp.float32)
    return {
        "embedding": (sd * jax.random.normal(ks[0], (VOCAB, D), jnp.float32)
                      ).astype(jnp.bfloat16),
        "wqkv": jnp.concatenate([wq, wk, wv], axis=1).astype(jnp.bfloat16),
        "wo": (sd * jax.random.normal(ks[4], (D, D), jnp.float32)).astype(jnp.bfloat16),
        "ln1_g": jnp.ones((1, D), jnp.float32),
        "ln1_b": jnp.zeros((1, D), jnp.float32),
        "w1": (sd * jax.random.normal(ks[5], (D, F), jnp.float32)).astype(jnp.bfloat16),
        "w2": (sd * jax.random.normal(ks[6], (F, D), jnp.float32)).astype(jnp.bfloat16),
        "ln2_g": jnp.ones((1, D), jnp.float32),
        "ln2_b": jnp.zeros((1, D), jnp.float32),
        "head_w": (sd * jax.random.normal(ks[7], (D, C), jnp.float32)).astype(jnp.bfloat16),
        "head_b": jnp.zeros((1, C), jnp.float32),
    }


if __name__ == "__main__":
    key = jax.random.PRNGKey(0)
    k_ids, k_params = jax.random.split(key)

    params = init_params(k_params)
    input_ids = jax.random.randint(k_ids, (B, S), 0, VOCAB, dtype=jnp.int32)
    lens = jnp.array([50, 64, 17, 3], dtype=jnp.int32)   # per-sequence true lengths

    out = representation_engine_forward(input_ids, lens, params)
    jax.block_until_ready(out)

    assert out["last_hidden_state"].shape == (B, S, D)
    assert out["mean_pooled"].shape == (B, D)
    assert out["cls"].shape == (B, D)
    assert out["head_out"].shape == (B, S, C)
    assert bool(jnp.isfinite(out["last_hidden_state"].astype(jnp.float32)).all())
    assert bool(jnp.isfinite(out["mean_pooled"]).all())
    assert bool(jnp.isfinite(out["cls"]).all())
    assert bool(jnp.isfinite(out["head_out"].astype(jnp.float32)).all())
    print("KERNEL_OK")
</pallas_src>

<mosaic_0001>
module attributes {stable_mosaic.version = 11 : i64} {
  func.func @_encoder_kernel(%arg0: i32, %arg1: memref<4xi32, #tpu.memory_space<smem>>, %arg2: memref<2x64x128xbf16, #tpu.memory_space<vmem>>, %arg3: memref<128x384xbf16, #tpu.memory_space<vmem>>, %arg4: memref<128x128xbf16, #tpu.memory_space<vmem>>, %arg5: memref<1x128xf32, #tpu.memory_space<vmem>>, %arg6: memref<1x128xf32, #tpu.memory_space<vmem>>, %arg7: memref<128x256xbf16, #tpu.memory_space<vmem>>, %arg8: memref<256x128xbf16, #tpu.memory_space<vmem>>, %arg9: memref<1x128xf32, #tpu.memory_space<vmem>>, %arg10: memref<1x128xf32, #tpu.memory_space<vmem>>, %arg11: memref<128x128xbf16, #tpu.memory_space<vmem>>, %arg12: memref<1x128xf32, #tpu.memory_space<vmem>>, %arg13: memref<2x64x128xbf16, #tpu.memory_space<vmem>>, %arg14: memref<2x2x128xf32, #tpu.memory_space<vmem>>, %arg15: memref<2x64x128xbf16, #tpu.memory_space<vmem>>) attributes {dimension_semantics = [#tpu.dimension_semantics<parallel>], iteration_bounds = array<i64: 2>, scalar_prefetch = 1 : i64, scratch_operands = 0 : i64, tpu.core_type = #tpu.core_type<tc>, window_params = [{transform_indices = @transform_0, window_bounds = array<i64: 2, 64, 128>}, {pipeline_mode = #tpu.pipeline_mode<synchronous>, transform_indices = @transform_1, window_bounds = array<i64: 128, 384>}, {pipeline_mode = #tpu.pipeline_mode<synchronous>, transform_indices = @transform_2, window_bounds = array<i64: 128, 128>}, {pipeline_mode = #tpu.pipeline_mode<synchronous>, transform_indices = @transform_3, window_bounds = array<i64: 1, 128>}, {pipeline_mode = #tpu.pipeline_mode<synchronous>, transform_indices = @transform_4, window_bounds = array<i64: 1, 128>}, {pipeline_mode = #tpu.pipeline_mode<synchronous>, transform_indices = @transform_5, window_bounds = array<i64: 128, 256>}, {pipeline_mode = #tpu.pipeline_mode<synchronous>, transform_indices = @transform_6, window_bounds = array<i64: 256, 128>}, {pipeline_mode = #tpu.pipeline_mode<synchronous>, transform_indices = @transform_7, window_bounds = array<i64: 1, 128>}, {pipeline_mode = #tpu.pipeline_mode<synchronous>, transform_indices = @transform_8, window_bounds = array<i64: 1, 128>}, {pipeline_mode = #tpu.pipeline_mode<synchronous>, transform_indices = @transform_9, window_bounds = array<i64: 128, 128>}, {pipeline_mode = #tpu.pipeline_mode<synchronous>, transform_indices = @transform_10, window_bounds = array<i64: 1, 128>}, {transform_indices = @transform_11, window_bounds = array<i64: 2, 64, 128>}, {transform_indices = @transform_12, window_bounds = array<i64: 2, 2, 128>}, {transform_indices = @transform_13, window_bounds = array<i64: 2, 64, 128>}]} {
    %c2_i32 = arith.constant 2 : i32
    %0 = arith.muli %arg0, %c2_i32 : i32
    %1 = tpu.iota {dimensions = array<i32: 0>} : vector<2x1x1xi32>
    %c0_i32 = arith.constant 0 : i32
    %2 = vector.broadcast %c0_i32 : i32 to vector<2x1x1xi32>
    %c0_i32_0 = arith.constant 0 : i32
    %3 = vector.broadcast %c0_i32_0 : i32 to vector<2x1x1xi32>
    %4 = arith.cmpi eq, %1, %3 : vector<2x1x1xi32>
    %c0_i32_1 = arith.constant 0 : i32
    %5 = arith.addi %0, %c0_i32_1 : i32
    %6 = arith.index_cast %5 : i32 to index
    %7 = memref.load %arg1[%6] : memref<4xi32, #tpu.memory_space<smem>>
    %8 = vector.broadcast %7 : i32 to vector<2x1x1xi32>
    %9 = arith.select %4, %8, %2 : vector<2x1x1xi1>, vector<2x1x1xi32>
    %c1_i32 = arith.constant 1 : i32
    %10 = vector.broadcast %c1_i32 : i32 to vector<2x1x1xi32>
    %11 = arith.cmpi eq, %1, %10 : vector<2x1x1xi32>
    %c1_i32_2 = arith.constant 1 : i32
    %12 = arith.addi %0, %c1_i32_2 : i32
    %13 = arith.index_cast %12 : i32 to index
    %14 = memref.load %arg1[%13] : memref<4xi32, #tpu.memory_space<smem>>
    %15 = vector.broadcast %14 : i32 to vector<2x1x1xi32>
    %16 = arith.select %11, %15, %9 : vector<2x1x1xi1>, vector<2x1x1xi32>
    %c0 = arith.constant 0 : index
    %c0_3 = arith.constant 0 : index
    %c0_4 = arith.constant 0 : index
    %17 = vector.load %arg2[%c0, %c0_3, %c0_4] : memref<2x64x128xbf16, #tpu.memory_space<vmem>>, vector<2x64x128xbf16>
    %18 = vector.shape_cast %17 : vector<2x64x128xbf16> to vector<128x128xbf16>
    %c0_5 = arith.constant 0 : index
    %c0_6 = arith.constant 0 : index
    %19 = vector.load %arg3[%c0_5, %c0_6] : memref<128x384xbf16, #tpu.memory_space<vmem>>, vector<128x384xbf16>
    %cst = arith.constant dense<0.000000e+00> : vector<128x384xf32>
    %20 = tpu.matmul %18, %19, %cst {dimension_numbers = #tpu.dot_dimension_numbers<[1], [0], [0], [1], [0, 0, 1, 1], [], []>} : vector<128x128xbf16>, vector<128x384xbf16>, vector<128x384xf32> -> vector<128x384xf32>
    %21 = vector.extract_strided_slice %20 {offsets = [0, 0], sizes = [128, 128], strides = [1, 1]} : vector<128x384xf32> to vector<128x128xf32>
    %22 = vector.shape_cast %21 : vector<128x128xf32> to vector<2x64x128xf32>
    %23 = vector.extract_strided_slice %20 {offsets = [0, 128], sizes = [128, 128], strides = [1, 1]} : vector<128x384xf32> to vector<128x128xf32>
    %24 = vector.shape_cast %23 : vector<128x128xf32> to vector<2x64x128xf32>
    %25 = vector.extract_strided_slice %20 {offsets = [0, 256], sizes = [128, 128], strides = [1, 1]} : vector<128x384xf32> to vector<128x128xf32>
    %26 = vector.shape_cast %25 : vector<128x128xf32> to vector<2x64x128xf32>
    %cst_7 = arith.constant 1.280000e+02 : f32
    %27 = math.sqrt %cst_7 : f32
    %cst_8 = arith.constant 1.000000e+00 : f32
    %28 = arith.divf %cst_8, %27 : f32
    %29 = arith.truncf %22 : vector<2x64x128xf32> to vector<2x64x128xbf16>
    %30 = arith.truncf %24 : vector<2x64x128xf32> to vector<2x64x128xbf16>
    "tpu.trace_start"() <{level = 10 : i32, message = "bqd,bkd->bqk"}> : () -> ()
    %cst_9 = arith.constant dense<0.000000e+00> : vector<2x64x64xf32>
    %31 = tpu.matmul %29, %30, %cst_9 {dimension_numbers = #tpu.dot_dimension_numbers<[2], [2], [1], [1], [0, 0, 0, 1, 1, 1], [0], [0]>} : vector<2x64x128xbf16>, vector<2x64x128xbf16>, vector<2x64x64xf32> -> vector<2x64x64xf32>
    "tpu.trace_stop"() : () -> ()
    %32 = vector.broadcast %28 : f32 to vector<2x64x64xf32>
    %33 = arith.mulf %31, %32 : vector<2x64x64xf32>
    %34 = tpu.iota {dimensions = array<i32: 2>} : vector<1x1x64xi32>
    %35 = vector.broadcast %34 : vector<1x1x64xi32> to vector<2x1x64xi32>
    %36 = vector.broadcast %16 : vector<2x1x1xi32> to vector<2x1x64xi32>
    %37 = arith.cmpi slt, %35, %36 : vector<2x1x64xi32>
    %cst_10 = arith.constant -1.000000e+09 : f32
    %38 = vector.shape_cast %37 : vector<2x1x64xi1> to vector<2x1x64xi1>
    %39 = vector.broadcast %38 : vector<2x1x64xi1> to vector<2x64x64xi1>
    %40 = vector.broadcast %cst_10 : f32 to vector<2x64x64xf32>
    %41 = arith.select %39, %33, %40 : vector<2x64x64xi1>, vector<2x64x64xf32>
    %cst_11 = arith.constant dense<0xFF800000> : vector<2x64xf32>
    %42 = vector.multi_reduction <maximumf>, %41, %cst_11 [2] : vector<2x64x64xf32> to vector<2x64xf32>
    %43 = vector.shape_cast %42 : vector<2x64xf32> to vector<2x64x1xf32>
    %44 = vector.broadcast %43 : vector<2x64x1xf32> to vector<2x64x64xf32>
    %45 = arith.subf %41, %44 : vector<2x64x64xf32>
    %46 = math.exp %45 : vector<2x64x64xf32>
    %cst_12 = arith.constant dense<0.000000e+00> : vector<2x64xf32>
    %47 = vector.multi_reduction <add>, %46, %cst_12 [2] : vector<2x64x64xf32> to vector<2x64xf32>
    %48 = vector.shape_cast %47 : vector<2x64xf32> to vector<2x64x1xf32>
    %49 = tpu.reciprocal %48 {approx = true} : vector<2x64x1xf32> -> vector<2x64x1xf32>
    %50 = vector.broadcast %49 : vector<2x64x1xf32> to vector<2x64x64xf32>
    %51 = arith.mulf %46, %50 : vector<2x64x64xf32>
    %52 = arith.truncf %51 : vector<2x64x64xf32> to vector<2x64x64xbf16>
    %53 = arith.truncf %26 : vector<2x64x128xf32> to vector<2x64x128xbf16>
    "tpu.trace_start"() <{level = 10 : i32, message = "bqk,bkd->bqd"}> : () -> ()
    %cst_13 = arith.constant dense<0.000000e+00> : vector<2x64x128xf32>
    %54 = tpu.matmul %52, %53, %cst_13 {dimension_numbers = #tpu.dot_dimension_numbers<[2], [1], [1], [2], [0, 0, 0, 1, 1, 2], [0], [0]>} : vector<2x64x64xbf16>, vector<2x64x128xbf16>, vector<2x64x128xf32> -> vector<2x64x128xf32>
    "tpu.trace_stop"() : () -> ()
    %55 = vector.shape_cast %54 : vector<2x64x128xf32> to vector<128x128xf32>
    %56 = arith.truncf %55 : vector<128x128xf32> to vector<128x128xbf16>
    %c0_14 = arith.constant 0 : index
    %c0_15 = arith.constant 0 : index
    %57 = vector.load %arg4[%c0_14, %c0_15] : memref<128x128xbf16, #tpu.memory_space<vmem>>, vector<128x128xbf16>
    %cst_16 = arith.constant dense<0.000000e+00> : vector<128x128xf32>
    %58 = tpu.matmul %56, %57, %cst_16 {dimension_numbers = #tpu.dot_dimension_numbers<[1], [0], [0], [1], [0, 0, 1, 1], [], []>} : vector<128x128xbf16>, vector<128x128xbf16>, vector<128x128xf32> -> vector<128x128xf32>
    %59 = arith.extf %18 : vector<128x128xbf16> to vector<128x128xf32>
    %60 = arith.addf %59, %58 : vector<128x128xf32>
    %cst_17 = arith.constant dense<0.000000e+00> : vector<128xf32>
    %61 = vector.multi_reduction <add>, %60, %cst_17 [1] : vector<128x128xf32> to vector<128xf32>
    %62 = vector.shape_cast %61 : vector<128xf32> to vector<128x1xf32>
    %cst_18 = arith.constant 1.280000e+02 : f32
    %63 = vector.broadcast %cst_18 : f32 to vector<128x1xf32>
    %64 = arith.divf %62, %63 : vector<128x1xf32>
    %65 = vector.broadcast %64 : vector<128x1xf32> to vector<128x128xf32>
    %66 = arith.subf %60, %65 : vector<128x128xf32>
    %67 = vector.broadcast %64 : vector<128x1xf32> to vector<128x128xf32>
    %68 = arith.subf %60, %67 : vector<128x128xf32>
    %69 = arith.mulf %66, %68 : vector<128x128xf32>
    %cst_19 = arith.constant dense<0.000000e+00> : vector<128xf32>
    %70 = vector.multi_reduction <add>, %69, %cst_19 [1] : vector<128x128xf32> to vector<128xf32>
    %71 = vector.shape_cast %70 : vector<128xf32> to vector<128x1xf32>
    %cst_20 = arith.constant 1.280000e+02 : f32
    %72 = vector.broadcast %cst_20 : f32 to vector<128x1xf32>
    %73 = arith.divf %71, %72 : vector<128x1xf32>
    %74 = vector.broadcast %64 : vector<128x1xf32> to vector<128x128xf32>
    %75 = arith.subf %60, %74 : vector<128x128xf32>
    %cst_21 = arith.constant 9.99999974E-6 : f32
    %76 = vector.broadcast %cst_21 : f32 to vector<128x1xf32>
    %77 = arith.addf %73, %76 : vector<128x1xf32>
    %78 = math.rsqrt %77 : vector<128x1xf32>
    %79 = vector.broadcast %78 : vector<128x1xf32> to vector<128x128xf32>
    %80 = arith.mulf %75, %79 : vector<128x128xf32>
    %c0_22 = arith.constant 0 : index
    %c0_23 = arith.constant 0 : index
    %81 = vector.load %arg5[%c0_22, %c0_23] : memref<1x128xf32, #tpu.memory_space<vmem>>, vector<1x128xf32>
    %82 = vector.broadcast %81 : vector<1x128xf32> to vector<128x128xf32>
    %83 = arith.mulf %80, %82 : vector<128x128xf32>
    %c0_24 = arith.constant 0 : index
    %c0_25 = arith.constant 0 : index
    %84 = vector.load %arg6[%c0_24, %c0_25] : memref<1x128xf32, #tpu.memory_space<vmem>>, vector<1x128xf32>
    %85 = vector.broadcast %84 : vector<1x128xf32> to vector<128x128xf32>
    %86 = arith.addf %83, %85 : vector<128x128xf32>
    %87 = arith.truncf %86 : vector<128x128xf32> to vector<128x128xbf16>
    %c0_26 = arith.constant 0 : index
    %c0_27 = arith.constant 0 : index
    %88 = vector.load %arg7[%c0_26, %c0_27] : memref<128x256xbf16, #tpu.memory_space<vmem>>, vector<128x256xbf16>
    %cst_28 = arith.constant dense<0.000000e+00> : vector<128x256xf32>
    %89 = tpu.matmul %87, %88, %cst_28 {dimension_numbers = #tpu.dot_dimension_numbers<[1], [0], [0], [1], [0, 0, 1, 1], [], []>} : vector<128x128xbf16>, vector<128x256xbf16>, vector<128x256xf32> -> vector<128x256xf32>
    %cst_29 = arith.constant 5.000000e-01 : f32
    %90 = vector.broadcast %cst_29 : f32 to vector<128x256xf32>
    %91 = arith.mulf %90, %89 : vector<128x256xf32>
    %cst_30 = arith.constant 4.471500e-02 : f32
    %92 = vector.broadcast %cst_30 : f32 to vector<128x256xf32>
    %93 = arith.mulf %92, %89 : vector<128x256xf32>
    %94 = arith.mulf %93, %89 : vector<128x256xf32>
    %95 = arith.mulf %94, %89 : vector<128x256xf32>
    %96 = arith.addf %89, %95 : vector<128x256xf32>
    %cst_31 = arith.constant 0.797884583 : f32
    %97 = vector.broadcast %cst_31 : f32 to vector<128x256xf32>
    %98 = arith.mulf %97, %96 : vector<128x256xf32>
    %99 = math.tanh %98 : vector<128x256xf32>
    %cst_32 = arith.constant 1.000000e+00 : f32
    %100 = vector.broadcast %cst_32 : f32 to vector<128x256xf32>
    %101 = arith.addf %100, %99 : vector<128x256xf32>
    %102 = arith.mulf %91, %101 : vector<128x256xf32>
    %103 = arith.truncf %102 : vector<128x256xf32> to vector<128x256xbf16>
    %c0_33 = arith.constant 0 : index
    %c0_34 = arith.constant 0 : index
    %104 = vector.load %arg8[%c0_33, %c0_34] : memref<256x128xbf16, #tpu.memory_space<vmem>>, vector<256x128xbf16>
    %cst_35 = arith.constant dense<0.000000e+00> : vector<128x128xf32>
    %105 = tpu.matmul %103, %104, %cst_35 {dimension_numbers = #tpu.dot_dimension_numbers<[1], [0], [0], [1], [0, 0, 1, 1], [], []>} : vector<128x256xbf16>, vector<256x128xbf16>, vector<128x128xf32> -> vector<128x128xf32>
    %106 = arith.addf %86, %105 : vector<128x128xf32>
    %cst_36 = arith.constant dense<0.000000e+00> : vector<128xf32>
    %107 = vector.multi_reduction <add>, %106, %cst_36 [1] : vector<128x128xf32> to vector<128xf32>
    %108 = vector.shape_cast %107 : vector<128xf32> to vector<128x1xf32>
    %cst_37 = arith.constant 1.280000e+02 : f32
    %109 = vector.broadcast %cst_37 : f32 to vector<128x1xf32>
    %110 = arith.divf %108, %109 : vector<128x1xf32>
    %111 = vector.broadcast %110 : vector<128x1xf32> to vector<128x128xf32>
    %112 = arith.subf %106, %111 : vector<128x128xf32>
    %113 = vector.broadcast %110 : vector<128x1xf32> to vector<128x128xf32>
    %114 = arith.subf %106, %113 : vector<128x128xf32>
    %115 = arith.mulf %112, %114 : vector<128x128xf32>
    %cst_38 = arith.constant dense<0.000000e+00> : vector<128xf32>
    %116 = vector.multi_reduction <add>, %115, %cst_38 [1] : vector<128x128xf32> to vector<128xf32>
    %117 = vector.shape_cast %116 : vector<128xf32> to vector<128x1xf32>
    %cst_39 = arith.constant 1.280000e+02 : f32
    %118 = vector.broadcast %cst_39 : f32 to vector<128x1xf32>
    %119 = arith.divf %117, %118 : vector<128x1xf32>
    %120 = vector.broadcast %110 : vector<128x1xf32> to vector<128x128xf32>
    %121 = arith.subf %106, %120 : vector<128x128xf32>
    %cst_40 = arith.constant 9.99999974E-6 : f32
    %122 = vector.broadcast %cst_40 : f32 to vector<128x1xf32>
    %123 = arith.addf %119, %122 : vector<128x1xf32>
    %124 = math.rsqrt %123 : vector<128x1xf32>
    %125 = vector.broadcast %124 : vector<128x1xf32> to vector<128x128xf32>
    %126 = arith.mulf %121, %125 : vector<128x128xf32>
    %c0_41 = arith.constant 0 : index
    %c0_42 = arith.constant 0 : index
    %127 = vector.load %arg9[%c0_41, %c0_42] : memref<1x128xf32, #tpu.memory_space<vmem>>, vector<1x128xf32>
    %128 = vector.broadcast %127 : vector<1x128xf32> to vector<128x128xf32>
    %129 = arith.mulf %126, %128 : vector<128x128xf32>
    %c0_43 = arith.constant 0 : index
    %c0_44 = arith.constant 0 : index
    %130 = vector.load %arg10[%c0_43, %c0_44] : memref<1x128xf32, #tpu.memory_space<vmem>>, vector<1x128xf32>
    %131 = vector.broadcast %130 : vector<1x128xf32> to vector<128x128xf32>
    %132 = arith.addf %129, %131 : vector<128x128xf32>
    %133 = vector.shape_cast %132 : vector<128x128xf32> to vector<2x64x128xf32>
    %134 = arith.truncf %133 : vector<2x64x128xf32> to vector<2x64x128xbf16>
    %c0_45 = arith.constant 0 : index
    %c0_46 = arith.constant 0 : index
    %c0_47 = arith.constant 0 : index
    %135 = vector.load %arg13[%c0_45, %c0_46, %c0_47] : memref<2x64x128xbf16, #tpu.memory_space<vmem>>, vector<2x64x128xbf16>
    tpu.vector_store %arg13[%c0_45, %c0_46, %c0_47], %134 {strides = array<i32>} : memref<2x64x128xbf16, #tpu.memory_space<vmem>>, vector<2x64x128xbf16>,
    %c1_i32_48 = arith.constant 1 : i32
    %136 = vector.broadcast %c1_i32_48 : i32 to vector<2x1x1xi32>
    %137 = arith.maxsi %16, %136 : vector<2x1x1xi32>
    %138 = arith.sitofp %137 : vector<2x1x1xi32> to vector<2x1x1xf32>
    %cst_49 = arith.constant 1.000000e+00 : f32
    %139 = vector.broadcast %cst_49 : f32 to vector<2x1x1xf32>
    %140 = arith.divf %139, %138 : vector<2x1x1xf32>
    %cst_50 = arith.constant 0.000000e+00 : f32
    %141 = vector.shape_cast %140 : vector<2x1x1xf32> to vector<2x1x1xf32>
    %142 = vector.broadcast %141 : vector<2x1x1xf32> to vector<2x1x64xf32>
    %143 = vector.broadcast %cst_50 : f32 to vector<2x1x64xf32>
    %144 = arith.select %37, %142, %143 : vector<2x1x64xi1>, vector<2x1x64xf32>
    %c0_i32_51 = arith.constant 0 : i32
    %145 = vector.broadcast %c0_i32_51 : i32 to vector<1x1x64xi32>
    %146 = arith.cmpi eq, %34, %145 : vector<1x1x64xi32>
    %147 = arith.extui %146 : vector<1x1x64xi1> to vector<1x1x64xi32>
    %148 = arith.sitofp %147 : vector<1x1x64xi32> to vector<1x1x64xf32>
    %149 = tpu.iota {dimensions = array<i32: 1>} : vector<1x2x1xi32>
    %c0_i32_52 = arith.constant 0 : i32
    %150 = vector.broadcast %c0_i32_52 : i32 to vector<1x2x1xi32>
    %151 = arith.cmpi eq, %149, %150 : vector<1x2x1xi32>
    %152 = vector.shape_cast %151 : vector<1x2x1xi1> to vector<1x2x1xi1>
    %153 = vector.broadcast %152 : vector<1x2x1xi1> to vector<2x2x64xi1>
    %154 = vector.shape_cast %144 : vector<2x1x64xf32> to vector<2x1x64xf32>
    %155 = vector.broadcast %154 : vector<2x1x64xf32> to vector<2x2x64xf32>
    %156 = vector.shape_cast %148 : vector<1x1x64xf32> to vector<1x1x64xf32>
    %157 = vector.broadcast %156 : vector<1x1x64xf32> to vector<2x2x64xf32>
    %158 = arith.select %153, %155, %157 : vector<2x2x64xi1>, vector<2x2x64xf32>
    "tpu.trace_start"() <{level = 10 : i32, message = "bos,bsd->bod"}> : () -> ()
    %cst_53 = arith.constant dense<0.000000e+00> : vector<2x2x128xf32>
    %159 = tpu.matmul %158, %133, %cst_53 {dimension_numbers = #tpu.dot_dimension_numbers<[2], [1], [1], [2], [0, 0, 0, 1, 1, 2], [0], [0]>} : vector<2x2x64xf32>, vector<2x64x128xf32>, vector<2x2x128xf32> -> vector<2x2x128xf32>
    "tpu.trace_stop"() : () -> ()
    %c0_54 = arith.constant 0 : index
    %c0_55 = arith.constant 0 : index
    %c0_56 = arith.constant 0 : index
    %160 = vector.load %arg14[%c0_54, %c0_55, %c0_56] : memref<2x2x128xf32, #tpu.memory_space<vmem>>, vector<2x2x128xf32>
    tpu.vector_store %arg14[%c0_54, %c0_55, %c0_56], %159 {strides = array<i32>} : memref<2x2x128xf32, #tpu.memory_space<vmem>>, vector<2x2x128xf32>,
    %161 = arith.truncf %132 : vector<128x128xf32> to vector<128x128xbf16>
    %c0_57 = arith.constant 0 : index
    %c0_58 = arith.constant 0 : index
    %162 = vector.load %arg11[%c0_57, %c0_58] : memref<128x128xbf16, #tpu.memory_space<vmem>>, vector<128x128xbf16>
    %cst_59 = arith.constant dense<0.000000e+00> : vector<128x128xf32>
    %163 = tpu.matmul %161, %162, %cst_59 {dimension_numbers = #tpu.dot_dimension_numbers<[1], [0], [0], [1], [0, 0, 1, 1], [], []>} : vector<128x128xbf16>, vector<128x128xbf16>, vector<128x128xf32> -> vector<128x128xf32>
    %c0_60 = arith.constant 0 : index
    %c0_61 = arith.constant 0 : index
    %164 = vector.load %arg12[%c0_60, %c0_61] : memref<1x128xf32, #tpu.memory_space<vmem>>, vector<1x128xf32>
    %165 = vector.broadcast %164 : vector<1x128xf32> to vector<128x128xf32>
    %166 = arith.addf %163, %165 : vector<128x128xf32>
    %167 = vector.shape_cast %166 : vector<128x128xf32> to vector<2x64x128xf32>
    %168 = arith.truncf %167 : vector<2x64x128xf32> to vector<2x64x128xbf16>
    %c0_62 = arith.constant 0 : index
    %c0_63 = arith.constant 0 : index
    %c0_64 = arith.constant 0 : index
    %169 = vector.load %arg15[%c0_62, %c0_63, %c0_64] : memref<2x64x128xbf16, #tpu.memory_space<vmem>>, vector<2x64x128xbf16>
    tpu.vector_store %arg15[%c0_62, %c0_63, %c0_64], %168 {strides = array<i32>} : memref<2x64x128xbf16, #tpu.memory_space<vmem>>, vector<2x64x128xbf16>,
    return
  }
  func.func @transform_0(%arg0: i32, %arg1: memref<4xi32, #tpu.memory_space<smem>>) -> (i32, i32, i32) {
    %c0_i32 = arith.constant 0 : i32
    %c0_i32_0 = arith.constant 0 : i32
    %c0_i32_1 = arith.constant 0 : i32
    return %arg0, %c0_i32, %c0_i32_0 : i32, i32, i32
  }
  func.func @transform_1(%arg0: i32, %arg1: memref<4xi32, #tpu.memory_space<smem>>) -> (i32, i32) {
    %c0_i32 = arith.constant 0 : i32
    %c0_i32_0 = arith.constant 0 : i32
    %c0_i32_1 = arith.constant 0 : i32
    return %c0_i32, %c0_i32_0 : i32, i32
  }
  func.func @transform_2(%arg0: i32, %arg1: memref<4xi32, #tpu.memory_space<smem>>) -> (i32, i32) {
    %c0_i32 = arith.constant 0 : i32
    %c0_i32_0 = arith.constant 0 : i32
    %c0_i32_1 = arith.constant 0 : i32
    return %c0_i32, %c0_i32_0 : i32, i32
  }
  func.func @transform_3(%arg0: i32, %arg1: memref<4xi32, #tpu.memory_space<smem>>) -> (i32, i32) {
    %c0_i32 = arith.constant 0 : i32
    %c0_i32_0 = arith.constant 0 : i32
    %c0_i32_1 = arith.constant 0 : i32
    return %c0_i32, %c0_i32_0 : i32, i32
  }
  func.func @transform_4(%arg0: i32, %arg1: memref<4xi32, #tpu.memory_space<smem>>) -> (i32, i32) {
    %c0_i32 = arith.constant 0 : i32
    %c0_i32_0 = arith.constant 0 : i32
    %c0_i32_1 = arith.constant 0 : i32
    return %c0_i32, %c0_i32_0 : i32, i32
  }
  func.func @transform_5(%arg0: i32, %arg1: memref<4xi32, #tpu.memory_space<smem>>) -> (i32, i32) {
    %c0_i32 = arith.constant 0 : i32
    %c0_i32_0 = arith.constant 0 : i32
    %c0_i32_1 = arith.constant 0 : i32
    return %c0_i32, %c0_i32_0 : i32, i32
  }
  func.func @transform_6(%arg0: i32, %arg1: memref<4xi32, #tpu.memory_space<smem>>) -> (i32, i32) {
    %c0_i32 = arith.constant 0 : i32
    %c0_i32_0 = arith.constant 0 : i32
    %c0_i32_1 = arith.constant 0 : i32
    return %c0_i32, %c0_i32_0 : i32, i32
  }
  func.func @transform_7(%arg0: i32, %arg1: memref<4xi32, #tpu.memory_space<smem>>) -> (i32, i32) {
    %c0_i32 = arith.constant 0 : i32
    %c0_i32_0 = arith.constant 0 : i32
    %c0_i32_1 = arith.constant 0 : i32
    return %c0_i32, %c0_i32_0 : i32, i32
  }
  func.func @transform_8(%arg0: i32, %arg1: memref<4xi32, #tpu.memory_space<smem>>) -> (i32, i32) {
    %c0_i32 = arith.constant 0 : i32
    %c0_i32_0 = arith.constant 0 : i32
    %c0_i32_1 = arith.constant 0 : i32
    return %c0_i32, %c0_i32_0 : i32, i32
  }
  func.func @transform_9(%arg0: i32, %arg1: memref<4xi32, #tpu.memory_space<smem>>) -> (i32, i32) {
    %c0_i32 = arith.constant 0 : i32
    %c0_i32_0 = arith.constant 0 : i32
    %c0_i32_1 = arith.constant 0 : i32
    return %c0_i32, %c0_i32_0 : i32, i32
  }
  func.func @transform_10(%arg0: i32, %arg1: memref<4xi32, #tpu.memory_space<smem>>) -> (i32, i32) {
    %c0_i32 = arith.constant 0 : i32
    %c0_i32_0 = arith.constant 0 : i32
    %c0_i32_1 = arith.constant 0 : i32
    return %c0_i32, %c0_i32_0 : i32, i32
  }
  func.func @transform_11(%arg0: i32, %arg1: memref<4xi32, #tpu.memory_space<smem>>) -> (i32, i32, i32) {
    %c0_i32 = arith.constant 0 : i32
    %c0_i32_0 = arith.constant 0 : i32
    %c0_i32_1 = arith.constant 0 : i32
    return %arg0, %c0_i32, %c0_i32_0 : i32, i32, i32
  }
  func.func @transform_12(%arg0: i32, %arg1: memref<4xi32, #tpu.memory_space<smem>>) -> (i32, i32, i32) {
    %c0_i32 = arith.constant 0 : i32
    %c0_i32_0 = arith.constant 0 : i32
    %c0_i32_1 = arith.constant 0 : i32
    return %arg0, %c0_i32, %c0_i32_0 : i32, i32, i32
  }
  func.func @transform_13(%arg0: i32, %arg1: memref<4xi32, #tpu.memory_space<smem>>) -> (i32, i32, i32) {
    %c0_i32 = arith.constant 0 : i32
    %c0_i32_0 = arith.constant 0 : i32
    %c0_i32_1 = arith.constant 0 : i32
    return %arg0, %c0_i32, %c0_i32_0 : i32, i32, i32
  }
}

</mosaic_0001>

<bundles_post_ra>
// kernel: representation_engine_forward.1
= control target key start
LH: loop header
LB: loop body
LE: loop exit
PB: predicated region body
PF: predicated region fallthrough
CT: control target
= control target key end

     0   :  { %s6115_s0 = inlined_call_operand.vmem [shape: s32[4], index: 0, kind: input, shape index: {}]   ;;  %s6116_s1 = inlined_call_operand.vmem [shape: bf16[4,64,128], index: 1, kind: input, shape index: {}]   ;;  %s6117_s2 = inlined_call_operand.vmem [shape: bf16[128,384], index: 2, kind: input, shape index: {}]   ;;  %s6118_s3 = inlined_call_operand.vmem [shape: bf16[128,128], index: 3, kind: input, shape index: {}]   ;;  %s6119_s4 = inlined_call_operand.vmem [shape: f32[1,128], index: 4, kind: input, shape index: {}]   ;;  %s6120_s5 = inlined_call_operand.vmem [shape: f32[1,128], index: 5, kind: input, shape index: {}]   ;;  %s6121_s6 = inlined_call_operand.vmem [shape: bf16[128,256], index: 6, kind: input, shape index: {}]   ;;  %s6122_s7 = inlined_call_operand.vmem [shape: bf16[256,128], index: 7, kind: input, shape index: {}]   ;;  %s6123_s8 = inlined_call_operand.vmem [shape: f32[1,128], index: 8, kind: input, shape index: {}]   ;;  %s6124_s9 = inlined_call_operand.vmem [shape: f32[1,128], index: 9, kind: input, shape index: {}]   ;;  %s6125_s10 = inlined_call_operand.vmem [shape: bf16[128,128], index: 10, kind: input, shape index: {}]   ;;  %s6126_s11 = inlined_call_operand.vmem [shape: f32[1,128], index: 11, kind: input, shape index: {}]   ;;  %s6127_s12 = inlined_call_operand.hbm [shape: bf16[4,64,128], index: 12, kind: output, shape index: {0}]   ;;  %s6128_s13 = inlined_call_operand.vmem [shape: f32[4,2,128], index: 13, kind: output, shape index: {1}]   ;;  %s6129_s14 = inlined_call_operand.hbm [shape: bf16[4,64,128], index: 14, kind: output, shape index: {2}]  }
   0x1   :  { %6136 = sst [smem:[#allocation15_spill]] %s6116_s1  ;;  %s20_s15 = sshll.u32 %s6115_s0, 4  ;;  %s21_s15 = int_to_ptr.vmem [resolvable:$true] %s20_s15 }
   0x2   :  { %s4559_s16 = scalar_lea.vmem %s21_s15, 16  ;;  %p4564_p1 = scmp.lt.s32.totalorder %s21_s15, %s21_s15 }
   0x3   :  { %p4560_p0 = scmp.ne.s32.totalorder %s21_s15, %s4559_s16  ;;  %p4565_p2 = scmp.lt.s32.totalorder %s4559_s16, %s4559_s16 }
   0x5   :  { %p4566_p3 = por %p4565_p2, %p4564_p1 }
   0x7   :  { %p4567_p4 = pnand %p4566_p3, %p4560_p0 }
   0x9   :  { %4570 = shalt.err (!%p4567_p4)  }
   0xa   :  { %s4669_s17 = smov [#allocation3]  }
   0xb   :  { %23 = dma.vmem_to_smem %s21_s15, 16, %s4669_s17, [#allocation2] }
   0xc   :  { %4643 = dma.done.wait [#allocation2], 16 }
   0xd   :  { %4644 = vsyncadd [#allocation2], 4294967280 }
   0xe   :  { %25 = sfence }
   0xf   :  { %26 = vsyncpa [#allocation5], 0 }
  0x10   :  { %28 = vsyncpa [#allocation5 + $0x1], 0 }
  0x11   :  { %29 = vsyncpa [#allocation7], 0 }
  0x12   :  { %31 = vsyncpa [#allocation7 + $0x1], 0  ;;  %s4756_s18 = smov 0   ;;  %s4758_s0 = smov 0  }
  0x13   :  { %s4760_s19 = smov 0   ;;  %s4762_s20 = smov 0  }
  0x14 LB: > { %6137 = sst [smem:[#allocation11_spill]] %s4663_s19  ;;  %s4777_s21 = sadd.s32 4294967295, %s4667_s20   ;;  %s4667_s20 = sphi %s4762_s20, %s6151_s20   ;;  %s4663_s19 = sphi %s4760_s19, %s6153_s19   ;;  %s4659_s0 = sphi %s4758_s0, %s6155_s0   ;;  %s4655_s18 = sphi %s4756_s18, %s6154_s18  }
  0x15   : > { %s3522_s22 = sadd.s32 4294967294, %s4667_s20   ;;  %s4781_s23 = sadd.s32 1, %s4667_s20  }
  0x16   : > { %6138 = sst [smem:[#allocation12_spill]] %s4781_s23  ;;  %s280_s24 = sadd.s32 1, %s4663_s19 }
  0x17   : > { %s277_s25 = ssub.s32 %s4667_s20, %s4781_s23  ;;  %p290_p5 = scmp.ne.s32.totalorder %s4663_s19, %s4659_s0 }
  0x18   : > { %p278_p6 = scmp.eq.s32.totalorder %s277_s25, 0  ;;  %p291_p7 = scmp.eq.s32.totalorder %s4777_s21, 1 }
  0x19   : > { %p296_p8 = scmp.ne.s32.totalorder %s4659_s0, %s4655_s18  ;;  %p297_p9 = scmp.eq.s32.totalorder %s3522_s22, 1 }
  0x1a   : > { %s4792_s26 = scalar_select %p278_p6, %s4663_s19, %s280_s24  }
  0x1b   : > { %p4794_p10 = por %p291_p7, %p290_p5  ;;  %p4798_p11 = por %p297_p9, %p296_p8 }
  0x1c   : > { %6139 = sst [smem:[#allocation13_spill]] %s4792_s26  ;;  %p3525_p12 = scmp.ge.s32.totalorder %s4667_s20, 1 }
  0x1d   : > { %s6141_s28 = scalar_select %p4798_p11, 1, 0 }
  0x1e   : > { %p407_p13 = scmp.lt.s32.totalorder %s4667_s20, 3 }
  0x1f   : > { %6142 = sst [smem:[#allocation14_spill]] %s6141_s28 }
  0x20   : > { %p408_p0 = pnand %p3525_p12, %p407_p13 }
  0x21   : > { %v4254_v0 = vld [vmem:[%s6117_s2 + $0x4] ss:$12 sps:$4 sm:$0xff] (!%p408_p0)   ;;  %s4808_s15 = sshll.u32 (!%p408_p0), %s4777_s21, 1  ;;  %v4256_v1 = vld [vmem:[%s6117_s2] ss:$12 sps:$4 sm:$0xff] (!%p408_p0)   ;;  %v4670_v2 = vmov (!%p408_p0), 0  }
  0x22   : > { %411 = sbr.rel (%p408_p0) target bundleno = 2672 (0xa70), region = 64  ;;  %740 = vmatprep.mubr.bf16.mxu0 (!%p408_p0), %v4670_v2  ;;  %p463_p1 = scmp.lt.s32.totalorder (!%p408_p0), %s4808_s15, 3  ;;  %708 = vmatprep.subr.bf16.mxu0 (!%p408_p0), %v4254_v0  ;;  %v4257_v3 = vld [vmem:[%s6117_s2 + $0x1c] ss:$12 sps:$4 sm:$0xff] (!%p408_p0)   ;;  %v4259_v4 = vld [vmem:[%s6117_s2 + $0x18] ss:$12 sps:$4 sm:$0xff] (!%p408_p0)  }
  0x23   : > { %709 = vmatpush1.bf16.msra.mxu0 (!%p408_p0), %v4256_v1  ;;  %v4260_v5 = vld [vmem:[%s6117_s2 + $0x34] ss:$12 sps:$4 sm:$0xff] (!%p408_p0)   ;;  %v4262_v6 = vld [vmem:[%s6117_s2 + $0x30] ss:$12 sps:$4 sm:$0xff] (!%p408_p0)   ;;  %s6143_s1 = sld [smem:[#allocation15_spill]] (!%p408_p0)  ;;  %vm1104_vm1 = vcmask (!%p408_p0), 523264  }
  0x24   : > { %710 = vmatprep.subr.bf16.mxu0 (!%p408_p0), %v4257_v3  ;;  %v4263_v7 = vld [vmem:[%s6117_s2 + $0x4c] ss:$12 sps:$4 sm:$0xff] (!%p408_p0)   ;;  %v4265_v9 = vld [vmem:[%s6117_s2 + $0x48] ss:$12 sps:$4 sm:$0xff] (!%p408_p0)   ;;  %v4266_v10 = vld [vmem:[%s6117_s2 + $0x64] ss:$12 sps:$4 sm:$0xff] (!%p408_p0)  }
  0x25   : > { %v4268_v11 = vld [vmem:[%s6117_s2 + $0x60] ss:$12 sps:$4 sm:$0xff] (!%p408_p0)   ;;  %v4286_v12 = vld [vmem:[%s6117_s2 + $0x8] ss:$12 sps:$4 sm:$0xff] (!%p408_p0)   ;;  %v4288_v15 = vld [vmem:[%s6117_s2 + $0x38] ss:$12 sps:$4 sm:$0xff] (!%p408_p0)  }
  0x26   : > { %v4287_v13 = vld [vmem:[%s6117_s2 + $0x20] ss:$12 sps:$4 sm:$0xff] (!%p408_p0)   ;;  %v4269_v14 = vld [vmem:[%s6117_s2 + $0x7c] ss:$12 sps:$4 sm:$0xff] (!%p408_p0)   ;;  %3965 = vmatprep.subr.bf16.mxu1 (!%p408_p0), %v4286_v12  ;;  %v4271_v16 = vld [vmem:[%s6117_s2 + $0x78] ss:$12 sps:$4 sm:$0xff] (!%p408_p0)  }
  0x27   : > { %711 = vmatpush1.bf16.msra.mxu0 (!%p408_p0), %v4259_v4  ;;  %3966 = vmatpush3.bf16.msra.mxu1 (!%p408_p0), %v4286_v12  ;;  %v4272_v17 = vld [vmem:[%s6117_s2 + $0x94] ss:$12 sps:$4 sm:$0xff] (!%p408_p0)   ;;  %v4274_v18 = vld [vmem:[%s6117_s2 + $0x90] ss:$12 sps:$4 sm:$0xff] (!%p408_p0)   ;;  %v4275_v20 = vld [vmem:[%s6117_s2 + $0xac] ss:$12 sps:$4 sm:$0xff] (!%p408_p0)  }
  0x28   : > { %712 = vmatprep.subr.bf16.mxu0 (!%p408_p0), %v4260_v5  ;;  %3967 = vmatprep.subr.bf16.mxu1 (!%p408_p0), %v4287_v13  ;;  %v4289_v19 = vld [vmem:[%s6117_s2 + $0x50] ss:$12 sps:$4 sm:$0xff] (!%p408_p0)   ;;  %v4290_v21 = vld [vmem:[%s6117_s2 + $0x68] ss:$12 sps:$4 sm:$0xff] (!%p408_p0)   ;;  %v4291_v23 = vld [vmem:[%s6117_s2 + $0x80] ss:$12 sps:$4 sm:$0xff] (!%p408_p0)  }
  0x29   : > { %s4822_s30 = scalar_select %p463_p1, %s4808_s15, 3  ;;  %v4277_v22 = vld [vmem:[%s6117_s2 + $0xa8] ss:$12 sps:$4 sm:$0xff]   ;;  %v4292_v24 = vld [vmem:[%s6117_s2 + $0x98] ss:$12 sps:$4 sm:$0xff]   ;;  %vm4672_vm3 = vmmov 0  }
  0x2a   : > { %v4293_v26 = vld [vmem:[%s6117_s2 + $0xb0] ss:$12 sps:$4 sm:$0xff]   ;;  %s481_s22 = sadd.s32 1, %s4808_s15  ;;  %s4674_s23 = smov [#allocation4]  }
  0x2b   : > { %s3672_s26 = sshll.u32 %s4822_s30, 5  ;;  %713 = vmatpush1.bf16.msra.mxu0 %v4262_v6  ;;  %3968 = vmatpush3.bf16.msra.mxu1 %v4287_v13 }
  0x2c   : > { %s4834_s28 = scalar_lea.vmem %s6143_s1, %s3672_s26  ;;  %714 = vmatprep.subr.bf16.mxu0 %v4263_v7  ;;  %3969 = vmatprep.subr.bf16.mxu1 %v4288_v15  ;;  %s479_s1 = sld [smem:[#allocation3 + %s4808_s15]] }
  0x2d   : > { %v484_v8 = vld [vmem:[%s4834_s28] sm:$0xff]   ;;  %v486_v25 = vld [vmem:[%s4834_s28 + $0x8] sm:$0xff]   ;;  %v488_v27 = vld [vmem:[%s4834_s28 + $0x10] sm:$0xff]   ;;  %s482_s26 = sld [smem:[#allocation3 + %s481_s22]]  ;;  %s6135_s15 = sshll.u32 %s4777_s21, 10 }
  0x2e   : > { %3981 = vmatprep.mubr.bf16.mxu1 %v484_v8  ;;  %v4897_v28 = vld [vmem:[%s4834_s28 + $0x18] sm:$0xff]   ;;  %v4900_v29 = vld [vmem:[%s4834_s28 + $0x20] sm:$0xff]   ;;  %v4907_v30 = vld [vmem:[%s4834_s28 + $0x28] sm:$0xff]   ;;  %s6006_s29 = scalar_lea.hbm %s6127_s12, %s6135_s15 }
  0x2f   : > { %715 = vmatpush1.bf16.msra.mxu0 %v4265_v9  ;;  %3970 = vmatpush3.bf16.msra.mxu1 %v4288_v15  ;;  %v4910_v31 = vld [vmem:[%s4834_s28 + $0x30] sm:$0xff]   ;;  %v4917_v32 = vld [vmem:[%s4834_s28 + $0x38] sm:$0xff]  }
  0x30   : > { %716 = vmatprep.subr.bf16.mxu0 %v4266_v10  ;;  %3971 = vmatprep.subr.bf16.mxu1 %v4289_v19 }
  0x33   : > { %717 = vmatpush1.bf16.msra.mxu0 %v4268_v11  ;;  %3972 = vmatpush3.bf16.msra.mxu1 %v4289_v19 }
  0x34   : > { %718 = vmatprep.subr.bf16.mxu0 %v4269_v14  ;;  %3973 = vmatprep.subr.bf16.mxu1 %v4290_v21 }
  0x37   : > { %719 = vmatpush1.bf16.msra.mxu0 %v4271_v16  ;;  %3974 = vmatpush3.bf16.msra.mxu1 %v4290_v21 }
  0x38   : > { %720 = vmatprep.subr.bf16.mxu0 %v4272_v17  ;;  %3975 = vmatprep.subr.bf16.mxu1 %v4291_v23 }
  0x3b   : > { %721 = vmatpush1.bf16.msra.mxu0 %v4274_v18  ;;  %3976 = vmatpush3.bf16.msra.mxu1 %v4291_v23 }
  0x3c   : > { %722 = vmatprep.subr.bf16.mxu0 %v4275_v20  ;;  %3977 = vmatprep.subr.bf16.mxu1 %v4292_v24 }
  0x3f   : > { %723 = vmatpush1.bf16.msra.mxu0 %v4277_v22  ;;  %3978 = vmatpush3.bf16.msra.mxu1 %v4292_v24 }
  0x40   : > { %3979 = vmatprep.subr.bf16.mxu1 %v4293_v26 }
  0x42   : > { %741 = vmatmul.mubr.bf16.vlgmr.msra.gmra.mrb[0].mxu0 %v484_v8 }
  0x43   : > { %750 = vmatprep.mubr.bf16.mxu0 %v4670_v2  ;;  %3980 = vmatpush3.bf16.msra.mxu1 %v4293_v26 }
  0x46   : > { %3982 = vmatmul.mubr.bf16.vlgmr.msra.gmra.mrb[0].mxu1 %v486_v25 }
  0x47   : > { %3985 = vmatprep.mubr.bf16.mxu1 %v488_v27 }
  0x4a   : > { %751 = vmatmul.mubr.bf16.gmra.mrb[4].mxu0 %v486_v25 }
  0x4b   : > { %760 = vmatprep.mubr.bf16.mxu0 %v4670_v2 }
  0x4e   : > { %3986 = vmatmul.mubr.bf16.gmra.mrb[4].mxu1 %v4897_v28 }
  0x4f   : > { %3989 = vmatprep.mubr.bf16.mxu1 %v4900_v29 }
  0x52   : > { %761 = vmatmul.mubr.bf16.gmra.mrb[8].mxu0 %v488_v27 }
  0x53   : > { %770 = vmatprep.mubr.bf16.mxu0 %v4670_v2 }
  0x56   : > { %3990 = vmatmul.mubr.bf16.gmra.mrb[8].mxu1 %v4907_v30 }
  0x57   : > { %3993 = vmatprep.mubr.bf16.mxu1 %v4910_v31 }
  0x5a   : > { %771 = vmatmul.mubr.bf16.gmra.mrb[12].mxu0 %v4897_v28 }
  0x5b   : > { %780 = vmatprep.mubr.bf16.mxu0 %v4670_v2 }
  0x5e   : > { %3994 = vmatmul.mubr.bf16.gmra.mrb[12].mxu1 %v4917_v32 }
  0x62   : > { %781 = vmatmul.mubr.bf16.gmra.mrb[16].mxu0 %v4900_v29 }
  0x63   : > { %790 = vmatprep.mubr.bf16.mxu0 %v4670_v2 }
  0x6a   : > { %791 = vmatmul.mubr.bf16.gmra.mrb[20].mxu0 %v4907_v30 }
  0x6b   : > { %800 = vmatprep.mubr.bf16.mxu0 %v4670_v2 }
  0x72   : > { %801 = vmatmul.mubr.bf16.gmra.mrb[24].mxu0 %v4910_v31 }
  0x73   : > { %810 = vmatprep.mubr.bf16.mxu0 %v4670_v2 }
  0x7a   : > { %811 = vmatmul.mubr.bf16.gmra.mrb[28].mxu0 %v4917_v32 }
 0x115   : > { %v742_v33 = vpop.f32.mrb[0].mxu0 }
 0x116   : > { %v744_v34 = vpop.f32.mrb[1].mxu0 }
 0x117   : > { %v746_v35 = vpop.f32.mrb[2].mxu0 }
 0x118   : > { %v918_v36 = vpack.c.bf16 %v746_v35, %v742_v33  ;;  %v748_v37 = vpop.f32.mrb[3].mxu0 }
 0x119   : > { %v926_v38 = vpack.c.bf16 %v748_v37, %v744_v34  ;;  %v3983_v45 = vpop.f32.mrb[0].mxu1 }
 0x11a   : > { %4005 = vmatprep.mubr.bf16.mxu1 %v918_v36  ;;  %v855_v46 = vpop.f32.mrb[1].mxu1 }
 0x11b   : > { %3997 = vmatprep.subr.bf16.mxu1 %v926_v38  ;;  %v3984_v48 = vpop.f32.mrb[2].mxu1 }
 0x11c   : > { %3998 = vmatpush3.bf16.xpose.msra.mxu1 %v926_v38  ;;  %v1290_v50 = vpack.c.bf16 %v3984_v48, %v3983_v45  ;;  %v858_v51 = vpop.f32.mrb[3].mxu1 }
 0x11d   : > { %v752_v39 = vpop.f32.mrb[4].mxu0  ;;  %v1289_v53 = vpack.c.bf16 %v858_v51, %v855_v46 }
 0x11e   : > { %v754_v40 = vpop.f32.mrb[5].mxu0 }
 0x11f   : > { %v756_v41 = vpop.f32.mrb[6].mxu0 }
 0x120   : > { %v919_v42 = vpack.c.bf16 %v756_v41, %v752_v39  ;;  %v758_v43 = vpop.f32.mrb[7].mxu0 }
 0x121   : > { %v927_v44 = vpack.c.bf16 %v758_v43, %v754_v40  ;;  %v3987_v57 = vpop.f32.mrb[4].mxu1 }
 0x122   : > { %v871_v58 = vpop.f32.mrb[5].mxu1 }
 0x123   : > { %3999 = vmatprep.subr.bf16.mxu1 %v927_v44  ;;  %v3988_v60 = vpop.f32.mrb[6].mxu1 }
 0x124   : > { %4000 = vmatpush3.bf16.xpose.msra.mxu1 %v927_v44  ;;  %v1292_v62 = vpack.c.bf16 %v3988_v60, %v3987_v57  ;;  %v874_v63 = vpop.f32.mrb[7].mxu1 }
 0x125   : > { %v762_v47 = vpop.f32.mrb[8].mxu0  ;;  %v1291_v1 = vpack.c.bf16 %v874_v63, %v871_v58 }
 0x126   : > { %v764_v49 = vpop.f32.mrb[9].mxu0 }
 0x127   : > { %v766_v52 = vpop.f32.mrb[10].mxu0 }
 0x128   : > { %v920_v54 = vpack.c.bf16 %v766_v52, %v762_v47  ;;  %v768_v55 = vpop.f32.mrb[11].mxu0  ;;  %v1080_v47 = vlaneseq }
 0x129   : > { %v928_v56 = vpack.c.bf16 %v768_v55, %v764_v49  ;;  %v3991_v6 = vpop.f32.mrb[8].mxu1  ;;  %v4938_v49 = vstv %s479_s1  ;;  %s4575_s1 = sshll.u32 %s4674_s23, 4  ;;  %s4576_s1 = int_to_ptr.vmem [resolvable:$false] %s4575_s1 }
 0x12a   : > { %v887_v7 = vpop.f32.mrb[9].mxu1  ;;  %v4936_v48 = vand.u32 127, %v1080_v47  ;;  %vm2939_vm4 = vcmp.gt.s32.totalorder %v4938_v49, 1 }
 0x12b   : > { %4001 = vmatprep.subr.bf16.mxu1 %v928_v56  ;;  %v3992_v9 = vpop.f32.mrb[10].mxu1 }
 0x12c   : > { %4002 = vmatpush3.bf16.xpose.msra.mxu1 %v928_v56  ;;  %v4925_v11 = vpack.c.bf16 %v3992_v9, %v3991_v6  ;;  %v890_v12 = vpop.f32.mrb[11].mxu1  ;;  %vm4942_vm0 = vcmp.lt.s32.totalorder %v4936_v48, %v4938_v49  ;;  %vm2951_vm5 = vcmp.eq.s32.totalorder %v4936_v48, 0 }
 0x12d   : > { %v772_v59 = vpop.f32.mrb[12].mxu0  ;;  %v4927_v14 = vpack.c.bf16 %v890_v12, %v887_v7 }
 0x12e   : > { %v774_v61 = vpop.f32.mrb[13].mxu0 }
 0x12f   : > { %v776_v0 = vpop.f32.mrb[14].mxu0 }
 0x130   : > { %v921_v3 = vpack.c.bf16 %v776_v0, %v772_v59  ;;  %v778_v4 = vpop.f32.mrb[15].mxu0 }
 0x131   : > { %v929_v5 = vpack.c.bf16 %v778_v4, %v774_v61  ;;  %v3995_v18 = vpop.f32.mrb[12].mxu1 }
 0x132   : > { %v903_v19 = vpop.f32.mrb[13].mxu1 }
 0x133   : > { %4003 = vmatprep.subr.bf16.mxu1 %v929_v5  ;;  %v3996_v21 = vpop.f32.mrb[14].mxu1 }
 0x134   : > { %4004 = vmatpush3.bf16.xpose.msra.mxu1 %v929_v5  ;;  %v4929_v23 = vpack.c.bf16 %v3996_v21, %v3995_v18  ;;  %v906_v24 = vpop.f32.mrb[15].mxu1 }
 0x135   : > { %v782_v8 = vpop.f32.mrb[16].mxu0  ;;  %4029 = vmatprep.subr.bf16.mxu1 %v1289_v53  ;;  %v4931_v26 = vpack.c.bf16 %v906_v24, %v903_v19 }
 0x136   : > { %v784_v10 = vpop.f32.mrb[17].mxu0 }
 0x137   : > { %v786_v13 = vpop.f32.mrb[18].mxu0 }
 0x138   : > { %v922_v15 = vpack.c.bf16 %v786_v13, %v782_v8  ;;  %v788_v16 = vpop.f32.mrb[19].mxu0 }
 0x139   : > { %v930_v17 = vpack.c.bf16 %v788_v16, %v784_v10 }
 0x13a   : > { %4021 = vmatprep.mubr.bf16.mxu0 %v922_v15 }
 0x13b   : > { %4006 = vmatmul.mubr.bf16.vlgmr.msra.gmra.mrb[16].mxu1 %v919_v42  ;;  %4013 = vmatprep.subr.bf16.mxu0 %v930_v17 }
 0x13c   : > { %4009 = vmatprep.mubr.bf16.mxu1 %v920_v54  ;;  %4014 = vmatpush3.bf16.xpose.msra.mxu0 %v930_v17 }
 0x13d   : > { %v792_v20 = vpop.f32.mrb[20].mxu0  ;;  %4030 = vmatpush3.bf16.msra.mxu1 %v1289_v53 }
 0x13e   : > { %v794_v22 = vpop.f32.mrb[21].mxu0  ;;  %4031 = vmatprep.subr.bf16.mxu1 %v1290_v50 }
 0x13f   : > { %v796_v25 = vpop.f32.mrb[22].mxu0 }
 0x140   : > { %v923_v27 = vpack.c.bf16 %v796_v25, %v792_v20  ;;  %v798_v33 = vpop.f32.mrb[23].mxu0 }
 0x141   : > { %v931_v34 = vpack.c.bf16 %v798_v33, %v794_v22  ;;  %4032 = vmatpush3.bf16.msra.mxu1 %v1290_v50  ;;  %v4995_v22 = vstv %s482_s26 }
 0x142   : > { %4033 = vmatprep.subr.bf16.mxu1 %v1291_v1  ;;  %vm4999_vm2 = vcmp.lt.s32.totalorder %v4936_v48, %v4995_v22  ;;  %vm2941_vm7 = vcmp.gt.s32.totalorder %v4995_v22, 1 }
 0x143   : > { %4010 = vmatmul.mubr.bf16.gmra.mrb[20].mxu1 %v921_v3  ;;  %4015 = vmatprep.subr.bf16.mxu0 %v931_v34 }
 0x144   : > { %4016 = vmatpush3.bf16.xpose.msra.mxu0 %v931_v34 }
 0x145   : > { %v802_v35 = vpop.f32.mrb[24].mxu0  ;;  %4034 = vmatpush3.bf16.msra.mxu1 %v1291_v1 }
 0x146   : > { %v804_v36 = vpop.f32.mrb[25].mxu0  ;;  %4035 = vmatprep.subr.bf16.mxu1 %v1292_v62 }
 0x147   : > { %v806_v37 = vpop.f32.mrb[26].mxu0 }
 0x148   : > { %v924_v38 = vpack.c.bf16 %v806_v37, %v802_v35  ;;  %v808_v39 = vpop.f32.mrb[27].mxu0 }
 0x149   : > { %v932_v40 = vpack.c.bf16 %v808_v39, %v804_v36  ;;  %4036 = vmatpush3.bf16.msra.mxu1 %v1292_v62 }
 0x14a   : > { %4045 = vmatprep.subr.bf16.mxu1 %v4927_v14 }
 0x14b   : > { %4017 = vmatprep.subr.bf16.mxu0 %v932_v40 }
 0x14c   : > { %4018 = vmatpush3.bf16.xpose.msra.mxu0 %v932_v40 }
 0x14d   : > { %v812_v41 = vpop.f32.mrb[28].mxu0 }
 0x14e   : > { %v814_v42 = vpop.f32.mrb[29].mxu0 }
 0x14f   : > { %v816_v43 = vpop.f32.mrb[30].mxu0 }
 0x150   : > { %v925_v44 = vpack.c.bf16 %v816_v43, %v812_v41  ;;  %v818_v45 = vpop.f32.mrb[31].mxu0 }
 0x151   : > { %v933_v46 = vpack.c.bf16 %v818_v45, %v814_v42 }
 0x153   : > { %4019 = vmatprep.subr.bf16.mxu0 %v933_v46 }
 0x154   : > { %4020 = vmatpush3.bf16.xpose.msra.mxu0 %v933_v46 }
 0x15b   : > { %4022 = vmatmul.mubr.bf16.vlgmr.msra.gmra.mrb[32].mxu0 %v923_v27 }
 0x15c   : > { %4025 = vmatprep.mubr.bf16.mxu0 %v924_v38 }
 0x163   : > { %4026 = vmatmul.mubr.bf16.gmra.mrb[36].mxu0 %v925_v44 }
 0x20e   : > { %v4007_v50 = vpop.f32.mrb[16].mxu1 }
 0x20f   : > { %v1066_v52 = vmul.f32 0.088388346, %v4007_v50  ;;  %v968_v53 = vpop.f32.mrb[17].mxu1 }
 0x210   : > { %v1064_v54 = vmul.f32 0.088388346, %v968_v53  ;;  %v4008_v55 = vpop.f32.mrb[18].mxu1 }
 0x211   : > { %v1067_v56 = vmul.f32 0.088388346, %v4008_v55  ;;  %v971_v57 = vpop.f32.mrb[19].mxu1  ;;  %v4948_v58 = vsel %vm4942_vm0, %v1066_v52, -1e+09 }
 0x212   : > { %v1065_v59 = vmul.f32 0.088388346, %v971_v57  ;;  %v1111_v60 = vsel %vm1104_vm1, %v4948_v58, -inf  ;;  %v4954_v61 = vsel %vm4942_vm0, %v1064_v54, -1e+09 }
 0x213   : > { %1112 = vmax.xlane.f32.xlu1 %v1111_v60  ;;  %v1105_v62 = vsel %vm1104_vm1, %v4954_v61, -inf  ;;  %v4960_v63 = vsel %vm4942_vm0, %v1067_v56, -1e+09 }
 0x214   : > { %1106 = vmax.xlane.f32.xlu0 %v1105_v62  ;;  %v4964_v0 = vsel %vm4942_vm0, %v1065_v59, -1e+09  ;;  %v1114_v3 = vsel %vm1104_vm1, %v4960_v63, -inf }
 0x215   : > { %v1108_v5 = vsel %vm1104_vm1, %v4964_v0, -inf }
 0x216   : > { %v4011_v1 = vpop.f32.mrb[20].mxu1 }
 0x217   : > { %1115 = vmax.xlane.f32.xlu1 %v1114_v3  ;;  %v984_v4 = vpop.f32.mrb[21].mxu1  ;;  %v1070_v6 = vmul.f32 0.088388346, %v4011_v1 }
 0x218   : > { %v1068_v7 = vmul.f32 0.088388346, %v984_v4  ;;  %1109 = vmax.xlane.f32.xlu0 %v1108_v5  ;;  %v4012_v8 = vpop.f32.mrb[22].mxu1 }
 0x219   : > { %v987_v9 = vpop.f32.mrb[23].mxu1  ;;  %v1071_v10 = vmul.f32 0.088388346, %v4012_v8  ;;  %v4982_v17 = vsel %vm4942_vm0, %v1070_v6, -1e+09 }
 0x21a   : > { %v1069_v12 = vmul.f32 0.088388346, %v987_v9  ;;  %v4972_v13 = vsel %vm4942_vm0, %v1068_v7, -1e+09  ;;  %v1123_v20 = vsel %vm1104_vm1, %v4982_v17, -inf }
 0x21b   : > { %v1117_v15 = vsel %vm1104_vm1, %v4972_v13, -inf  ;;  %v4988_v19 = vsel %vm4942_vm0, %v1071_v10, -1e+09 }
 0x21c   : > { %1118 = vmax.xlane.f32.xlu0 %v1117_v15  ;;  %v4978_v16 = vsel %vm4942_vm0, %v1069_v12, -1e+09  ;;  %v1126_v21 = vsel %vm1104_vm1, %v4988_v19, -inf }
 0x21d   : > { %v1120_v18 = vsel %vm1104_vm1, %v4978_v16, -inf }
 0x21e   : > { %1121 = vmax.xlane.f32.xlu1 %v1120_v18 }
 0x220   : > { %1124 = vmax.xlane.f32.xlu0 %v1123_v20 }
 0x222   : > { %1127 = vmax.xlane.f32.xlu1 %v1126_v21 }
 0x22e   : > { %v4023_v24 = vpop.f32.mrb[32].mxu0 }
 0x22f   : > { %v1033_v25 = vpop.f32.mrb[33].mxu0  ;;  %v1074_v33 = vmul.f32 0.088388346, %v4023_v24 }
 0x230   : > { %v1072_v34 = vmul.f32 0.088388346, %v1033_v25  ;;  %v4024_v35 = vpop.f32.mrb[34].mxu0 }
 0x231   : > { %v1036_v36 = vpop.f32.mrb[35].mxu0  ;;  %v1075_v37 = vmul.f32 0.088388346, %v4024_v35  ;;  %v5015_v42 = vsel %vm4999_vm2, %v1074_v33, -1e+09 }
 0x232   : > { %v1073_v38 = vmul.f32 0.088388346, %v1036_v36  ;;  %v5005_v39 = vsel %vm4999_vm2, %v1072_v34, -1e+09  ;;  %v1135_v50 = vsel %vm1104_vm1, %v5015_v42, -inf }
 0x233   : > { %v1129_v40 = vsel %vm1104_vm1, %v5005_v39, -inf  ;;  %v5021_v45 = vsel %vm4999_vm2, %v1075_v37, -1e+09 }
 0x234   : > { %1130 = vmax.xlane.f32.xlu0 %v1129_v40  ;;  %v5011_v41 = vsel %vm4999_vm2, %v1073_v38, -1e+09  ;;  %v1138_v56 = vsel %vm1104_vm1, %v5021_v45, -inf }
 0x235   : > { %v1132_v43 = vsel %vm1104_vm1, %v5011_v41, -inf }
 0x236   : > { %1133 = vmax.xlane.f32.xlu1 %v1132_v43  ;;  %v4027_v44 = vpop.f32.mrb[36].mxu0 }
 0x237   : > { %v1049_v46 = vpop.f32.mrb[37].mxu0  ;;  %v1078_v52 = vmul.f32 0.088388346, %v4027_v44 }
 0x238   : > { %v1076_v53 = vmul.f32 0.088388346, %v1049_v46  ;;  %1136 = vmax.xlane.f32.xlu0 %v1135_v50  ;;  %v4028_v54 = vpop.f32.mrb[38].mxu0 }
 0x239   : > { %v1052_v55 = vpop.f32.mrb[39].mxu0  ;;  %v1079_v57 = vmul.f32 0.088388346, %v4028_v54  ;;  %v5039_v3 = vsel %vm4999_vm2, %v1078_v52, -1e+09 }
 0x23a   : > { %v1077_v59 = vmul.f32 0.088388346, %v1052_v55  ;;  %1139 = vmax.xlane.f32.xlu1 %v1138_v56  ;;  %v5029_v60 = vsel %vm4999_vm2, %v1076_v53, -1e+09  ;;  %v1147_v6 = vsel %vm1104_vm1, %v5039_v3, -inf }
 0x23b   : > { %v1141_v62 = vsel %vm1104_vm1, %v5029_v60, -inf  ;;  %v5045_v5 = vsel %vm4999_vm2, %v1079_v57, -1e+09 }
 0x23c   : > { %1142 = vmax.xlane.f32.xlu0 %v1141_v62  ;;  %v5035_v1 = vsel %vm4999_vm2, %v1077_v59, -1e+09  ;;  %v1150_v7 = vsel %vm1104_vm1, %v5045_v5, -inf }
 0x23d   : > { %v1144_v4 = vsel %vm1104_vm1, %v5035_v1, -inf }
 0x23e   : > { %1145 = vmax.xlane.f32.xlu1 %v1144_v4 }
 0x240   : > { %1148 = vmax.xlane.f32.xlu0 %v1147_v6 }
 0x242   : > { %1151 = vmax.xlane.f32.xlu1 %v1150_v7 }
 0x2a0   : > { %v1113_v8 = vpop.xlane.xlu1 %1112 }
 0x2a1   : > { %v1155_v9 = vsub.f32 %v4948_v58, %v1113_v8  ;;  %v1107_v10 = vpop.xlane.xlu0 %1106 }
 0x2a2   : > { %v1153_v12 = vsub.f32 %v4954_v61, %v1107_v10 }
 0x2a3   : > { %v1173_v15 = vmul.f32 1.442695, %v1155_v9 }
 0x2a4   : > { %v1169_v18 = vmul.f32 1.442695, %v1153_v12  ;;  %v1116_v20 = vpop.xlane.xlu1 %1115 }
 0x2a5   : > { %v1156_v21 = vsub.f32 %v4960_v63, %v1116_v20  ;;  %v1110_v24 = vpop.xlane.xlu0 %1109 }
 0x2a6   : > { %4358 = vpow2.f32 %v1169_v18  ;;  %v1154_v25 = vsub.f32 %v4964_v0, %v1110_v24 }
 0x2a7   : > { %4360 = vpow2.f32 %v1173_v15  ;;  %v1175_v33 = vmul.f32 1.442695, %v1156_v21 }
 0x2a8   : > { %v1171_v34 = vmul.f32 1.442695, %v1154_v25 }
 0x2a9   : > { %v1119_v35 = vpop.xlane.xlu0 %1118 }
 0x2aa   : > { %4362 = vpow2.f32 %v1171_v34  ;;  %v1157_v36 = vsub.f32 %v4972_v13, %v1119_v35 }
 0x2ab   : > { %v1122_v58 = vpop.xlane.xlu1 %1121  ;;  %4364 = vpow2.f32 %v1175_v33 }
 0x2ac   : > { %v1177_v37 = vmul.f32 1.442695, %v1157_v36  ;;  %v1158_v61 = vsub.f32 %v4978_v16, %v1122_v58 }
 0x2ad   : > { %v1125_v38 = vpop.xlane.xlu0 %1124 }
 0x2ae   : > { %4366 = vpow2.f32 %v1177_v37  ;;  %v1179_v40 = vmul.f32 1.442695, %v1158_v61  ;;  %v1159_v63 = vsub.f32 %v4982_v17, %v1125_v38 }
 0x2af   : > { %v1128_v43 = vpop.xlane.xlu1 %1127 }
 0x2b0   : > { %v5058_v44 = vpop.eup %4358  ;;  %4368 = vpow2.f32 %v1179_v40  ;;  %v1181_v0 = vmul.f32 1.442695, %v1159_v63  ;;  %v1160_v46 = vsub.f32 %v4988_v19, %v1128_v43 }
 0x2b1   : > { %v1201_v13 = vsel %vm1104_vm1, %v5058_v44, 0.0  ;;  %v5063_v50 = vpop.eup %4360 }
 0x2b2   : > { %4370 = vpow2.f32 %v1181_v0  ;;  %v1183_v52 = vmul.f32 1.442695, %v1160_v46  ;;  %1202 = vadd.xlane.f32.xlu0 %v1201_v13  ;;  %v1207_v17 = vsel %vm1104_vm1, %v5063_v50, 0.0 }
 0x2b4   : > { %v5065_v16 = vpop.eup %4362  ;;  %4372 = vpow2.f32 %v1183_v52 }
 0x2b5   : > { %v1204_v53 = vsel %vm1104_vm1, %v5065_v16, 0.0  ;;  %v5071_v54 = vpop.eup %4364 }
 0x2b6   : > { %1208 = vadd.xlane.f32.xlu0 %v1207_v17  ;;  %1205 = vadd.xlane.f32.xlu1 %v1204_v53  ;;  %v1210_v56 = vsel %vm1104_vm1, %v5071_v54, 0.0 }
 0x2b8   : > { %v5073_v19 = vpop.eup %4366 }
 0x2b9   : > { %v1213_v55 = vsel %vm1104_vm1, %v5073_v19, 0.0 }
 0x2ba   : > { %v5079_v57 = vpop.eup %4368  ;;  %1214 = vadd.xlane.f32.xlu0 %v1213_v55  ;;  %1211 = vadd.xlane.f32.xlu1 %v1210_v56 }
 0x2bb   : > { %v1216_v4 = vsel %vm1104_vm1, %v5079_v57, 0.0 }
 0x2bc   : > { %v5081_v59 = vpop.eup %4370 }
 0x2bd   : > { %v1219_v62 = vsel %vm1104_vm1, %v5081_v59, 0.0 }
 0x2be   : > { %v5087_v6 = vpop.eup %4372  ;;  %1220 = vadd.xlane.f32.xlu0 %v1219_v62  ;;  %1217 = vadd.xlane.f32.xlu1 %v1216_v4 }
 0x2bf   : > { %v1222_v8 = vsel %vm1104_vm1, %v5087_v6, 0.0 }
 0x2c1   : > { %v1131_v7 = vpop.xlane.xlu0 %1130 }
 0x2c2   : > { %v1161_v9 = vsub.f32 %v5005_v39, %v1131_v7  ;;  %1223 = vadd.xlane.f32.xlu1 %v1222_v8  ;;  %v4294_v8 = vld [vmem:[%s6118_s3] sm:$0xff]  }
 0x2c3   : > { %v1134_v10 = vpop.xlane.xlu1 %1133  ;;  %4061 = vmatprep.subr.bf16.mxu0 %v4294_v8 }
 0x2c4   : > { %v1185_v12 = vmul.f32 1.442695, %v1161_v9  ;;  %v1162_v15 = vsub.f32 %v5011_v41, %v1134_v10  ;;  %v4295_v9 = vld [vmem:[%s6118_s3 + $0x8] sm:$0xff]   ;;  %4062 = vmatpush3.bf16.msra.mxu0 %v4294_v8  ;;  %v4296_v10 = vld [vmem:[%s6118_s3 + $0x10] sm:$0xff]  }
 0x2c5   : > { %v1137_v18 = vpop.xlane.xlu0 %1136  ;;  %4063 = vmatprep.subr.bf16.mxu0 %v4295_v9 }
 0x2c6   : > { %4374 = vpow2.f32 %v1185_v12  ;;  %v1187_v20 = vmul.f32 1.442695, %v1162_v15  ;;  %v1163_v21 = vsub.f32 %v5015_v42, %v1137_v18  ;;  %v4297_v12 = vld [vmem:[%s6118_s3 + $0x18] sm:$0xff]   ;;  %v4298_v15 = vld [vmem:[%s6118_s3 + $0x20] sm:$0xff]   ;;  %v4299_v18 = vld [vmem:[%s6118_s3 + $0x28] sm:$0xff]  }
 0x2c7   : > { %v1140_v24 = vpop.xlane.xlu1 %1139 }
 0x2c8   : > { %4376 = vpow2.f32 %v1187_v20  ;;  %v1189_v25 = vmul.f32 1.442695, %v1163_v21  ;;  %v1164_v33 = vsub.f32 %v5021_v45, %v1140_v24  ;;  %4064 = vmatpush3.bf16.msra.mxu0 %v4295_v9  ;;  %v4300_v20 = vld [vmem:[%s6118_s3 + $0x30] sm:$0xff]  }
 0x2c9   : > { %v1143_v34 = vpop.xlane.xlu0 %1142  ;;  %4065 = vmatprep.subr.bf16.mxu0 %v4296_v10 }
 0x2ca   : > { %4378 = vpow2.f32 %v1189_v25  ;;  %v1191_v35 = vmul.f32 1.442695, %v1164_v33  ;;  %v1165_v39 = vsub.f32 %v5029_v60, %v1143_v34 }
 0x2cb   : > { %v1146_v36 = vpop.xlane.xlu1 %1145 }
 0x2cc   : > { %4380 = vpow2.f32 %v1191_v35  ;;  %v1193_v58 = vmul.f32 1.442695, %v1165_v39  ;;  %v1166_v41 = vsub.f32 %v5035_v1, %v1146_v36  ;;  %4066 = vmatpush3.bf16.msra.mxu0 %v4296_v10 }
 0x2cd   : > { %v1149_v37 = vpop.xlane.xlu0 %1148  ;;  %4067 = vmatprep.subr.bf16.mxu0 %v4297_v12 }
 0x2ce   : > { %4382 = vpow2.f32 %v1193_v58  ;;  %v1195_v61 = vmul.f32 1.442695, %v1166_v41  ;;  %v1167_v42 = vsub.f32 %v5039_v3, %v1149_v37 }
 0x2cf   : > { %v1152_v38 = vpop.xlane.xlu1 %1151 }
 0x2d0   : > { %v5098_v40 = vpop.eup %4374  ;;  %4384 = vpow2.f32 %v1195_v61  ;;  %v1197_v45 = vmul.f32 1.442695, %v1167_v42  ;;  %v1168_v63 = vsub.f32 %v5045_v5, %v1152_v38  ;;  %4068 = vmatpush3.bf16.msra.mxu0 %v4297_v12 }
 0x2d1   : > { %v1225_v60 = vsel %vm1104_vm1, %v5098_v40, 0.0  ;;  %4069 = vmatprep.subr.bf16.mxu0 %v4298_v15 }
 0x2d2   : > { %v5103_v43 = vpop.eup %4376  ;;  %4386 = vpow2.f32 %v1197_v45  ;;  %v1199_v0 = vmul.f32 1.442695, %v1168_v63  ;;  %1226 = vadd.xlane.f32.xlu0 %v1225_v60 }
 0x2d3   : > { %v1228_v1 = vsel %vm1104_vm1, %v5103_v43, 0.0 }
 0x2d4   : > { %v5107_v46 = vpop.eup %4378  ;;  %4388 = vpow2.f32 %v1199_v0  ;;  %1229 = vadd.xlane.f32.xlu1 %v1228_v1  ;;  %4070 = vmatpush3.bf16.msra.mxu0 %v4298_v15 }
 0x2d5   : > { %v1231_v3 = vsel %vm1104_vm1, %v5107_v46, 0.0  ;;  %4071 = vmatprep.subr.bf16.mxu0 %v4299_v18 }
 0x2d6   : > { %v5111_v13 = vpop.eup %4380  ;;  %1232 = vadd.xlane.f32.xlu0 %v1231_v3 }
 0x2d7   : > { %v1234_v5 = vsel %vm1104_vm1, %v5111_v13, 0.0 }
 0x2d8   : > { %v5115_v52 = vpop.eup %4382  ;;  %1235 = vadd.xlane.f32.xlu1 %v1234_v5  ;;  %4072 = vmatpush3.bf16.msra.mxu0 %v4299_v18 }
 0x2d9   : > { %v1237_v17 = vsel %vm1104_vm1, %v5115_v52, 0.0  ;;  %4073 = vmatprep.subr.bf16.mxu0 %v4300_v20 }
 0x2da   : > { %v5119_v53 = vpop.eup %4384  ;;  %1238 = vadd.xlane.f32.xlu0 %v1237_v17 }
 0x2db   : > { %v1240_v55 = vsel %vm1104_vm1, %v5119_v53, 0.0 }
 0x2dc   : > { %v5123_v56 = vpop.eup %4386  ;;  %1241 = vadd.xlane.f32.xlu1 %v1240_v55  ;;  %4074 = vmatpush3.bf16.msra.mxu0 %v4300_v20 }
 0x2dd   : > { %v1243_v62 = vsel %vm1104_vm1, %v5123_v56, 0.0 }
 0x2de   : > { %v5127_v4 = vpop.eup %4388  ;;  %1244 = vadd.xlane.f32.xlu0 %v1243_v62 }
 0x2df   : > { %v1246_v7 = vsel %vm1104_vm1, %v5127_v4, 0.0 }
 0x2e0   : > { %1247 = vadd.xlane.f32.xlu1 %v1246_v7 }
 0x33f   : > { %v1203_v21 = vpop.xlane.xlu0 %1202 }
 0x340   : > { %4390 = vrcp.f32 %v1203_v21 }
 0x343   : > { %v1209_v24 = vpop.xlane.xlu0 %1208  ;;  %v1206_v25 = vpop.xlane.xlu1 %1205 }
 0x344   : > { %4392 = vrcp.f32 %v1206_v25 }
 0x345   : > { %4394 = vrcp.f32 %v1209_v24 }
 0x347   : > { %v1215_v33 = vpop.xlane.xlu0 %1214  ;;  %v1212_v34 = vpop.xlane.xlu1 %1211 }
 0x348   : > { %4396 = vrcp.f32 %v1212_v34 }
 0x349   : > { %4398 = vrcp.f32 %v1215_v33 }
 0x34a   : > { %v4391_v36 = vpop.eup %4390 }
 0x34b   : > { %v1221_v35 = vpop.xlane.xlu0 %1220  ;;  %v1218_v39 = vpop.xlane.xlu1 %1217  ;;  %v1265_v37 = vmul.f32 %v4391_v36, %v5058_v44 }
 0x34c   : > { %4400 = vrcp.f32 %v1218_v39 }
 0x34d   : > { %4402 = vrcp.f32 %v1221_v35 }
 0x34e   : > { %v4393_v58 = vpop.eup %4392 }
 0x34f   : > { %v1224_v41 = vpop.xlane.xlu1 %1223  ;;  %v1266_v61 = vmul.f32 %v4393_v58, %v5065_v16  ;;  %v4395_v42 = vpop.eup %4394 }
 0x350   : > { %4404 = vrcp.f32 %v1224_v41  ;;  %v1267_v63 = vmul.f32 %v4395_v42, %v5063_v50 }
 0x351   : > { %v1281_v38 = vpack.c.bf16 %v1266_v61, %v1265_v37 }
 0x352   : > { %v4397_v45 = vpop.eup %4396 }
 0x353   : > { %v1268_v60 = vmul.f32 %v4397_v45, %v5071_v54  ;;  %4037 = vmatprep.mubr.msk.bf16.mxu1 %vm1104_vm1, %v1281_v38  ;;  %v4399_v0 = vpop.eup %4398 }
 0x354   : > { %v1269_v17 = vmul.f32 %v4399_v0, %v5073_v19 }
 0x355   : > { %v1282_v1 = vpack.c.bf16 %v1268_v60, %v1267_v63 }
 0x356   : > { %v4401_v3 = vpop.eup %4400 }
 0x357   : > { %v4403_v5 = vpop.eup %4402  ;;  %4038 = vmatmul.mubr.msk.bf16.vlgmr.msra.gmra.mrb[24].mxu1 %vm1104_vm1, %v1282_v1  ;;  %v1270_v44 = vmul.f32 %v4401_v3, %v5079_v57 }
 0x358   : > { %4046 = vmatpush3.bf16.msra.mxu1 %v4927_v14  ;;  %v1271_v54 = vmul.f32 %v4403_v5, %v5081_v59 }
 0x359   : > { %4047 = vmatprep.subr.bf16.mxu1 %v4925_v11  ;;  %v1283_v50 = vpack.c.bf16 %v1270_v44, %v1269_v17 }
 0x35a   : > { %v4405_v16 = vpop.eup %4404 }
 0x35b   : > { %v1272_v55 = vmul.f32 %v4405_v16, %v5087_v6  ;;  %4041 = vmatprep.mubr.msk.bf16.mxu1 %vm1104_vm1, %v1283_v50 }
 0x35c   : > { %4048 = vmatpush3.bf16.msra.mxu1 %v4925_v11 }
 0x35d   : > { %v1284_v62 = vpack.c.bf16 %v1272_v55, %v1271_v54  ;;  %4049 = vmatprep.subr.bf16.mxu1 %v4931_v26 }
 0x35f   : > { %v1227_v19 = vpop.xlane.xlu0 %1226  ;;  %4042 = vmatmul.mubr.msk.bf16.gmra.mrb[28].mxu1 %vm1104_vm1, %v1284_v62 }
 0x360   : > { %4406 = vrcp.f32 %v1227_v19  ;;  %4050 = vmatpush3.bf16.msra.mxu1 %v4931_v26 }
 0x361   : > { %v1230_v14 = vpop.xlane.xlu1 %1229  ;;  %4051 = vmatprep.subr.bf16.mxu1 %v4929_v23 }
 0x362   : > { %4408 = vrcp.f32 %v1230_v14  ;;  %v4554_v14 = vld [vmem:[%s4834_s28] sm:$0xff]  }
 0x363   : > { %v1233_v57 = vpop.xlane.xlu0 %1232 }
 0x364   : > { %4410 = vrcp.f32 %v1233_v57  ;;  %4052 = vmatpush3.bf16.msra.mxu1 %v4929_v23  ;;  %v1620_v57 = vunpack.c.l.bf16 %v4554_v14 }
 0x365   : > { %v1236_v59 = vpop.xlane.xlu1 %1235 }
 0x366   : > { %4412 = vrcp.f32 %v1236_v59 }
 0x367   : > { %v1239_v11 = vpop.xlane.xlu0 %1238 }
 0x368   : > { %4414 = vrcp.f32 %v1239_v11  ;;  %v1621_v11 = vunpack.c.h.bf16 %v4554_v14 }
 0x369   : > { %v1242_v6 = vpop.xlane.xlu1 %1241 }
 0x36a   : > { %v4407_v7 = vpop.eup %4406  ;;  %4416 = vrcp.f32 %v1242_v6 }
 0x36b   : > { %v1245_v8 = vpop.xlane.xlu0 %1244  ;;  %v1273_v26 = vmul.f32 %v4407_v7, %v5098_v40  ;;  %v4555_v7 = vld [vmem:[%s4834_s28 + $0x8] sm:$0xff]  }
 0x36c   : > { %v4409_v9 = vpop.eup %4408  ;;  %4418 = vrcp.f32 %v1245_v8  ;;  %v1622_v8 = vunpack.c.l.bf16 %v4555_v7 }
 0x36d   : > { %v1248_v10 = vpop.xlane.xlu1 %1247  ;;  %v1274_v12 = vmul.f32 %v4409_v9, %v5103_v43 }
 0x36e   : > { %v4411_v15 = vpop.eup %4410  ;;  %4420 = vrcp.f32 %v1248_v10 }
 0x36f   : > { %v1285_v18 = vpack.c.bf16 %v1274_v12, %v1273_v26  ;;  %v1275_v23 = vmul.f32 %v4411_v15, %v5107_v46  ;;  %v1623_v12 = vunpack.c.h.bf16 %v4555_v7 }
 0x370   : > { %v4413_v20 = vpop.eup %4412 }
 0x371   : > { %v1276_v21 = vmul.f32 %v4413_v20, %v5111_v13  ;;  %4053 = vmatprep.mubr.msk.bf16.mxu1 %vm1104_vm1, %v1285_v18  ;;  %v4556_v20 = vld [vmem:[%s4834_s28 + $0x10] sm:$0xff]  }
 0x372   : > { %v4415_v24 = vpop.eup %4414 }
 0x373   : > { %v1286_v25 = vpack.c.bf16 %v1276_v21, %v1275_v23  ;;  %v1277_v34 = vmul.f32 %v4415_v24, %v5115_v52  ;;  %v4301_v52 = vld [vmem:[%s6118_s3 + $0x38] sm:$0xff]   ;;  %v1624_v23 = vunpack.c.l.bf16 %v4556_v20 }
 0x374   : > { %v4417_v33 = vpop.eup %4416  ;;  %4075 = vmatprep.subr.bf16.mxu0 %v4301_v52 }
 0x375   : > { %4054 = vmatmul.mubr.msk.bf16.vlgmr.msra.gmra.mrb[32].mxu1 %vm1104_vm1, %v1286_v25  ;;  %v1278_v40 = vmul.f32 %v4417_v33, %v5119_v53  ;;  %4076 = vmatpush3.bf16.msra.mxu0 %v4301_v52  ;;  %v1625_v25 = vunpack.c.h.bf16 %v4556_v20  ;;  %v1628_v52 = vunpack.c.l.bf16 %v4900_v29 }
 0x376   : > { %v4419_v43 = vpop.eup %4418 }
 0x377   : > { %v1287_v35 = vpack.c.bf16 %v1278_v40, %v1277_v34  ;;  %v1279_v46 = vmul.f32 %v4419_v43, %v5123_v56  ;;  %v1626_v34 = vunpack.c.l.bf16 %v4897_v28 }
 0x378   : > { %v4421_v39 = vpop.eup %4420 }
 0x379   : > { %4057 = vmatprep.mubr.msk.bf16.mxu1 %vm1104_vm1, %v1287_v35  ;;  %v1280_v13 = vmul.f32 %v4421_v39, %v5127_v4  ;;  %v1627_v39 = vunpack.c.h.bf16 %v4897_v28  ;;  %v1629_v28 = vunpack.c.h.bf16 %v4900_v29  ;;  %v1632_v29 = vunpack.c.l.bf16 %v4910_v31 }
 0x37b   : > { %v1288_v36 = vpack.c.bf16 %v1280_v13, %v1279_v46 }
 0x37d   : > { %4058 = vmatmul.mubr.msk.bf16.gmra.mrb[36].mxu1 %vm1104_vm1, %v1288_v36 }
 0x37e   : > { %2011 = vmatprep.mubr.bf16.mxu1 %v4670_v2 }
 0x42a   : > { %v4039_v53 = vpop.f32.mrb[24].mxu1 }
 0x42b   : > { %v1343_v58 = vpop.f32.mrb[25].mxu1 }
 0x42c   : > { %v4040_v41 = vpop.f32.mrb[26].mxu1 }
 0x42d   : > { %v1452_v37 = vpack.c.bf16 %v4040_v41, %v4039_v53  ;;  %v1346_v61 = vpop.f32.mrb[27].mxu1  ;;  %v1630_v41 = vunpack.c.l.bf16 %v4907_v30 }
 0x42e   : > { %v1451_v42 = vpack.c.bf16 %v1346_v61, %v1343_v58 }
 0x430   : > { %4077 = vmatprep.mubr.bf16.mxu0 %v1451_v42 }
 0x431   : > { %4078 = vmatmul.mubr.bf16.vlgmr.msra.gmra.mrb[40].mxu0 %v1452_v37 }
 0x432   : > { %v4043_v56 = vpop.f32.mrb[28].mxu1 }
 0x433   : > { %v1359_v4 = vpop.f32.mrb[29].mxu1 }
 0x434   : > { %v4044_v38 = vpop.f32.mrb[30].mxu1 }
 0x435   : > { %v1454_v45 = vpack.c.bf16 %v4044_v38, %v4043_v56  ;;  %v1362_v63 = vpop.f32.mrb[31].mxu1  ;;  %v1631_v56 = vunpack.c.h.bf16 %v4907_v30  ;;  %v1634_v30 = vunpack.c.l.bf16 %v4917_v32  ;;  %v4302_v32 = vld [vmem:[%s6121_s6] ss:$8 sps:$4 sm:$0xff]  }
 0x436   : > { %v1453_v60 = vpack.c.bf16 %v1362_v63, %v1359_v4 }
 0x438   : > { %4081 = vmatprep.mubr.bf16.mxu0 %v1453_v60  ;;  %v4557_v60 = vld [vmem:[%s4834_s28 + $0x30] sm:$0xff]  }
 0x439   : > { %4082 = vmatmul.mubr.bf16.gmra.mrb[44].mxu0 %v1454_v45 }
 0x448   : > { %v4055_v0 = vpop.f32.mrb[32].mxu1 }
 0x449   : > { %v1420_v1 = vpop.f32.mrb[33].mxu1 }
 0x44a   : > { %v4056_v3 = vpop.f32.mrb[34].mxu1 }
 0x44b   : > { %v1456_v5 = vpack.c.bf16 %v4056_v3, %v4055_v0  ;;  %v1423_v17 = vpop.f32.mrb[35].mxu1  ;;  %v1633_v0 = vunpack.c.h.bf16 %v4557_v60  ;;  %v4316_v60 = vld [vmem:[%s6121_s6 + $0x44] ss:$8 sps:$4 sm:$0xff]  }
 0x44c   : > { %v1455_v44 = vpack.c.bf16 %v1423_v17, %v1420_v1 }
 0x44e   : > { %4085 = vmatprep.mubr.bf16.mxu0 %v1455_v44  ;;  %v4558_v44 = vld [vmem:[%s4834_s28 + $0x38] sm:$0xff]   ;;  %s5900_s28 = sand.u32 1, %s4659_s0  }
 0x44f   : > { %4086 = vmatmul.mubr.bf16.gmra.mrb[48].mxu0 %v1456_v5  ;;  %s6134_s22 = sshll.u32 %s5900_s28, 6  ;;  %s3358_s17 = scalar_lea.sflag [#allocation5], %s5900_s28 }
 0x450   : > { %v4059_v16 = vpop.f32.mrb[36].mxu1  ;;  %s5916_s26 = scalar_lea.vmem [#allocation4], %s6134_s22  ;;  %s4577_s22 = scalar_lea.vmem %s4576_s1, 2048 }
 0x451   : > { %v1436_v50 = vpop.f32.mrb[37].mxu1  ;;  %s3382_s16 = sshll.u32 %s5916_s26, 4  ;;  %s6009_s16 = int_to_ptr.vmem [resolvable:$true] %s3382_s16 }
 0x452   : > { %v4060_v54 = vpop.f32.mrb[38].mxu1  ;;  %s4571_s19 = scalar_lea.vmem %s6009_s16, 1024  ;;  %p4578_p5 = scmp.lt.s32.totalorder %s6009_s16, %s4576_s1 }
 0x453   : > { %v1458_v55 = vpack.c.bf16 %v4060_v54, %v4059_v16  ;;  %v1439_v62 = vpop.f32.mrb[39].mxu1  ;;  %v1635_v16 = vunpack.c.h.bf16 %v4558_v44  ;;  %p4572_p2 = scmp.ne.s32.totalorder %s6009_s16, %s4571_s19  ;;  %p4579_p6 = scmp.lt.s32.totalorder %s4577_s22, %s4571_s19 }
 0x454   : > { %v1457_v19 = vpack.c.bf16 %v1439_v62, %v1436_v50  ;;  %v4307_v62 = vld [vmem:[%s6121_s6 + $0x14] ss:$8 sps:$4 sm:$0xff]  }
 0x455   : > { %p4573_p3 = pnand %p4572_p2, %p4794_p10  ;;  %p4580_p7 = por %p4579_p6, %p4578_p5 }
 0x456   : > { %4089 = vmatprep.mubr.bf16.mxu0 %v1457_v19  ;;  %v4305_v19 = vld [vmem:[%s6121_s6 + $0x10] ss:$8 sps:$4 sm:$0xff]  }
 0x457   : > { %4090 = vmatmul.mubr.bf16.gmra.mrb[52].mxu0 %v1458_v55  ;;  %v4304_v55 = vld [vmem:[%s6121_s6 + $0x4] ss:$8 sps:$4 sm:$0xff]   ;;  %p4574_p4 = pneg %p4573_p3 }
 0x458   : > { %1979 = vmatprep.subr.bf16.mxu1 %v4304_v55 }
 0x459   : > { %1980 = vmatpush1.bf16.msra.mxu1 %v4302_v32  ;;  %p4581_p8 = pnand %p4580_p7, %p4574_p4 }
 0x45a   : > { %1981 = vmatprep.subr.bf16.mxu1 %v4307_v62 }
 0x45d   : > { %1982 = vmatpush1.bf16.msra.mxu1 %v4305_v19  ;;  %v4317_v19 = vld [vmem:[%s6121_s6 + $0x50] ss:$8 sps:$4 sm:$0xff]  }
 0x504   : > { %v4079_v59 = vpop.f32.mrb[40].mxu0 }
 0x505   : > { %v1557_v6 = vpop.f32.mrb[41].mxu0  ;;  %v5194_v18 = vadd.f32 %v4079_v59, %v1622_v8 }
 0x506   : > { %v5189_v9 = vadd.f32 %v1620_v57, %v1557_v6  ;;  %v4080_v10 = vpop.f32.mrb[42].mxu0 }
 0x507   : > { %v1560_v26 = vpop.f32.mrb[43].mxu0  ;;  %v5198_v21 = vadd.f32 %v4080_v10, %v1623_v12 }
 0x508   : > { %v5191_v15 = vadd.f32 %v1621_v11, %v1560_v26  ;;  %1652 = vadd.xlane.f32.xlu0 %v5189_v9 }
 0x50a   : > { %1654 = vadd.xlane.f32.xlu1 %v5191_v15 }
 0x50c   : > { %1656 = vadd.xlane.f32.xlu0 %v5194_v18  ;;  %v4083_v24 = vpop.f32.mrb[44].mxu0 }
 0x50d   : > { %v1573_v33 = vpop.f32.mrb[45].mxu0  ;;  %v5209_v13 = vadd.f32 %v4083_v24, %v1626_v34 }
 0x50e   : > { %v5202_v40 = vadd.f32 %v1624_v23, %v1573_v33  ;;  %1658 = vadd.xlane.f32.xlu1 %v5198_v21  ;;  %v4084_v43 = vpop.f32.mrb[46].mxu0 }
 0x50f   : > { %v1576_v35 = vpop.f32.mrb[47].mxu0  ;;  %v5212_v36 = vadd.f32 %v4084_v43, %v1627_v39 }
 0x510   : > { %v5206_v46 = vadd.f32 %v1625_v25, %v1576_v35  ;;  %1660 = vadd.xlane.f32.xlu0 %v5202_v40 }
 0x512   : > { %1662 = vadd.xlane.f32.xlu1 %v5206_v46 }
 0x514   : > { %1664 = vadd.xlane.f32.xlu0 %v5209_v13 }
 0x516   : > { %1666 = vadd.xlane.f32.xlu1 %v5212_v36 }
 0x522   : > { %v4087_v53 = vpop.f32.mrb[48].mxu0 }
 0x523   : > { %v1589_v58 = vpop.f32.mrb[49].mxu0  ;;  %v5225_v38 = vadd.f32 %v4087_v53, %v1630_v41 }
 0x524   : > { %v5219_v37 = vadd.f32 %v1628_v52, %v1589_v58  ;;  %v4088_v61 = vpop.f32.mrb[50].mxu0 }
 0x525   : > { %v1592_v42 = vpop.f32.mrb[51].mxu0  ;;  %v5229_v45 = vadd.f32 %v4088_v61, %v1631_v56  ;;  %v4308_v56 = vld [vmem:[%s6121_s6 + $0x20] ss:$8 sps:$4 sm:$0xff]  }
 0x526   : > { %v5222_v4 = vadd.f32 %v1629_v28, %v1592_v42  ;;  %1668 = vadd.xlane.f32.xlu0 %v5219_v37 }
 0x528   : > { %1670 = vadd.xlane.f32.xlu1 %v5222_v4 }
 0x52a   : > { %1672 = vadd.xlane.f32.xlu0 %v5225_v38  ;;  %v4091_v63 = vpop.f32.mrb[52].mxu0 }
 0x52b   : > { %v1605_v1 = vpop.f32.mrb[53].mxu0  ;;  %v5241_v31 = vadd.f32 %v4091_v63, %v1634_v30 }
 0x52c   : > { %v5234_v3 = vadd.f32 %v1632_v29, %v1605_v1  ;;  %1674 = vadd.xlane.f32.xlu1 %v5229_v45  ;;  %v4092_v5 = vpop.f32.mrb[54].mxu0  ;;  %v4311_v29 = vld [vmem:[%s6121_s6 + $0x30] ss:$8 sps:$4 sm:$0xff]   ;;  %v4314_v1 = vld [vmem:[%s6121_s6 + $0x40] ss:$8 sps:$4 sm:$0xff]  }
 0x52d   : > { %v1608_v17 = vpop.f32.mrb[55].mxu0  ;;  %v5244_v54 = vadd.f32 %v4092_v5, %v1635_v16  ;;  %v4319_v16 = vld [vmem:[%s6121_s6 + $0x54] ss:$8 sps:$4 sm:$0xff]  }
 0x52e   : > { %v5238_v50 = vadd.f32 %v1633_v0, %v1608_v17  ;;  %1676 = vadd.xlane.f32.xlu0 %v5234_v3 }
 0x530   : > { %1678 = vadd.xlane.f32.xlu1 %v5238_v50 }
 0x532   : > { %1680 = vadd.xlane.f32.xlu0 %v5241_v31 }
 0x534   : > { %1682 = vadd.xlane.f32.xlu1 %v5244_v54 }
 0x595   : > { %v1653_v14 = vpop.xlane.xlu0 %1652 }
 0x596   : > { %v1685_v57 = vmul.f32 0.0078125, %v1653_v14 }
 0x597   : > { %v1655_v59 = vpop.xlane.xlu1 %1654 }
 0x598   : > { %v5261_v11 = vsub.f32 %v5189_v9, %v1685_v57  ;;  %v1686_v6 = vmul.f32 0.0078125, %v1655_v59 }
 0x599   : > { %v1657_v7 = vpop.xlane.xlu0 %1656 }
 0x59a   : > { %v5264_v8 = vsub.f32 %v5191_v15, %v1686_v6  ;;  %v1687_v10 = vmul.f32 0.0078125, %v1657_v7  ;;  %v1717_v26 = vmul.f32 %v5261_v11, %v5261_v11  ;;  %v4322_v6 = vld [vmem:[%s6121_s6 + $0x64] ss:$8 sps:$4 sm:$0xff]  }
 0x59b   : > { %v1659_v12 = vpop.xlane.xlu1 %1658 }
 0x59c   : > { %v5269_v20 = vsub.f32 %v5194_v18, %v1687_v10  ;;  %v1688_v23 = vmul.f32 0.0078125, %v1659_v12  ;;  %1733 = vadd.xlane.f32.xlu0 %v1717_v26  ;;  %v1718_v24 = vmul.f32 %v5264_v8, %v5264_v8  ;;  %v4320_v26 = vld [vmem:[%s6121_s6 + $0x60] ss:$8 sps:$4 sm:$0xff]  }
 0x59d   : > { %v1661_v9 = vpop.xlane.xlu0 %1660 }
 0x59e   : > { %v5274_v25 = vsub.f32 %v5198_v21, %v1688_v23  ;;  %v1689_v33 = vmul.f32 0.0078125, %v1661_v9  ;;  %1735 = vadd.xlane.f32.xlu1 %v1718_v24  ;;  %v1719_v15 = vmul.f32 %v5269_v20, %v5269_v20  ;;  %v4323_v9 = vld [vmem:[%s6121_s6 + $0x70] ss:$8 sps:$4 sm:$0xff]  }
 0x59f   : > { %v1663_v34 = vpop.xlane.xlu1 %1662 }
 0x5a0   : > { %v5279_v43 = vsub.f32 %v5202_v40, %v1689_v33  ;;  %v1690_v18 = vmul.f32 0.0078125, %v1663_v34  ;;  %1737 = vadd.xlane.f32.xlu0 %v1719_v15  ;;  %v1720_v35 = vmul.f32 %v5274_v25, %v5274_v25  ;;  %v4325_v33 = vld [vmem:[%s6121_s6 + $0x74] ss:$8 sps:$4 sm:$0xff]  }
 0x5a1   : > { %v1665_v39 = vpop.xlane.xlu0 %1664 }
 0x5a2   : > { %v5284_v52 = vsub.f32 %v5206_v46, %v1690_v18  ;;  %v1691_v21 = vmul.f32 0.0078125, %v1665_v39  ;;  %1739 = vadd.xlane.f32.xlu1 %v1720_v35  ;;  %v1721_v53 = vmul.f32 %v5279_v43, %v5279_v43 }
 0x5a3   : > { %v1667_v28 = vpop.xlane.xlu1 %1666 }
 0x5a4   : > { %v5289_v58 = vsub.f32 %v5209_v13, %v1691_v21  ;;  %v1692_v40 = vmul.f32 0.0078125, %v1667_v28  ;;  %1741 = vadd.xlane.f32.xlu0 %v1721_v53  ;;  %v1722_v41 = vmul.f32 %v5284_v52, %v5284_v52  ;;  %v4310_v13 = vld [vmem:[%s6121_s6 + $0x24] ss:$8 sps:$4 sm:$0xff]  }
 0x5a5   : > { %1983 = vmatprep.subr.bf16.mxu1 %v4310_v13 }
 0x5a6   : > { %v5294_v61 = vsub.f32 %v5212_v36, %v1692_v40  ;;  %1743 = vadd.xlane.f32.xlu1 %v1722_v41  ;;  %v1723_v46 = vmul.f32 %v5289_v58, %v5289_v58  ;;  %1984 = vmatpush1.bf16.msra.mxu1 %v4308_v56  ;;  %v4313_v36 = vld [vmem:[%s6121_s6 + $0x34] ss:$8 sps:$4 sm:$0xff]  }
 0x5a7   : > { %1985 = vmatprep.subr.bf16.mxu1 %v4313_v36 }
 0x5a8   : > { %1745 = vadd.xlane.f32.xlu0 %v1723_v46  ;;  %v1724_v42 = vmul.f32 %v5294_v61, %v5294_v61 }
 0x5aa   : > { %1747 = vadd.xlane.f32.xlu1 %v1724_v42  ;;  %1986 = vmatpush1.bf16.msra.mxu1 %v4311_v29 }
 0x5ab   : > { %1987 = vmatprep.subr.bf16.mxu1 %v4316_v60 }
 0x5ae   : > { %1988 = vmatpush1.bf16.msra.mxu1 %v4314_v1 }
 0x5af   : > { %1989 = vmatprep.subr.bf16.mxu1 %v4319_v16 }
 0x5b2   : > { %1990 = vmatpush1.bf16.msra.mxu1 %v4317_v19 }
 0x5b3   : > { %v1669_v63 = vpop.xlane.xlu0 %1668  ;;  %1991 = vmatprep.subr.bf16.mxu1 %v4322_v6 }
 0x5b4   : > { %v1693_v0 = vmul.f32 0.0078125, %v1669_v63 }
 0x5b5   : > { %v1671_v30 = vpop.xlane.xlu1 %1670 }
 0x5b6   : > { %v5319_v5 = vsub.f32 %v5219_v37, %v1693_v0  ;;  %v1694_v17 = vmul.f32 0.0078125, %v1671_v30  ;;  %1992 = vmatpush1.bf16.msra.mxu1 %v4320_v26 }
 0x5b7   : > { %v1673_v44 = vpop.xlane.xlu0 %1672  ;;  %1993 = vmatprep.subr.bf16.mxu1 %v4325_v33 }
 0x5b8   : > { %v5325_v32 = vsub.f32 %v5222_v4, %v1694_v17  ;;  %v1695_v55 = vmul.f32 0.0078125, %v1673_v44  ;;  %v1725_v62 = vmul.f32 %v5319_v5, %v5319_v5 }
 0x5b9   : > { %v1675_v37 = vpop.xlane.xlu1 %1674 }
 0x5ba   : > { %v5333_v14 = vsub.f32 %v5225_v38, %v1695_v55  ;;  %v1696_v57 = vmul.f32 0.0078125, %v1675_v37  ;;  %1749 = vadd.xlane.f32.xlu0 %v1725_v62  ;;  %v1726_v59 = vmul.f32 %v5325_v32, %v5325_v32  ;;  %1994 = vmatpush1.bf16.msra.mxu1 %v4323_v9 }
 0x5bb   : > { %v1677_v4 = vpop.xlane.xlu0 %1676 }
 0x5bc   : > { %v5341_v7 = vsub.f32 %v5229_v45, %v1696_v57  ;;  %v1697_v10 = vmul.f32 0.0078125, %v1677_v4  ;;  %1751 = vadd.xlane.f32.xlu1 %v1726_v59  ;;  %v1727_v38 = vmul.f32 %v5333_v14, %v5333_v14  ;;  %v5379_v57 = vld [vmem:[%s6119_s4] ss:$0 sm:$0xff] }
 0x5bd   : > { %v1679_v12 = vpop.xlane.xlu1 %1678 }
 0x5be   : > { %v5349_v23 = vsub.f32 %v5234_v3, %v1697_v10  ;;  %v1698_v24 = vmul.f32 0.0078125, %v1679_v12  ;;  %1753 = vadd.xlane.f32.xlu0 %v1727_v38  ;;  %v1728_v45 = vmul.f32 %v5341_v7, %v5341_v7 }
 0x5bf   : > { %v1681_v15 = vpop.xlane.xlu0 %1680 }
 0x5c0   : > { %v5360_v34 = vsub.f32 %v5238_v50, %v1698_v24  ;;  %v1699_v3 = vmul.f32 0.0078125, %v1681_v15  ;;  %1755 = vadd.xlane.f32.xlu1 %v1728_v45  ;;  %v1729_v18 = vmul.f32 %v5349_v23, %v5349_v23  ;;  %v5387_v45 = vld [vmem:[%s6120_s5] ss:$0 sm:$0xff] }
 0x5c1   : > { %v1683_v35 = vpop.xlane.xlu1 %1682 }
 0x5c2   : > { %v5365_v39 = vsub.f32 %v5241_v31, %v1699_v3  ;;  %v1700_v21 = vmul.f32 0.0078125, %v1683_v35  ;;  %1757 = vadd.xlane.f32.xlu0 %v1729_v18  ;;  %v1730_v53 = vmul.f32 %v5360_v34, %v5360_v34 }
 0x5c4   : > { %v5370_v28 = vsub.f32 %v5244_v54, %v1700_v21  ;;  %1759 = vadd.xlane.f32.xlu1 %v1730_v53  ;;  %v1731_v50 = vmul.f32 %v5365_v39, %v5365_v39 }
 0x5c6   : > { %1761 = vadd.xlane.f32.xlu0 %v1731_v50  ;;  %v1732_v40 = vmul.f32 %v5370_v28, %v5370_v28 }
 0x5c8   : > { %1763 = vadd.xlane.f32.xlu1 %v1732_v40 }
 0x629   : > { %v1734_v31 = vpop.xlane.xlu0 %1733 }
 0x62a   : > { %v1765_v41 = vmul.f32 0.0078125, %v1734_v31 }
 0x62b   : > { %v1736_v46 = vpop.xlane.xlu1 %1735 }
 0x62c   : > { %v1781_v42 = vadd.f32 1e-05, %v1765_v41  ;;  %v1766_v13 = vmul.f32 0.0078125, %v1736_v46 }
 0x62d   : > { %v1738_v56 = vpop.xlane.xlu0 %1737 }
 0x62e   : > { %4422 = vrsqrt.f32 %v1781_v42  ;;  %v1782_v36 = vadd.f32 1e-05, %v1766_v13  ;;  %v1767_v29 = vmul.f32 0.0078125, %v1738_v56 }
 0x62f   : > { %v1740_v54 = vpop.xlane.xlu1 %1739 }
 0x630   : > { %4424 = vrsqrt.f32 %v1782_v36  ;;  %v1783_v63 = vadd.f32 1e-05, %v1767_v29  ;;  %v1768_v60 = vmul.f32 0.0078125, %v1740_v54 }
 0x631   : > { %v1742_v0 = vpop.xlane.xlu0 %1741 }
 0x632   : > { %4426 = vrsqrt.f32 %v1783_v63  ;;  %v1784_v1 = vadd.f32 1e-05, %v1768_v60  ;;  %v1769_v30 = vmul.f32 0.0078125, %v1742_v0 }
 0x633   : > { %v1744_v17 = vpop.xlane.xlu1 %1743 }
 0x634   : > { %4428 = vrsqrt.f32 %v1784_v1  ;;  %v1770_v44 = vmul.f32 0.0078125, %v1744_v17  ;;  %v1785_v16 = vadd.f32 1e-05, %v1769_v30 }
 0x635   : > { %v1746_v62 = vpop.xlane.xlu0 %1745 }
 0x636   : > { %v1786_v55 = vadd.f32 1e-05, %v1770_v44  ;;  %v1771_v10 = vmul.f32 0.0078125, %v1746_v62 }
 0x637   : > { %v1748_v19 = vpop.xlane.xlu1 %1747 }
 0x638   : > { %v4423_v37 = vpop.eup %4422  ;;  %4430 = vrsqrt.f32 %v1786_v55  ;;  %v1772_v59 = vmul.f32 0.0078125, %v1748_v19  ;;  %v1787_v15 = vadd.f32 1e-05, %v1771_v10 }
 0x639   : > { %v1813_v4 = vmul.f32 %v4423_v37, %v5261_v11  ;;  %4432 = vrsqrt.f32 %v1785_v16 }
 0x63a   : > { %v4425_v6 = vpop.eup %4424  ;;  %v1788_v24 = vadd.f32 1e-05, %v1772_v59 }
 0x63b   : > { %v1836_v38 = vmul.f32 %v5379_v57, %v1813_v4  ;;  %v1814_v26 = vmul.f32 %v4425_v6, %v5264_v8 }
 0x63c   : > { %v4427_v12 = vpop.eup %4426  ;;  %4434 = vrsqrt.f32 %v1788_v24 }
 0x63d   : > { %v1837_v9 = vmul.f32 %v5379_v57, %v1814_v26  ;;  %v5391_v11 = vadd.f32 %v5387_v45, %v1836_v38  ;;  %v1815_v18 = vmul.f32 %v4427_v12, %v5269_v20  ;;  %4436 = vrsqrt.f32 %v1787_v15 }
 0x63e   : > { %v4429_v33 = vpop.eup %4428 }
 0x63f   : > { %v5394_v3 = vadd.f32 %v5387_v45, %v1837_v9  ;;  %v1816_v8 = vmul.f32 %v4429_v33, %v5274_v25  ;;  %v1838_v50 = vmul.f32 %v5379_v57, %v1815_v18 }
 0x641   : > { %v1875_v35 = vpack.c.bf16 %v5394_v3, %v5391_v11  ;;  %v1839_v21 = vmul.f32 %v5379_v57, %v1816_v8  ;;  %v5408_v46 = vadd.f32 %v5387_v45, %v1838_v50 }
 0x642   : > { %v4431_v53 = vpop.eup %4430 }
 0x643   : > { %2012 = vmatmul.mubr.bf16.vlgmr.msra.gmra.mrb[40].mxu1 %v1875_v35  ;;  %v4433_v40 = vpop.eup %4432  ;;  %v5404_v31 = vadd.f32 %v5387_v45, %v1839_v21  ;;  %v1818_v20 = vmul.f32 %v4431_v53, %v5284_v52 }
 0x644   : > { %2021 = vmatprep.mubr.bf16.mxu1 %v4670_v2  ;;  %v1817_v42 = vmul.f32 %v4433_v40, %v5279_v43 }
 0x645   : > { %v1876_v29 = vpack.c.bf16 %v5404_v31, %v5408_v46  ;;  %v1841_v54 = vmul.f32 %v5379_v57, %v1818_v20 }
 0x646   : > { %v4435_v63 = vpop.eup %4434  ;;  %v1840_v1 = vmul.f32 %v5379_v57, %v1817_v42 }
 0x647   : > { %v1750_v25 = vpop.xlane.xlu0 %1749  ;;  %v4437_v30 = vpop.eup %4436  ;;  %v5417_v44 = vadd.f32 %v5387_v45, %v1841_v54  ;;  %v1820_v16 = vmul.f32 %v4435_v63, %v5294_v61 }
 0x648   : > { %v1773_v41 = vmul.f32 0.0078125, %v1750_v25  ;;  %v5421_v37 = vadd.f32 %v5387_v45, %v1840_v1  ;;  %v1819_v59 = vmul.f32 %v4437_v30, %v5289_v58 }
 0x649   : > { %v1752_v13 = vpop.xlane.xlu1 %1751  ;;  %v1843_v38 = vmul.f32 %v5379_v57, %v1820_v16 }
 0x64a   : > { %v1789_v56 = vadd.f32 1e-05, %v1773_v41  ;;  %v1774_v36 = vmul.f32 0.0078125, %v1752_v13  ;;  %v1877_v10 = vpack.c.bf16 %v5417_v44, %v5421_v37  ;;  %v1842_v61 = vmul.f32 %v5379_v57, %v1819_v59 }
 0x64b   : > { %v1754_v60 = vpop.xlane.xlu0 %1753  ;;  %2022 = vmatmul.mubr.bf16.gmra.mrb[44].mxu1 %v1876_v29  ;;  %v5430_v58 = vadd.f32 %v5387_v45, %v1843_v38 }
 0x64c   : > { %4438 = vrsqrt.f32 %v1789_v56  ;;  %v1790_v0 = vadd.f32 1e-05, %v1774_v36  ;;  %v1775_v52 = vmul.f32 0.0078125, %v1754_v60  ;;  %2031 = vmatprep.mubr.bf16.mxu1 %v4670_v2  ;;  %v5433_v8 = vadd.f32 %v5387_v45, %v1842_v61  ;;  %v4330_v61 = vld [vmem:[%s6122_s7 + $0x50] sm:$0xff]  }
 0x64d   : > { %v1756_v17 = vpop.xlane.xlu1 %1755 }
 0x64e   : > { %4440 = vrsqrt.f32 %v1790_v0  ;;  %v1776_v43 = vmul.f32 0.0078125, %v1756_v17  ;;  %v1791_v55 = vadd.f32 1e-05, %v1775_v52  ;;  %v1878_v50 = vpack.c.bf16 %v5430_v58, %v5433_v8 }
 0x64f   : > { %v1758_v19 = vpop.xlane.xlu0 %1757 }
 0x650   : > { %v1792_v62 = vadd.f32 1e-05, %v1776_v43  ;;  %v1777_v26 = vmul.f32 0.0078125, %v1758_v19 }
 0x651   : > { %v1760_v4 = vpop.xlane.xlu1 %1759 }
 0x652   : > { %4442 = vrsqrt.f32 %v1792_v62  ;;  %v1778_v6 = vmul.f32 0.0078125, %v1760_v4  ;;  %v1793_v33 = vadd.f32 1e-05, %v1777_v26 }
 0x653   : > { %4444 = vrsqrt.f32 %v1791_v55  ;;  %2032 = vmatmul.mubr.bf16.gmra.mrb[48].mxu1 %v1877_v10  ;;  %v1762_v18 = vpop.xlane.xlu0 %1761 }
 0x654   : > { %v1794_v12 = vadd.f32 1e-05, %v1778_v6  ;;  %2041 = vmatprep.mubr.bf16.mxu1 %v4670_v2  ;;  %v1779_v40 = vmul.f32 0.0078125, %v1762_v18  ;;  %v4336_v18 = vld [vmem:[%s6122_s7 + $0x68] sm:$0xff]  }
 0x655   : > { %v1764_v9 = vpop.xlane.xlu1 %1763 }
 0x656   : > { %v4439_v24 = vpop.eup %4438  ;;  %4446 = vrsqrt.f32 %v1794_v12  ;;  %v1780_v21 = vmul.f32 0.0078125, %v1764_v9  ;;  %v1795_v56 = vadd.f32 1e-05, %v1779_v40  ;;  %v4331_v12 = vld [vmem:[%s6122_s7 + $0x10] sm:$0xff]   ;;  %v4333_v9 = vld [vmem:[%s6122_s7 + $0x18] sm:$0xff]  }
 0x657   : > { %v1821_v35 = vmul.f32 %v4439_v24, %v5319_v5  ;;  %4448 = vrsqrt.f32 %v1793_v33  ;;  %v4332_v24 = vld [vmem:[%s6122_s7 + $0x58] sm:$0xff]   ;;  %v4334_v33 = vld [vmem:[%s6122_s7 + $0x60] sm:$0xff]  }
 0x658   : > { %v4441_v15 = vpop.eup %4440  ;;  %v1796_v13 = vadd.f32 1e-05, %v1780_v21  ;;  %v4338_v21 = vld [vmem:[%s6122_s7 + $0x70] sm:$0xff]   ;;  %v4341_v40 = vld [vmem:[%s6122_s7 + $0x38] sm:$0xff]  }
 0x659   : > { %v1822_v53 = vmul.f32 %v4441_v15, %v5325_v32  ;;  %v1844_v41 = vmul.f32 %v5379_v57, %v1821_v35  ;;  %v4335_v15 = vld [vmem:[%s6122_s7 + $0x20] sm:$0xff]   ;;  %v4337_v35 = vld [vmem:[%s6122_s7 + $0x28] sm:$0xff]  }
 0x65a   : > { %4450 = vrsqrt.f32 %v1796_v13 }
 0x65b   : > { %v1845_v20 = vmul.f32 %v5379_v57, %v1822_v53  ;;  %2042 = vmatmul.mubr.bf16.gmra.mrb[52].mxu1 %v1878_v50  ;;  %v5447_v36 = vadd.f32 %v5387_v45, %v1844_v41  ;;  %4452 = vrsqrt.f32 %v1795_v56  ;;  %v4339_v53 = vld [vmem:[%s6122_s7 + $0x30] sm:$0xff]   ;;  %v4340_v50 = vld [vmem:[%s6122_s7 + $0x78] sm:$0xff]  }
 0x65c   : > { %v4443_v25 = vpop.eup %4442  ;;  %2051 = vmatprep.mubr.bf16.mxu1 %v4670_v2 }
 0x65d   : > { %v4445_v42 = vpop.eup %4444  ;;  %v5443_v5 = vadd.f32 %v5387_v45, %v1845_v20  ;;  %v1824_v32 = vmul.f32 %v4443_v25, %v5341_v7 }
 0x65e   : > { %v1823_v29 = vmul.f32 %v4445_v42, %v5333_v14 }
 0x65f   : > { %v1879_v54 = vpack.c.bf16 %v5443_v5, %v5447_v36  ;;  %v1847_v63 = vmul.f32 %v5379_v57, %v1824_v32 }
 0x660   : > { %v4447_v60 = vpop.eup %4446  ;;  %v1846_v0 = vmul.f32 %v5379_v57, %v1823_v29 }
 0x661   : > { %v4449_v52 = vpop.eup %4448  ;;  %v5456_v7 = vadd.f32 %v5387_v45, %v1847_v63  ;;  %v1826_v1 = vmul.f32 %v4447_v60, %v5360_v34 }
 0x662   : > { %v5460_v14 = vadd.f32 %v5387_v45, %v1846_v0  ;;  %v1825_v30 = vmul.f32 %v4449_v52, %v5349_v23 }
 0x663   : > { %2052 = vmatmul.mubr.bf16.gmra.mrb[56].mxu1 %v1879_v54  ;;  %v1849_v43 = vmul.f32 %v5379_v57, %v1826_v1 }
 0x664   : > { %2061 = vmatprep.mubr.bf16.mxu1 %v4670_v2  ;;  %v1880_v17 = vpack.c.bf16 %v5456_v7, %v5460_v14  ;;  %v4451_v16 = vpop.eup %4450  ;;  %v1848_v55 = vmul.f32 %v5379_v57, %v1825_v30 }
 0x665   : > { %v4453_v62 = vpop.eup %4452  ;;  %v5469_v19 = vadd.f32 %v5387_v45, %v1849_v43  ;;  %v1828_v34 = vmul.f32 %v4451_v16, %v5370_v28 }
 0x666   : > { %v5473_v59 = vadd.f32 %v5387_v45, %v1848_v55  ;;  %v1827_v23 = vmul.f32 %v4453_v62, %v5365_v39  ;;  %v4326_v39 = vld [vmem:[%s6122_s7 + $0x40] sm:$0xff]  }
 0x667   : > { %v1851_v6 = vmul.f32 %v5379_v57, %v1828_v34  ;;  %3867 = vmatprep.subr.bf16.mxu0 %v4326_v39  ;;  %4187 = vmatprep.subr.bf16.mxu1 %v4326_v39 }
 0x668   : > { %v1881_v4 = vpack.c.bf16 %v5469_v19, %v5473_v59  ;;  %v1850_v10 = vmul.f32 %v5379_v57, %v1827_v23  ;;  %v4327_v57 = vld [vmem:[%s6122_s7] sm:$0xff]  }
 0x669   : > { %v5482_v38 = vadd.f32 %v5387_v45, %v1851_v6  ;;  %3868 = vmatpush3.bf16.msra.mxu0 %v4327_v57  ;;  %4195 = vmatpush3.bf16.msra.mxu1 %v4327_v57 }
 0x66a   : > { %v5485_v28 = vadd.f32 %v5387_v45, %v1850_v10  ;;  %v4329_v45 = vld [vmem:[%s6122_s7 + $0x8] sm:$0xff]  }
 0x66b   : > { %2062 = vmatmul.mubr.bf16.gmra.mrb[60].mxu1 %v1880_v17 }
 0x66c   : > { %2071 = vmatprep.mubr.bf16.mxu1 %v4670_v2  ;;  %v1882_v26 = vpack.c.bf16 %v5482_v38, %v5485_v28 }
 0x673   : > { %2072 = vmatmul.mubr.bf16.gmra.mrb[64].mxu1 %v1881_v4 }
 0x674   : > { %2081 = vmatprep.mubr.bf16.mxu1 %v4670_v2  ;;  %v4328_v2 = vld [vmem:[%s6122_s7 + $0x48] sm:$0xff]  }
 0x675   : > { %3869 = vmatprep.subr.bf16.mxu0 %v4328_v2  ;;  %4188 = vmatprep.subr.bf16.mxu1 %v4328_v2 }
 0x676   : > { %3870 = vmatpush3.bf16.msra.mxu0 %v4329_v45  ;;  %4196 = vmatpush3.bf16.msra.mxu1 %v4329_v45 }
 0x677   : > { %3871 = vmatprep.subr.bf16.mxu0 %v4330_v61  ;;  %4189 = vmatprep.subr.bf16.mxu1 %v4330_v61 }
 0x67a   : > { %3872 = vmatpush3.bf16.msra.mxu0 %v4331_v12  ;;  %4197 = vmatpush3.bf16.msra.mxu1 %v4331_v12 }
 0x67b   : > { %2082 = vmatmul.mubr.bf16.gmra.mrb[68].mxu1 %v1882_v26  ;;  %3873 = vmatprep.subr.bf16.mxu0 %v4332_v24 }
 0x67c   : > { %4190 = vmatprep.subr.bf16.mxu1 %v4332_v24 }
 0x67e   : > { %3874 = vmatpush3.bf16.msra.mxu0 %v4333_v9  ;;  %4198 = vmatpush3.bf16.msra.mxu1 %v4333_v9 }
 0x67f   : > { %3875 = vmatprep.subr.bf16.mxu0 %v4334_v33  ;;  %4191 = vmatprep.subr.bf16.mxu1 %v4334_v33 }
 0x682   : > { %3876 = vmatpush3.bf16.msra.mxu0 %v4335_v15  ;;  %4199 = vmatpush3.bf16.msra.mxu1 %v4335_v15 }
 0x683   : > { %3877 = vmatprep.subr.bf16.mxu0 %v4336_v18  ;;  %4192 = vmatprep.subr.bf16.mxu1 %v4336_v18 }
 0x686   : > { %3878 = vmatpush3.bf16.msra.mxu0 %v4337_v35  ;;  %4200 = vmatpush3.bf16.msra.mxu1 %v4337_v35 }
 0x687   : > { %3879 = vmatprep.subr.bf16.mxu0 %v4338_v21  ;;  %4193 = vmatprep.subr.bf16.mxu1 %v4338_v21 }
 0x68a   : > { %3880 = vmatpush3.bf16.msra.mxu0 %v4339_v53  ;;  %4201 = vmatpush3.bf16.msra.mxu1 %v4339_v53 }
 0x68b   : > { %3881 = vmatprep.subr.bf16.mxu0 %v4340_v50  ;;  %4194 = vmatprep.subr.bf16.mxu1 %v4340_v50 }
 0x68e   : > { %3882 = vmatpush3.bf16.msra.mxu0 %v4341_v40  ;;  %4202 = vmatpush3.bf16.msra.mxu1 %v4341_v40 }
 0x716   : > { %v2013_v20 = vpop.f32.mrb[40].mxu1 }
 0x717   : > { %v2124_v25 = vmul.f32 0.044715, %v2013_v20  ;;  %v2015_v41 = vpop.f32.mrb[41].mxu1  ;;  %v5537_v6 = vmul.f32 0.5, %v2013_v20 }
 0x718   : > { %v2125_v42 = vmul.f32 0.044715, %v2015_v41  ;;  %v2017_v13 = vpop.f32.mrb[42].mxu1  ;;  %v5539_v35 = vmul.f32 0.5, %v2015_v41 }
 0x719   : > { %v2156_v32 = vmul.f32 %v2124_v25, %v2013_v20  ;;  %v2126_v56 = vmul.f32 0.044715, %v2017_v13  ;;  %v2019_v29 = vpop.f32.mrb[43].mxu1  ;;  %v2094_v21 = vmul.f32 0.5, %v2017_v13 }
 0x71a   : > { %v2157_v54 = vmul.f32 %v2125_v42, %v2015_v41  ;;  %v2127_v63 = vmul.f32 0.044715, %v2019_v29  ;;  %v5541_v25 = vmul.f32 0.5, %v2019_v29 }
 0x71b   : > { %v2188_v60 = vmul.f32 %v2156_v32, %v2013_v20  ;;  %v2158_v0 = vmul.f32 %v2126_v56, %v2017_v13 }
 0x71c   : > { %v2189_v52 = vmul.f32 %v2157_v54, %v2015_v41  ;;  %v2159_v1 = vmul.f32 %v2127_v63, %v2019_v29 }
 0x71d   : > { %v2220_v30 = vadd.f32 %v2188_v60, %v2013_v20  ;;  %v2190_v17 = vmul.f32 %v2158_v0, %v2017_v13 }
 0x71e   : > { %v2221_v43 = vadd.f32 %v2189_v52, %v2015_v41  ;;  %v2191_v16 = vmul.f32 %v2159_v1, %v2019_v29  ;;  %v2023_v55 = vpop.f32.mrb[44].mxu1 }
 0x71f   : > { %v2252_v62 = vmul.f32 0.7978846, %v2220_v30  ;;  %v2222_v34 = vadd.f32 %v2190_v17, %v2017_v13  ;;  %v2128_v23 = vmul.f32 0.044715, %v2023_v55  ;;  %v2025_v4 = vpop.f32.mrb[45].mxu1  ;;  %v5543_v42 = vmul.f32 0.5, %v2023_v55 }
 0x720   : > { %v2253_v10 = vmul.f32 0.7978846, %v2221_v43  ;;  %v2223_v26 = vadd.f32 %v2191_v16, %v2019_v29  ;;  %v2129_v39 = vmul.f32 0.044715, %v2025_v4  ;;  %v2027_v57 = vpop.f32.mrb[46].mxu1  ;;  %v5545_v63 = vmul.f32 0.5, %v2025_v4 }
 0x721   : > { %4454 = vtanh.f32 %v2252_v62  ;;  %v2254_v2 = vmul.f32 0.7978846, %v2222_v34  ;;  %v2160_v45 = vmul.f32 %v2128_v23, %v2023_v55  ;;  %v2130_v61 = vmul.f32 0.044715, %v2027_v57  ;;  %v2029_v12 = vpop.f32.mrb[47].mxu1 }
 0x722   : > { %4456 = vtanh.f32 %v2253_v10  ;;  %v2255_v24 = vmul.f32 0.7978846, %v2223_v26  ;;  %v2161_v9 = vmul.f32 %v2129_v39, %v2025_v4  ;;  %v2131_v33 = vmul.f32 0.044715, %v2029_v12 }
 0x723   : > { %4458 = vtanh.f32 %v2254_v2  ;;  %v2192_v15 = vmul.f32 %v2160_v45, %v2023_v55  ;;  %v2162_v18 = vmul.f32 %v2130_v61, %v2027_v57  ;;  %v5547_v60 = vmul.f32 0.5, %v2029_v12 }
 0x724   : > { %4460 = vtanh.f32 %v2255_v24  ;;  %v2193_v53 = vmul.f32 %v2161_v9, %v2025_v4  ;;  %v2163_v50 = vmul.f32 %v2131_v33, %v2029_v12  ;;  %v5549_v1 = vmul.f32 0.5, %v2027_v57 }
 0x725   : > { %v2224_v40 = vadd.f32 %v2192_v15, %v2023_v55  ;;  %v2194_v20 = vmul.f32 %v2162_v18, %v2027_v57 }
 0x726   : > { %v2225_v32 = vadd.f32 %v2193_v53, %v2025_v4  ;;  %v2195_v56 = vmul.f32 %v2163_v50, %v2029_v12  ;;  %v2033_v54 = vpop.f32.mrb[48].mxu1 }
 0x727   : > { %v2256_v0 = vmul.f32 0.7978846, %v2224_v40  ;;  %v2226_v41 = vadd.f32 %v2194_v20, %v2027_v57  ;;  %v2132_v52 = vmul.f32 0.044715, %v2033_v54  ;;  %v2035_v13 = vpop.f32.mrb[49].mxu1  ;;  %v5553_v16 = vmul.f32 0.5, %v2033_v54 }
 0x728   : > { %v2257_v30 = vmul.f32 0.7978846, %v2225_v32  ;;  %v2227_v17 = vadd.f32 %v2195_v56, %v2029_v12  ;;  %v2133_v43 = vmul.f32 0.044715, %v2035_v13  ;;  %v5551_v29 = vpop.f32.mrb[50].mxu1  ;;  %v5557_v45 = vmul.f32 0.5, %v2035_v13 }
 0x729   : > { %4462 = vtanh.f32 %v2256_v0  ;;  %v2258_v55 = vmul.f32 0.7978846, %v2226_v41  ;;  %v2164_v62 = vmul.f32 %v2132_v52, %v2033_v54  ;;  %v2134_v34 = vmul.f32 0.044715, %v5551_v29  ;;  %v2039_v23 = vpop.f32.mrb[51].mxu1 }
 0x72a   : > { %4464 = vtanh.f32 %v2257_v30  ;;  %v2259_v4 = vmul.f32 0.7978846, %v2227_v17  ;;  %v2165_v10 = vmul.f32 %v2133_v43, %v2035_v13  ;;  %v2135_v26 = vmul.f32 0.044715, %v2039_v23 }
 0x72b   : > { %v4455_v39 = vpop.eup %4454  ;;  %4466 = vtanh.f32 %v2258_v55  ;;  %v2196_v57 = vmul.f32 %v2164_v62, %v2033_v54  ;;  %v2166_v2 = vmul.f32 %v2134_v34, %v5551_v29  ;;  %v5560_v50 = vmul.f32 0.5, %v2039_v23 }
 0x72c   : > { %v4457_v61 = vpop.eup %4456  ;;  %v2316_v12 = vadd.f32 1.0, %v4455_v39  ;;  %4468 = vtanh.f32 %v2259_v4  ;;  %v2197_v24 = vmul.f32 %v2165_v10, %v2035_v13  ;;  %v2167_v9 = vmul.f32 %v2135_v26, %v2039_v23 }
 0x72d   : > { %v4459_v33 = vpop.eup %4458  ;;  %v2228_v15 = vadd.f32 %v2196_v57, %v2033_v54  ;;  %v2198_v18 = vmul.f32 %v2166_v2, %v5551_v29  ;;  %v2317_v53 = vadd.f32 1.0, %v4457_v61 }
 0x72e   : > { %v4461_v40 = vpop.eup %4460  ;;  %v2348_v20 = vmul.f32 %v2316_v12, %v5537_v6  ;;  %v2318_v32 = vadd.f32 1.0, %v4459_v33  ;;  %v2229_v56 = vadd.f32 %v2197_v24, %v2035_v13  ;;  %v2199_v0 = vmul.f32 %v2167_v9, %v2039_v23  ;;  %v5563_v41 = vpop.f32.mrb[52].mxu1 }
 0x72f   : > { %v2260_v52 = vmul.f32 0.7978846, %v2228_v15  ;;  %v2230_v30 = vadd.f32 %v2198_v18, %v5551_v29  ;;  %v2136_v17 = vmul.f32 0.044715, %v5563_v41  ;;  %v5567_v43 = vpop.f32.mrb[53].mxu1  ;;  %v2319_v54 = vadd.f32 1.0, %v4461_v40 }
 0x730   : > { %v2350_v55 = vmul.f32 %v2318_v32, %v2094_v21  ;;  %v2261_v62 = vmul.f32 0.7978846, %v2229_v56  ;;  %v2231_v34 = vadd.f32 %v2199_v0, %v2039_v23  ;;  %v2137_v4 = vmul.f32 0.044715, %v5567_v43  ;;  %v5570_v10 = vpop.f32.mrb[54].mxu1 }
 0x731   : > { %4470 = vtanh.f32 %v2260_v52  ;;  %v2262_v6 = vmul.f32 0.7978846, %v2230_v30  ;;  %v2168_v13 = vmul.f32 %v2136_v17, %v5563_v41  ;;  %v2138_v26 = vmul.f32 0.044715, %v5570_v10  ;;  %v5574_v39 = vpop.f32.mrb[55].mxu1 }
 0x732   : > { %4472 = vtanh.f32 %v2261_v62  ;;  %v2263_v57 = vmul.f32 0.7978846, %v2231_v34  ;;  %v2169_v2 = vmul.f32 %v2137_v4, %v5567_v43  ;;  %v2139_v21 = vmul.f32 0.044715, %v5574_v39 }
 0x733   : > { %v4463_v61 = vpop.eup %4462  ;;  %4474 = vtanh.f32 %v2262_v6  ;;  %v2200_v23 = vmul.f32 %v2168_v13, %v5563_v41  ;;  %v2170_v12 = vmul.f32 %v2138_v26, %v5570_v10  ;;  %v2349_v24 = vmul.f32 %v2317_v53, %v5539_v35 }
 0x734   : > { %v4465_v9 = vpop.eup %4464  ;;  %4476 = vtanh.f32 %v2263_v57  ;;  %v2201_v33 = vmul.f32 %v2169_v2, %v5567_v43  ;;  %v2171_v15 = vmul.f32 %v2139_v21, %v5574_v39  ;;  %v2351_v18 = vmul.f32 %v2319_v54, %v5541_v25 }
 0x735   : > { %v4467_v40 = vpop.eup %4466  ;;  %v2232_v32 = vadd.f32 %v2200_v23, %v5563_v41  ;;  %v2202_v56 = vmul.f32 %v2170_v12, %v5570_v10  ;;  %v2380_v0 = vpack.c.bf16 %v2350_v55, %v2348_v20  ;;  %v2321_v52 = vadd.f32 1.0, %v4465_v9 }
 0x736   : > { %v4469_v30 = vpop.eup %4468  ;;  %v2233_v17 = vadd.f32 %v2201_v33, %v5567_v43  ;;  %v2203_v35 = vmul.f32 %v2171_v15, %v5574_v39  ;;  %v2381_v53 = vpack.c.bf16 %v2351_v18, %v2349_v24  ;;  %v5588_v62 = vpop.f32.mrb[56].mxu1  ;;  %v2320_v34 = vadd.f32 1.0, %v4463_v61 }
 0x737   : > { %v2264_v4 = vmul.f32 0.7978846, %v2232_v32  ;;  %v2234_v6 = vadd.f32 %v2202_v56, %v5570_v10  ;;  %v2140_v25 = vmul.f32 0.044715, %v5588_v62  ;;  %v5592_v54 = vpop.f32.mrb[57].mxu1  ;;  %v2323_v13 = vadd.f32 1.0, %v4469_v30 }
 0x738   : > { %v2265_v26 = vmul.f32 0.7978846, %v2233_v17  ;;  %v2235_v20 = vadd.f32 %v2203_v35, %v5574_v39  ;;  %2556 = vmatprep.mubr.bf16.mxu0 %v2381_v53  ;;  %v2141_v55 = vmul.f32 0.044715, %v5592_v54  ;;  %v5596_v57 = vpop.f32.mrb[58].mxu1  ;;  %v2353_v2 = vmul.f32 %v2321_v52, %v5545_v63 }
 0x739   : > { %4478 = vtanh.f32 %v2264_v4  ;;  %v2266_v21 = vmul.f32 0.7978846, %v2234_v6  ;;  %v2172_v61 = vmul.f32 %v2140_v25, %v5588_v62  ;;  %2557 = vmatmul.mubr.bf16.vlgmr.msra.gmra.mrb[56].mxu0 %v2380_v0  ;;  %v2142_v23 = vmul.f32 0.044715, %v5596_v57  ;;  %v5601_v12 = vpop.f32.mrb[59].mxu1 }
 0x73a   : > { %4480 = vtanh.f32 %v2265_v26  ;;  %v2267_v24 = vmul.f32 0.7978846, %v2235_v20  ;;  %v2173_v9 = vmul.f32 %v2141_v55, %v5592_v54  ;;  %v2143_v33 = vmul.f32 0.044715, %v5601_v12 }
 0x73b   : > { %v4471_v15 = vpop.eup %4470  ;;  %4482 = vtanh.f32 %v2266_v21  ;;  %v2204_v18 = vmul.f32 %v2172_v61, %v5588_v62  ;;  %v2174_v63 = vmul.f32 %v2142_v23, %v5596_v57  ;;  %v2355_v32 = vmul.f32 %v2323_v13, %v5547_v60 }
 0x73c   : > { %v4473_v56 = vpop.eup %4472  ;;  %4484 = vtanh.f32 %v2267_v24  ;;  %v2205_v0 = vmul.f32 %v2173_v9, %v5592_v54  ;;  %v2175_v52 = vmul.f32 %v2143_v33, %v5601_v12  ;;  %v2322_v30 = vadd.f32 1.0, %v4467_v40 }
 0x73d   : > { %v4475_v17 = vpop.eup %4474  ;;  %v2236_v35 = vadd.f32 %v2204_v18, %v5588_v62  ;;  %v2206_v53 = vmul.f32 %v2174_v63, %v5596_v57  ;;  %v2383_v4 = vpack.c.bf16 %v2355_v32, %v2353_v2  ;;  %v2352_v6 = vmul.f32 %v2320_v34, %v5543_v42 }
 0x73e   : > { %v4477_v25 = vpop.eup %4476  ;;  %v2237_v26 = vadd.f32 %v2205_v0, %v5592_v54  ;;  %v2207_v60 = vmul.f32 %v2175_v52, %v5601_v12  ;;  %v5615_v13 = vpop.f32.mrb[60].mxu1  ;;  %v2354_v20 = vmul.f32 %v2322_v30, %v5549_v1  ;;  %v2325_v55 = vadd.f32 1.0, %v4473_v56 }
 0x73f   : > { %v2268_v21 = vmul.f32 0.7978846, %v2236_v35  ;;  %v2238_v40 = vadd.f32 %v2206_v53, %v5596_v57  ;;  %2564 = vmatprep.mubr.bf16.mxu0 %v2383_v4  ;;  %v2144_v61 = vmul.f32 0.044715, %v5615_v13  ;;  %v5620_v23 = vpop.f32.mrb[61].mxu1  ;;  %v2327_v2 = vadd.f32 1.0, %v4477_v25 }
 0x740   : > { %v2269_v42 = vmul.f32 0.7978846, %v2237_v26  ;;  %v2239_v34 = vadd.f32 %v2207_v60, %v5601_v12  ;;  %v2382_v24 = vpack.c.bf16 %v2354_v20, %v2352_v6  ;;  %v2145_v9 = vmul.f32 0.044715, %v5620_v23  ;;  %v5624_v33 = vpop.f32.mrb[62].mxu1 }
 0x741   : > { %4486 = vtanh.f32 %v2268_v21  ;;  %v2270_v1 = vmul.f32 0.7978846, %v2238_v40  ;;  %v2176_v18 = vmul.f32 %v2144_v61, %v5615_v13  ;;  %v2146_v63 = vmul.f32 0.044715, %v5624_v33  ;;  %v5628_v32 = vpop.f32.mrb[63].mxu1 }
 0x742   : > { %4488 = vtanh.f32 %v2269_v42  ;;  %v2271_v56 = vmul.f32 0.7978846, %v2239_v34  ;;  %2565 = vmatmul.mubr.bf16.gmra.mrb[60].mxu0 %v2382_v24  ;;  %v2177_v0 = vmul.f32 %v2145_v9, %v5620_v23  ;;  %v2147_v52 = vmul.f32 0.044715, %v5628_v32 }
 0x743   : > { %v5632_v30 = vpop.eup %4478  ;;  %4490 = vtanh.f32 %v2270_v1  ;;  %v2208_v35 = vmul.f32 %v2176_v18, %v5615_v13  ;;  %v2178_v53 = vmul.f32 %v2146_v63, %v5624_v33  ;;  %v2102_v4 = vmul.f32 0.5, %v5551_v29 }
 0x744   : > { %v4481_v6 = vpop.eup %4480  ;;  %v2209_v25 = vmul.f32 %v2177_v0, %v5620_v23  ;;  %v2179_v26 = vmul.f32 %v2147_v52, %v5628_v32  ;;  %v2357_v60 = vmul.f32 %v2325_v55, %v5557_v45  ;;  %v2359_v20 = vmul.f32 %v2327_v2, %v5560_v50 }
 0x745   : > { %v4483_v21 = vpop.eup %4482  ;;  %v2240_v40 = vadd.f32 %v2208_v35, %v5615_v13  ;;  %v2210_v61 = vmul.f32 %v2178_v53, %v5624_v33  ;;  %v2324_v42 = vadd.f32 1.0, %v4471_v15  ;;  %v2326_v34 = vadd.f32 1.0, %v4475_v17 }
 0x746   : > { %v4485_v24 = vpop.eup %4484  ;;  %4492 = vtanh.f32 %v2271_v56  ;;  %v2241_v29 = vadd.f32 %v2209_v25, %v5620_v23  ;;  %v2211_v9 = vmul.f32 %v2179_v26, %v5628_v32  ;;  %v2385_v1 = vpack.c.bf16 %v2359_v20, %v2357_v60  ;;  %v2073_v18 = vpop.f32.mrb[64].mxu1 }
 0x747   : > { %v2272_v63 = vmul.f32 0.7978846, %v2240_v40  ;;  %v2242_v45 = vadd.f32 %v2210_v61, %v5624_v33  ;;  %v2148_v55 = vmul.f32 0.044715, %v2073_v18  ;;  %v5646_v50 = vpop.f32.mrb[65].mxu1  ;;  %v2105_v2 = vmul.f32 0.5, %v5567_v43 }
 0x748   : > { %v2273_v0 = vmul.f32 0.7978846, %v2241_v29  ;;  %v2243_v15 = vadd.f32 %v2211_v9, %v5628_v32  ;;  %2572 = vmatprep.mubr.bf16.mxu0 %v2385_v1  ;;  %v2356_v17 = vmul.f32 %v2324_v42, %v5553_v16  ;;  %v2358_v56 = vmul.f32 %v2326_v34, %v2102_v4  ;;  %v5651_v52 = vpop.f32.mrb[66].mxu1 }
 0x749   : > { %4494 = vtanh.f32 %v2272_v63  ;;  %v2274_v35 = vmul.f32 0.7978846, %v2242_v45  ;;  %v2180_v53 = vmul.f32 %v2148_v55, %v2073_v18  ;;  %v2149_v25 = vmul.f32 0.044715, %v5646_v50  ;;  %v5654_v26 = vpop.f32.mrb[67].mxu1 }
 0x74a   : > { %4496 = vtanh.f32 %v2273_v0  ;;  %v2275_v60 = vmul.f32 0.7978846, %v2243_v15  ;;  %v5656_v20 = vmul.f32 0.5, %v2073_v18  ;;  %v2384_v43 = vpack.c.bf16 %v2358_v56, %v2356_v17 }
 0x74b   : > { %v5658_v40 = vpop.eup %4486  ;;  %4498 = vtanh.f32 %v2274_v35  ;;  %v2212_v61 = vmul.f32 %v2180_v53, %v2073_v18  ;;  %v2181_v16 = vmul.f32 %v2149_v25, %v5646_v50  ;;  %v2150_v4 = vmul.f32 0.044715, %v5651_v52 }
 0x74c   : > { %v4489_v42 = vpop.eup %4488  ;;  %4500 = vtanh.f32 %v2275_v60  ;;  %2573 = vmatmul.mubr.bf16.gmra.mrb[64].mxu0 %v2384_v43  ;;  %v2151_v34 = vmul.f32 0.044715, %v5654_v26  ;;  %v2107_v29 = vmul.f32 0.5, %v5574_v39  ;;  %v2329_v9 = vadd.f32 1.0, %v4481_v6 }
 0x74d   : > { %v5664_v1 = vpop.eup %4490  ;;  %v2244_v63 = vadd.f32 %v2212_v61, %v2073_v18  ;;  %v2213_v45 = vmul.f32 %v2181_v16, %v5646_v50  ;;  %v2182_v55 = vmul.f32 %v2150_v4, %v5651_v52  ;;  %v2331_v0 = vadd.f32 1.0, %v4485_v24 }
 0x74e   : > { %v2183_v15 = vmul.f32 %v2151_v34, %v5654_v26  ;;  %v2361_v17 = vmul.f32 %v2329_v9, %v2105_v2  ;;  %v5669_v56 = vpop.f32.mrb[68].mxu1  ;;  %v2104_v35 = vmul.f32 0.5, %v5563_v41  ;;  %v2106_v53 = vmul.f32 0.5, %v5570_v10 }
 0x74f   : > { %v2276_v25 = vmul.f32 0.7978846, %v2244_v63  ;;  %v2245_v39 = vadd.f32 %v2213_v45, %v5646_v50  ;;  %v2214_v6 = vmul.f32 %v2182_v55, %v5651_v52  ;;  %v2363_v18 = vmul.f32 %v2331_v0, %v2107_v29  ;;  %v5675_v60 = vpop.f32.mrb[69].mxu1 }
 0x750   : > { %v4493_v43 = vpop.eup %4492  ;;  %v2215_v24 = vmul.f32 %v2183_v15, %v5654_v26  ;;  %v2152_v61 = vmul.f32 0.044715, %v5669_v56  ;;  %v2328_v2 = vadd.f32 1.0, %v5632_v30  ;;  %v2330_v16 = vadd.f32 1.0, %v4483_v21  ;;  %v5680_v4 = vpop.f32.mrb[70].mxu1 }
 0x751   : > { %4502 = vtanh.f32 %v2276_v25  ;;  %v2277_v41 = vmul.f32 0.7978846, %v2245_v39  ;;  %v2246_v10 = vadd.f32 %v2214_v6, %v5651_v52  ;;  %v2387_v34 = vpack.c.bf16 %v2363_v18, %v2361_v17  ;;  %v5683_v9 = vpop.f32.mrb[71].mxu1 }
 0x752   : > { %v2247_v29 = vadd.f32 %v2215_v24, %v5654_v26  ;;  %v2184_v63 = vmul.f32 %v2152_v61, %v5669_v56  ;;  %v2360_v45 = vmul.f32 %v2328_v2, %v2104_v35  ;;  %v2362_v55 = vmul.f32 %v2330_v16, %v2106_v53 }
 0x753   : > { %v5687_v0 = vpop.eup %4494  ;;  %4504 = vtanh.f32 %v2277_v41  ;;  %v2278_v30 = vmul.f32 0.7978846, %v2246_v10  ;;  %2580 = vmatprep.mubr.bf16.mxu0 %v2387_v34  ;;  %v2153_v21 = vmul.f32 0.044715, %v5675_v60  ;;  %v2154_v15 = vmul.f32 0.044715, %v5680_v4 }
 0x754   : > { %v4497_v25 = vpop.eup %4496  ;;  %v2279_v39 = vmul.f32 0.7978846, %v2247_v29  ;;  %v2216_v17 = vmul.f32 %v2184_v63, %v5669_v56  ;;  %v2386_v6 = vpack.c.bf16 %v2362_v55, %v2360_v45  ;;  %v2155_v18 = vmul.f32 0.044715, %v5683_v9 }
 0x755   : > { %v4499_v24 = vpop.eup %4498  ;;  %4506 = vtanh.f32 %v2278_v30  ;;  %v2185_v35 = vmul.f32 %v2153_v21, %v5675_v60  ;;  %v2186_v53 = vmul.f32 %v2154_v15, %v5680_v4  ;;  %v2109_v61 = vmul.f32 0.5, %v5592_v54 }
 0x756   : > { %v4501_v2 = vpop.eup %4500  ;;  %4508 = vtanh.f32 %v2279_v39  ;;  %v2248_v16 = vadd.f32 %v2216_v17, %v5669_v56  ;;  %2581 = vmatmul.mubr.bf16.gmra.mrb[68].mxu0 %v2386_v6  ;;  %v2187_v41 = vmul.f32 %v2155_v18, %v5683_v9  ;;  %v2111_v10 = vmul.f32 0.5, %v5601_v12 }
 0x757   : > { %v2217_v34 = vmul.f32 %v2185_v35, %v5675_v60  ;;  %v2218_v29 = vmul.f32 %v2186_v53, %v5680_v4  ;;  %v2333_v63 = vadd.f32 1.0, %v4489_v42  ;;  %v2335_v45 = vadd.f32 1.0, %v4493_v43 }
 0x758   : > { %v2280_v55 = vmul.f32 0.7978846, %v2248_v16  ;;  %v2219_v30 = vmul.f32 %v2187_v41, %v5683_v9  ;;  %v2108_v54 = vmul.f32 0.5, %v5588_v62  ;;  %v2110_v21 = vmul.f32 0.5, %v5596_v57 }
 0x759   : > { %v2249_v15 = vadd.f32 %v2217_v34, %v5675_v60  ;;  %v2250_v39 = vadd.f32 %v2218_v29, %v5680_v4  ;;  %v2365_v17 = vmul.f32 %v2333_v63, %v2109_v61  ;;  %v2367_v6 = vmul.f32 %v2335_v45, %v2111_v10 }
 0x75a   : > { %4510 = vtanh.f32 %v2280_v55  ;;  %v2251_v12 = vadd.f32 %v2219_v30, %v5683_v9  ;;  %v2332_v18 = vadd.f32 1.0, %v5658_v40  ;;  %v2334_v42 = vadd.f32 1.0, %v5664_v1 }
 0x75b   : > { %v4503_v43 = vpop.eup %4502  ;;  %v2118_v35 = vmul.f32 0.5, %v5651_v52  ;;  %v2281_v53 = vmul.f32 0.7978846, %v2249_v15  ;;  %v2282_v62 = vmul.f32 0.7978846, %v2250_v39  ;;  %v2389_v16 = vpack.c.bf16 %v2367_v6, %v2365_v17 }
 0x75c   : > { %v2283_v57 = vmul.f32 0.7978846, %v2251_v12  ;;  %v2364_v41 = vmul.f32 %v2332_v18, %v2108_v54  ;;  %v2366_v34 = vmul.f32 %v2334_v42, %v2110_v21  ;;  %v2113_v29 = vmul.f32 0.5, %v5620_v23 }
 0x75d   : > { %v4505_v61 = vpop.eup %4504  ;;  %4512 = vtanh.f32 %v2281_v53  ;;  %2588 = vmatprep.mubr.bf16.mxu0 %v2389_v16  ;;  %v2115_v10 = vmul.f32 0.5, %v5628_v32  ;;  %v2337_v63 = vadd.f32 1.0, %v4497_v25  ;;  %v2339_v40 = vadd.f32 1.0, %v4501_v2 }
 0x75e   : > { %v2340_v45 = vadd.f32 1.0, %v4503_v43  ;;  %4514 = vtanh.f32 %v2282_v62  ;;  %v2388_v1 = vpack.c.bf16 %v2366_v34, %v2364_v41  ;;  %v2112_v52 = vmul.f32 0.5, %v5615_v13 }
 0x75f   : > { %v4507_v55 = vpop.eup %4506  ;;  %4516 = vtanh.f32 %v2283_v57  ;;  %v2369_v30 = vmul.f32 %v2337_v63, %v2113_v29  ;;  %v2371_v15 = vmul.f32 %v2339_v40, %v2115_v10  ;;  %v2114_v54 = vmul.f32 0.5, %v5624_v33 }
 0x760   : > { %v4509_v21 = vpop.eup %4508  ;;  %v2342_v23 = vadd.f32 1.0, %v4507_v55  ;;  %2589 = vmatmul.mubr.bf16.gmra.mrb[72].mxu0 %v2388_v1  ;;  %v2336_v39 = vadd.f32 1.0, %v5687_v0  ;;  %v2338_v17 = vadd.f32 1.0, %v4499_v24  ;;  %v2117_v32 = vmul.f32 0.5, %v5646_v50 }
 0x761   : > { %v2391_v25 = vpack.c.bf16 %v2371_v15, %v2369_v30  ;;  %v2119_v2 = vmul.f32 0.5, %v5654_v26  ;;  %v2341_v6 = vadd.f32 1.0, %v4505_v61  ;;  %v2343_v12 = vadd.f32 1.0, %v4509_v21 }
 0x762   : > { %v2372_v13 = vmul.f32 %v2340_v45, %v5656_v20  ;;  %v2374_v18 = vmul.f32 %v2342_v23, %v2118_v35  ;;  %v2368_v42 = vmul.f32 %v2336_v39, %v2112_v52  ;;  %v2370_v43 = vmul.f32 %v2338_v17, %v2114_v54 }
 0x763   : > { %2596 = vmatprep.mubr.bf16.mxu0 %v2391_v25  ;;  %v2373_v33 = vmul.f32 %v2341_v6, %v2117_v32  ;;  %v2375_v53 = vmul.f32 %v2343_v12, %v2119_v2  ;;  %v2120_v20 = vmul.f32 0.5, %v5669_v56  ;;  %v2122_v35 = vmul.f32 0.5, %v5680_v4 }
 0x764   : > { %v4511_v62 = vpop.eup %4510  ;;  %v2390_v16 = vpack.c.bf16 %v2370_v43, %v2368_v42  ;;  %v2392_v57 = vpack.c.bf16 %v2374_v18, %v2372_v13  ;;  %v2121_v61 = vmul.f32 0.5, %v5675_v60  ;;  %v2123_v10 = vmul.f32 0.5, %v5683_v9 }
 0x765   : > { %v2393_v0 = vpack.c.bf16 %v2375_v53, %v2373_v33  ;;  %v2344_v50 = vadd.f32 1.0, %v4511_v62 }
 0x767   : > { %v4513_v24 = vpop.eup %4512  ;;  %2604 = vmatprep.mubr.bf16.mxu1 %v2393_v0  ;;  %v2376_v40 = vmul.f32 %v2344_v50, %v2120_v20 }
 0x768   : > { %v4515_v41 = vpop.eup %4514  ;;  %2597 = vmatmul.mubr.bf16.gmra.mrb[76].mxu0 %v2390_v16  ;;  %2605 = vmatmul.mubr.bf16.vlgmr.msra.gmra.mrb[72].mxu1 %v2392_v57  ;;  %v2345_v26 = vadd.f32 1.0, %v4513_v24 }
 0x769   : > { %v4517_v34 = vpop.eup %4516  ;;  %v2346_v29 = vadd.f32 1.0, %v4515_v41 }
 0x76a   : > { %v2347_v63 = vadd.f32 1.0, %v4517_v34  ;;  %v2377_v1 = vmul.f32 %v2345_v26, %v2121_v61 }
 0x76b   : > { %v2378_v45 = vmul.f32 %v2346_v29, %v2122_v35 }
 0x76c   : > { %v2379_v52 = vmul.f32 %v2347_v63, %v2123_v10 }
 0x76d   : > { %v2394_v55 = vpack.c.bf16 %v2378_v45, %v2376_v40 }
 0x76e   : > { %v2395_v30 = vpack.c.bf16 %v2379_v52, %v2377_v1 }
 0x770   : > { %2612 = vmatprep.mubr.bf16.mxu1 %v2395_v30 }
 0x771   : > { %2613 = vmatmul.mubr.bf16.gmra.mrb[76].mxu1 %v2394_v55 }
 0x80c   : > { %v3883_v15 = vpop.f32.mrb[56].mxu0 }
 0x80d   : > { %v3884_v54 = vpop.f32.mrb[57].mxu0 }
 0x80e   : > { %v3885_v21 = vadd.f32 %v3884_v54, %v3883_v15  ;;  %v3886_v56 = vpop.f32.mrb[58].mxu0 }
 0x80f   : > { %v3887_v23 = vpop.f32.mrb[59].mxu0 }
 0x810   : > { %v3888_v4 = vadd.f32 %v3887_v23, %v3886_v56  ;;  %v5723_v39 = vadd.f32 %v3885_v21, %v5391_v11 }
 0x812   : > { %2637 = vadd.xlane.f32.xlu0 %v5723_v39  ;;  %v5727_v60 = vadd.f32 %v3888_v4, %v5394_v3 }
 0x814   : > { %2639 = vadd.xlane.f32.xlu1 %v5727_v60 }
 0x815   : > { %v3889_v9 = vpop.f32.mrb[60].mxu0 }
 0x816   : > { %v3890_v17 = vpop.f32.mrb[61].mxu0 }
 0x817   : > { %v3891_v32 = vadd.f32 %v3890_v17, %v3889_v9  ;;  %v3892_v25 = vpop.f32.mrb[62].mxu0 }
 0x818   : > { %v3893_v2 = vpop.f32.mrb[63].mxu0 }
 0x819   : > { %v3894_v6 = vadd.f32 %v3893_v2, %v3892_v25  ;;  %v5731_v12 = vadd.f32 %v3891_v32, %v5408_v46 }
 0x81b   : > { %2641 = vadd.xlane.f32.xlu0 %v5731_v12  ;;  %v5735_v11 = vadd.f32 %v3894_v6, %v5404_v31 }
 0x81d   : > { %2643 = vadd.xlane.f32.xlu1 %v5735_v11 }
 0x81f   : > { %v3895_v3 = vpop.f32.mrb[64].mxu0 }
 0x820   : > { %v3896_v13 = vpop.f32.mrb[65].mxu0 }
 0x821   : > { %v3897_v18 = vadd.f32 %v3896_v13, %v3895_v3  ;;  %v3898_v42 = vpop.f32.mrb[66].mxu0 }
 0x822   : > { %v3899_v43 = vpop.f32.mrb[67].mxu0 }
 0x823   : > { %v3900_v33 = vadd.f32 %v3899_v43, %v3898_v42  ;;  %v5739_v53 = vadd.f32 %v3897_v18, %v5421_v37 }
 0x825   : > { %2645 = vadd.xlane.f32.xlu0 %v5739_v53  ;;  %v5743_v46 = vadd.f32 %v3900_v33, %v5417_v44 }
 0x827   : > { %2647 = vadd.xlane.f32.xlu1 %v5743_v46 }
 0x829   : > { %v3901_v31 = vpop.f32.mrb[68].mxu0 }
 0x82a   : > { %v3902_v62 = vpop.f32.mrb[69].mxu0 }
 0x82b   : > { %v3903_v16 = vadd.f32 %v3902_v62, %v3901_v31  ;;  %v3904_v57 = vpop.f32.mrb[70].mxu0 }
 0x82c   : > { %v3905_v0 = vpop.f32.mrb[71].mxu0 }
 0x82d   : > { %v3906_v24 = vadd.f32 %v3905_v0, %v3904_v57  ;;  %v5747_v50 = vadd.f32 %v3903_v16, %v5433_v8 }
 0x82f   : > { %2649 = vadd.xlane.f32.xlu0 %v5747_v50  ;;  %v5751_v37 = vadd.f32 %v3906_v24, %v5430_v58 }
 0x831   : > { %2651 = vadd.xlane.f32.xlu1 %v5751_v37 }
 0x833   : > { %v3907_v44 = vpop.f32.mrb[72].mxu0 }
 0x834   : > { %v3908_v41 = vpop.f32.mrb[73].mxu0 }
 0x835   : > { %v3909_v26 = vadd.f32 %v3908_v41, %v3907_v44  ;;  %v3910_v34 = vpop.f32.mrb[74].mxu0 }
 0x836   : > { %v3911_v20 = vpop.f32.mrb[75].mxu0 }
 0x837   : > { %v3912_v35 = vadd.f32 %v3911_v20, %v3910_v34  ;;  %v5755_v29 = vadd.f32 %v3909_v26, %v5447_v36 }
 0x839   : > { %2653 = vadd.xlane.f32.xlu0 %v5755_v29  ;;  %v5759_v8 = vadd.f32 %v3912_v35, %v5443_v5 }
 0x83b   : > { %2655 = vadd.xlane.f32.xlu1 %v5759_v8  ;;  %v3913_v58 = vpop.f32.mrb[76].mxu0  ;;  %v3919_v61 = vpop.f32.mrb[72].mxu1 }
 0x83c   : > { %v3914_v10 = vpop.f32.mrb[77].mxu0  ;;  %v3920_v63 = vpop.f32.mrb[73].mxu1 }
 0x83d   : > { %v3915_v40 = vadd.f32 %v3914_v10, %v3913_v58  ;;  %v3916_v45 = vpop.f32.mrb[78].mxu0  ;;  %v3921_v1 = vadd.f32 %v3920_v63, %v3919_v61  ;;  %v3922_v52 = vpop.f32.mrb[74].mxu1  ;;  %v4342_v10 = vld [vmem:[%s6125_s10] sm:$0xff]  }
 0x83e   : > { %v3917_v55 = vpop.f32.mrb[79].mxu0  ;;  %v3923_v30 = vpop.f32.mrb[75].mxu1  ;;  %4131 = vmatprep.subr.bf16.mxu0 %v4342_v10 }
 0x83f   : > { %v3918_v15 = vadd.f32 %v3917_v55, %v3916_v45  ;;  %v5763_v36 = vadd.f32 %v3915_v40, %v5460_v14  ;;  %v3924_v54 = vadd.f32 %v3923_v30, %v3922_v52  ;;  %v5770_v21 = vadd.f32 %v3921_v1, %v5473_v59  ;;  %4132 = vmatpush3.bf16.msra.mxu0 %v4342_v10  ;;  %v4344_v30 = vld [vmem:[%s6125_s10 + $0x10] sm:$0xff]  }
 0x841   : > { %2657 = vadd.xlane.f32.xlu0 %v5763_v36  ;;  %v5767_v5 = vadd.f32 %v3918_v15, %v5456_v7  ;;  %v5774_v56 = vadd.f32 %v3924_v54, %v5469_v19 }
 0x843   : > { %2659 = vadd.xlane.f32.xlu1 %v5767_v5 }
 0x844   : > { %v3925_v23 = vpop.f32.mrb[76].mxu1 }
 0x845   : > { %2661 = vadd.xlane.f32.xlu0 %v5770_v21  ;;  %v3926_v4 = vpop.f32.mrb[77].mxu1 }
 0x846   : > { %v3927_v14 = vadd.f32 %v3926_v4, %v3925_v23  ;;  %v3928_v9 = vpop.f32.mrb[78].mxu1 }
 0x847   : > { %2663 = vadd.xlane.f32.xlu1 %v5774_v56  ;;  %v3929_v17 = vpop.f32.mrb[79].mxu1 }
 0x848   : > { %v3930_v32 = vadd.f32 %v3929_v17, %v3928_v9  ;;  %v5779_v7 = vadd.f32 %v3927_v14, %v5485_v28 }
 0x84a   : > { %2665 = vadd.xlane.f32.xlu0 %v5779_v7  ;;  %v5783_v59 = vadd.f32 %v3930_v32, %v5482_v38 }
 0x84c   : > { %2667 = vadd.xlane.f32.xlu1 %v5783_v59 }
 0x89f   : > { %v2638_v19 = vpop.xlane.xlu0 %2637 }
 0x8a0   : > { %v2669_v25 = vmul.f32 0.0078125, %v2638_v19 }
 0x8a1   : > { %v2640_v2 = vpop.xlane.xlu1 %2639 }
 0x8a2   : > { %v5787_v6 = vsub.f32 %v5723_v39, %v2669_v25  ;;  %v2670_v3 = vmul.f32 0.0078125, %v2640_v2 }
 0x8a4   : > { %v5790_v13 = vsub.f32 %v5727_v60, %v2670_v3  ;;  %v2701_v28 = vmul.f32 %v5787_v6, %v5787_v6 }
 0x8a6   : > { %2717 = vadd.xlane.f32.xlu0 %v2701_v28  ;;  %v2702_v38 = vmul.f32 %v5790_v13, %v5790_v13  ;;  %v4346_v28 = vld [vmem:[%s6125_s10 + $0x20] sm:$0xff]  }
 0x8a8   : > { %v2642_v18 = vpop.xlane.xlu0 %2641  ;;  %2719 = vadd.xlane.f32.xlu1 %v2702_v38 }
 0x8a9   : > { %v2671_v42 = vmul.f32 0.0078125, %v2642_v18 }
 0x8aa   : > { %v2644_v43 = vpop.xlane.xlu1 %2643 }
 0x8ab   : > { %v5797_v33 = vsub.f32 %v5731_v12, %v2671_v42  ;;  %v2672_v39 = vmul.f32 0.0078125, %v2644_v43 }
 0x8ad   : > { %v5800_v31 = vsub.f32 %v5735_v11, %v2672_v39  ;;  %v2703_v60 = vmul.f32 %v5797_v33, %v5797_v33 }
 0x8af   : > { %2721 = vadd.xlane.f32.xlu0 %v2703_v60  ;;  %v2704_v62 = vmul.f32 %v5800_v31, %v5800_v31 }
 0x8b1   : > { %2723 = vadd.xlane.f32.xlu1 %v2704_v62 }
 0x8b2   : > { %v2646_v16 = vpop.xlane.xlu0 %2645 }
 0x8b3   : > { %v2673_v57 = vmul.f32 0.0078125, %v2646_v16 }
 0x8b4   : > { %v2648_v0 = vpop.xlane.xlu1 %2647 }
 0x8b5   : > { %v5807_v24 = vsub.f32 %v5739_v53, %v2673_v57  ;;  %v2674_v12 = vmul.f32 0.0078125, %v2648_v0  ;;  %v4671_v0 = vmov 0.0|0.0  }
 0x8b6   : > { %4163 = vmatprep.subr.bf16.mxu1 %v4671_v0 }
 0x8b7   : > { %v5810_v44 = vsub.f32 %v5743_v46, %v2674_v12  ;;  %v2705_v11 = vmul.f32 %v5807_v24, %v5807_v24  ;;  %v4673_v12 = vmov 0.0  }
 0x8b8   : > { %4109 = vmatprep.mubr.msk.f32.mxu1 %vm4672_vm3, %v4673_v12 }
 0x8b9   : > { %2725 = vadd.xlane.f32.xlu0 %v2705_v11  ;;  %v2706_v41 = vmul.f32 %v5810_v44, %v5810_v44 }
 0x8bb   : > { %2727 = vadd.xlane.f32.xlu1 %v2706_v41 }
 0x8bc   : > { %v2650_v26 = vpop.xlane.xlu0 %2649 }
 0x8bd   : > { %v2675_v34 = vmul.f32 0.0078125, %v2650_v26 }
 0x8be   : > { %v2652_v20 = vpop.xlane.xlu1 %2651 }
 0x8bf   : > { %v5817_v35 = vsub.f32 %v5747_v50, %v2675_v34  ;;  %v2676_v53 = vmul.f32 0.0078125, %v2652_v20  ;;  %v4343_v50 = vld [vmem:[%s6125_s10 + $0x8] sm:$0xff]  }
 0x8c0   : > { %4133 = vmatprep.subr.bf16.mxu0 %v4343_v50 }
 0x8c1   : > { %v5820_v58 = vsub.f32 %v5751_v37, %v2676_v53  ;;  %v2707_v46 = vmul.f32 %v5817_v35, %v5817_v35  ;;  %4134 = vmatpush3.bf16.msra.mxu0 %v4343_v50 }
 0x8c2   : > { %4135 = vmatprep.subr.bf16.mxu0 %v4344_v30 }
 0x8c3   : > { %2729 = vadd.xlane.f32.xlu0 %v2707_v46  ;;  %v2708_v61 = vmul.f32 %v5820_v58, %v5820_v58 }
 0x8c5   : > { %2731 = vadd.xlane.f32.xlu1 %v2708_v61  ;;  %4136 = vmatpush3.bf16.msra.mxu0 %v4344_v30 }
 0x8c6   : > { %v2654_v63 = vpop.xlane.xlu0 %2653 }
 0x8c7   : > { %v2677_v37 = vmul.f32 0.0078125, %v2654_v63 }
 0x8c8   : > { %v2656_v40 = vpop.xlane.xlu1 %2655 }
 0x8c9   : > { %v5833_v45 = vsub.f32 %v5755_v29, %v2677_v37  ;;  %v2678_v1 = vmul.f32 0.0078125, %v2656_v40  ;;  %v4345_v29 = vld [vmem:[%s6125_s10 + $0x18] sm:$0xff]  }
 0x8ca   : > { %4137 = vmatprep.subr.bf16.mxu0 %v4345_v29 }
 0x8cb   : > { %v5836_v52 = vsub.f32 %v5759_v8, %v2678_v1  ;;  %v2709_v55 = vmul.f32 %v5833_v45, %v5833_v45  ;;  %4138 = vmatpush3.bf16.msra.mxu0 %v4345_v29  ;;  %v5896_v1 = vld [vmem:[%s6123_s8] ss:$0 sm:$0xff] }
 0x8cc   : > { %4139 = vmatprep.subr.bf16.mxu0 %v4346_v28 }
 0x8cd   : > { %2733 = vadd.xlane.f32.xlu0 %v2709_v55  ;;  %v2710_v15 = vmul.f32 %v5836_v52, %v5836_v52 }
 0x8ce   : > { %v2658_v54 = vpop.xlane.xlu0 %2657 }
 0x8cf   : > { %v2679_v23 = vmul.f32 0.0078125, %v2658_v54  ;;  %2735 = vadd.xlane.f32.xlu1 %v2710_v15  ;;  %4140 = vmatpush3.bf16.msra.mxu0 %v4346_v28 }
 0x8d0   : > { %v2660_v8 = vpop.xlane.xlu1 %2659 }
 0x8d1   : > { %v5849_v4 = vsub.f32 %v5763_v36, %v2679_v23  ;;  %v2680_v14 = vmul.f32 0.0078125, %v2660_v8  ;;  %v5907_v23 = vld [vmem:[%s6124_s9] ss:$0 sm:$0xff] }
 0x8d2   : > { %v2662_v9 = vpop.xlane.xlu0 %2661 }
 0x8d3   : > { %v5852_v17 = vsub.f32 %v5767_v5, %v2680_v14  ;;  %v2711_v32 = vmul.f32 %v5849_v4, %v5849_v4  ;;  %v2681_v19 = vmul.f32 0.0078125, %v2662_v9 }
 0x8d4   : > { %v2664_v25 = vpop.xlane.xlu1 %2663 }
 0x8d5   : > { %2737 = vadd.xlane.f32.xlu0 %v2711_v32  ;;  %v5857_v2 = vsub.f32 %v5770_v21, %v2681_v19  ;;  %v2712_v3 = vmul.f32 %v5852_v17, %v5852_v17  ;;  %v2682_v36 = vmul.f32 0.0078125, %v2664_v25  ;;  %v4347_v21 = vld [vmem:[%s6125_s10 + $0x28] sm:$0xff]  }
 0x8d6   : > { %4141 = vmatprep.subr.bf16.mxu0 %v4347_v21 }
 0x8d7   : > { %2739 = vadd.xlane.f32.xlu1 %v2712_v3  ;;  %v5865_v5 = vsub.f32 %v5774_v56, %v2682_v36  ;;  %v2713_v38 = vmul.f32 %v5857_v2, %v5857_v2  ;;  %v2666_v18 = vpop.xlane.xlu0 %2665  ;;  %4142 = vmatpush3.bf16.msra.mxu0 %v4347_v21 }
 0x8d8   : > { %v2683_v42 = vmul.f32 0.0078125, %v2666_v18 }
 0x8d9   : > { %2741 = vadd.xlane.f32.xlu0 %v2713_v38  ;;  %v2714_v43 = vmul.f32 %v5865_v5, %v5865_v5  ;;  %v2668_v39 = vpop.xlane.xlu1 %2667 }
 0x8da   : > { %v5875_v60 = vsub.f32 %v5779_v7, %v2683_v42  ;;  %v2684_v56 = vmul.f32 0.0078125, %v2668_v39  ;;  %v4348_v7 = vld [vmem:[%s6125_s10 + $0x30] sm:$0xff]  }
 0x8db   : > { %2743 = vadd.xlane.f32.xlu1 %v2714_v43  ;;  %4143 = vmatprep.subr.bf16.mxu0 %v4348_v7 }
 0x8dc   : > { %v5878_v62 = vsub.f32 %v5783_v59, %v2684_v56  ;;  %v2715_v16 = vmul.f32 %v5875_v60, %v5875_v60  ;;  %v4349_v59 = vld [vmem:[%s6125_s10 + $0x38] sm:$0xff]   ;;  %4144 = vmatpush3.bf16.msra.mxu0 %v4348_v7 }
 0x8dd   : > { %4145 = vmatprep.subr.bf16.mxu0 %v4349_v59 }
 0x8de   : > { %2745 = vadd.xlane.f32.xlu0 %v2715_v16  ;;  %v2716_v57 = vmul.f32 %v5878_v62, %v5878_v62 }
 0x8e0   : > { %2747 = vadd.xlane.f32.xlu1 %v2716_v57  ;;  %4146 = vmatpush3.bf16.msra.mxu0 %v4349_v59 }
 0x933   : > { %v2718_v11 = vpop.xlane.xlu0 %2717 }
 0x934   : > { %v2749_v41 = vmul.f32 0.0078125, %v2718_v11 }
 0x935   : > { %v2720_v26 = vpop.xlane.xlu1 %2719 }
 0x936   : > { %v2765_v34 = vadd.f32 1e-05, %v2749_v41  ;;  %v2750_v20 = vmul.f32 0.0078125, %v2720_v26 }
 0x938   : > { %4518 = vrsqrt.f32 %v2765_v34  ;;  %v2766_v53 = vadd.f32 1e-05, %v2750_v20 }
 0x93a   : > { %4520 = vrsqrt.f32 %v2766_v53 }
 0x93c   : > { %v2722_v46 = vpop.xlane.xlu0 %2721 }
 0x93d   : > { %v2751_v61 = vmul.f32 0.0078125, %v2722_v46 }
 0x93e   : > { %v2724_v10 = vpop.xlane.xlu1 %2723 }
 0x93f   : > { %v2767_v50 = vadd.f32 1e-05, %v2751_v61  ;;  %v2752_v63 = vmul.f32 0.0078125, %v2724_v10 }
 0x941   : > { %4522 = vrsqrt.f32 %v2767_v50  ;;  %v2768_v37 = vadd.f32 1e-05, %v2752_v63 }
 0x942   : > { %v4519_v40 = vpop.eup %4518 }
 0x943   : > { %v2797_v55 = vmul.f32 %v4519_v40, %v5787_v6  ;;  %4524 = vrsqrt.f32 %v2768_v37 }
 0x944   : > { %v4521_v30 = vpop.eup %4520 }
 0x945   : > { %v2798_v15 = vmul.f32 %v4521_v30, %v5790_v13  ;;  %v2820_v54 = vmul.f32 %v5896_v1, %v2797_v55 }
 0x946   : > { %v2726_v29 = vpop.xlane.xlu0 %2725 }
 0x947   : > { %v2753_v8 = vmul.f32 0.0078125, %v2726_v29  ;;  %v2821_v6 = vmul.f32 %v5896_v1, %v2798_v15  ;;  %v2843_v19 = vadd.f32 %v5907_v23, %v2820_v54 }
 0x948   : > { %v2728_v14 = vpop.xlane.xlu1 %2727 }
 0x949   : > { %v2769_v9 = vadd.f32 1e-05, %v2753_v8  ;;  %v2754_v32 = vmul.f32 0.0078125, %v2728_v14  ;;  %v2844_v13 = vadd.f32 %v5907_v23, %v2821_v6  ;;  %v5941_v14 = vshrl.u32 %v1080_v47, 7 }
 0x94b   : > { %v4523_v25 = vpop.eup %4522  ;;  %4526 = vrsqrt.f32 %v2769_v9  ;;  %v2770_v3 = vadd.f32 1e-05, %v2754_v32  ;;  %v2859_v36 = vpack.c.bf16 %v2844_v13, %v2843_v19  ;;  %vm2956_vm6 = vcmp.eq.s32.totalorder %v5941_v14, 0 }
 0x94c   : > { %v2799_v28 = vmul.f32 %v4523_v25, %v5797_v33 }
 0x94d   : > { %v4525_v38 = vpop.eup %4524  ;;  %4528 = vrsqrt.f32 %v2770_v3  ;;  %3713 = vst [vmem:[%s5916_s26] sm:$0xff] %v2859_v36   ;;  %4165 = vmatpush3.bf16.msra.mxu1 %v2859_v36  ;;  %4147 = vmatprep.mubr.bf16.mxu0 %v2859_v36 }
 0x94e   : > { %v2800_v18 = vmul.f32 %v4525_v38, %v5800_v31  ;;  %4166 = vmatprep.subr.bf16.mxu1 %v4671_v0  ;;  %v2822_v42 = vmul.f32 %v5896_v1, %v2799_v28  ;;  %v2940_v31 = vsel %vm2939_vm4, %v4938_v49, 1  ;;  %v5948_v28 = vsel %vm2951_vm5, 1.0, %v4673_v12 }
 0x94f   : > { %v2943_v34 = vcvt.s32.f32 %v2940_v31 }
 0x950   : > { %v2730_v21 = vpop.xlane.xlu0 %2729  ;;  %v2823_v43 = vmul.f32 %v5896_v1, %v2800_v18  ;;  %v2845_v56 = vadd.f32 %v5907_v23, %v2822_v42 }
 0x951   : > { %v2755_v33 = vmul.f32 0.0078125, %v2730_v21 }
 0x952   : > { %v2732_v39 = vpop.xlane.xlu1 %2731  ;;  %v2846_v16 = vadd.f32 %v5907_v23, %v2823_v43 }
 0x953   : > { %v2771_v57 = vadd.f32 1e-05, %v2755_v33  ;;  %v2756_v7 = vmul.f32 0.0078125, %v2732_v39 }
 0x954   : > { %v2860_v59 = vpack.c.bf16 %v2846_v16, %v2845_v56 }
 0x955   : > { %v4527_v11 = vpop.eup %4526  ;;  %4530 = vrsqrt.f32 %v2771_v57  ;;  %v2772_v41 = vadd.f32 1e-05, %v2756_v7 }
 0x956   : > { %v2801_v26 = vmul.f32 %v4527_v11, %v5807_v24  ;;  %3789 = vst [vmem:[%s5916_s26 + $0x8] sm:$0xff] %v2860_v59   ;;  %4168 = vmatpush3.bf16.msra.mxu1 %v2860_v59  ;;  %4148 = vmatmul.mubr.bf16.vlgmr.msra.gmra.mrb[80].mxu0 %v2860_v59 }
 0x957   : > { %v4529_v20 = vpop.eup %4528  ;;  %4532 = vrsqrt.f32 %v2772_v41  ;;  %4169 = vmatprep.subr.bf16.mxu1 %v4671_v0 }
 0x958   : > { %v2802_v53 = vmul.f32 %v4529_v20, %v5810_v44  ;;  %v2824_v46 = vmul.f32 %v5896_v1, %v2801_v26  ;;  %4534 = vrcp.f32 %v2943_v34  ;;  %v2942_v34 = vsel %vm2941_vm7, %v4995_v22, 1 }
 0x95a   : > { %v2734_v49 = vpop.xlane.xlu0 %2733  ;;  %v2825_v61 = vmul.f32 %v5896_v1, %v2802_v53  ;;  %v2847_v24 = vadd.f32 %v5907_v23, %v2824_v46 }
 0x95b   : > { %v2757_v10 = vmul.f32 0.0078125, %v2734_v49  ;;  %v2944_v49 = vcvt.s32.f32 %v2942_v34 }
 0x95c   : > { %v2736_v50 = vpop.xlane.xlu1 %2735  ;;  %v2848_v63 = vadd.f32 %v5907_v23, %v2825_v61 }
 0x95d   : > { %v2773_v37 = vadd.f32 1e-05, %v2757_v10  ;;  %v2758_v40 = vmul.f32 0.0078125, %v2736_v50 }
 0x95e   : > { %v2861_v55 = vpack.c.bf16 %v2848_v63, %v2847_v24 }
 0x95f   : > { %v4531_v30 = vpop.eup %4530  ;;  %4536 = vrsqrt.f32 %v2773_v37  ;;  %v2774_v15 = vadd.f32 1e-05, %v2758_v40 }
 0x960   : > { %v2803_v44 = vmul.f32 %v4531_v30, %v5817_v35  ;;  %3790 = vst [vmem:[%s5916_s26 + $0x10] sm:$0xff] %v2861_v55   ;;  %4171 = vmatpush3.bf16.msra.mxu1 %v2861_v55  ;;  %4151 = vmatprep.mubr.bf16.mxu0 %v2861_v55 }
 0x961   : > { %v4533_v54 = vpop.eup %4532  ;;  %4538 = vrsqrt.f32 %v2774_v15  ;;  %4172 = vmatprep.subr.bf16.mxu1 %v4671_v0 }
 0x962   : > { %v2804_v29 = vmul.f32 %v4533_v54, %v5820_v58  ;;  %v2738_v8 = vpop.xlane.xlu0 %2737  ;;  %v2826_v6 = vmul.f32 %v5896_v1, %v2803_v44  ;;  %v4535_v32 = vpop.eup %4534 }
 0x963   : > { %v2759_v9 = vmul.f32 0.0078125, %v2738_v8  ;;  %v2949_v38 = vsel %vm4942_vm0, %v4535_v32, 0.0 }
 0x964   : > { %v2740_v35 = vpop.xlane.xlu1 %2739  ;;  %v2827_v19 = vmul.f32 %v5896_v1, %v2804_v29  ;;  %v2849_v36 = vadd.f32 %v5907_v23, %v2826_v6  ;;  %v2959_v56 = vsel %vm2956_vm6, %v2949_v38, %v5948_v28 }
 0x965   : > { %v2775_v13 = vadd.f32 1e-05, %v2759_v9  ;;  %v2760_v25 = vmul.f32 0.0078125, %v2740_v35 }
 0x966   : > { %v2742_v3 = vpop.xlane.xlu0 %2741  ;;  %v2850_v58 = vadd.f32 %v5907_v23, %v2827_v19 }
 0x967   : > { %4540 = vrsqrt.f32 %v2775_v13  ;;  %v2776_v47 = vadd.f32 1e-05, %v2760_v25  ;;  %v2761_v48 = vmul.f32 0.0078125, %v2742_v3 }
 0x968   : > { %v2862_v18 = vpack.c.bf16 %v2850_v58, %v2849_v36  ;;  %v2744_v42 = vpop.xlane.xlu1 %2743 }
 0x969   : > { %v4537_v21 = vpop.eup %4536  ;;  %4542 = vrsqrt.f32 %v2776_v47  ;;  %v2777_v43 = vadd.f32 1e-05, %v2761_v48  ;;  %v2762_v33 = vmul.f32 0.0078125, %v2744_v42 }
 0x96a   : > { %v2805_v39 = vmul.f32 %v4537_v21, %v5833_v45  ;;  %3791 = vst [vmem:[%s5916_s26 + $0x18] sm:$0xff] %v2862_v18   ;;  %4174 = vmatpush3.bf16.msra.mxu1 %v2862_v18  ;;  %4152 = vmatmul.mubr.bf16.gmra.mrb[84].mxu0 %v2862_v18 }
 0x96b   : > { %v4539_v16 = vpop.eup %4538  ;;  %4544 = vrsqrt.f32 %v2777_v43  ;;  %v2778_v57 = vadd.f32 1e-05, %v2762_v33  ;;  %v2746_v51 = vpop.xlane.xlu0 %2745  ;;  %4175 = vmatprep.subr.bf16.mxu1 %v4671_v0 }
 0x96c   : > { %v2806_v7 = vmul.f32 %v4539_v16, %v5836_v52  ;;  %v2763_v31 = vmul.f32 0.0078125, %v2746_v51  ;;  %v2828_v45 = vmul.f32 %v5896_v1, %v2805_v39 }
 0x96d   : > { %4546 = vrsqrt.f32 %v2778_v57  ;;  %4110 = vmatmul.mubr.msk.f32.vlgmr.msra.gmra.mrb[80].mxu1 %vm1104_vm1, %v2959_v56  ;;  %v2748_v59 = vpop.xlane.xlu1 %2747 }
 0x96e   : > { %v2779_v11 = vadd.f32 1e-05, %v2763_v31  ;;  %v2829_v41 = vmul.f32 %v5896_v1, %v2806_v7  ;;  %v2764_v26 = vmul.f32 0.0078125, %v2748_v59  ;;  %4128 = vmatprep.mubr.msk.f32.mxu1 %vm4672_vm3, %v4673_v12  ;;  %v2851_v52 = vadd.f32 %v5907_v23, %v2828_v45 }
 0x970   : > { %4548 = vrsqrt.f32 %v2779_v11  ;;  %v2852_v20 = vadd.f32 %v5907_v23, %v2829_v41  ;;  %v2780_v53 = vadd.f32 1e-05, %v2764_v26 }
 0x971   : > { %v4541_v46 = vpop.eup %4540 }
 0x972   : > { %v2807_v61 = vmul.f32 %v4541_v46, %v5849_v4  ;;  %v2863_v10 = vpack.c.bf16 %v2852_v20, %v2851_v52  ;;  %4550 = vrsqrt.f32 %v2780_v53 }
 0x973   : > { %v4543_v50 = vpop.eup %4542  ;;  %4552 = vrcp.f32 %v2944_v49 }
 0x974   : > { %v2808_v24 = vmul.f32 %v4543_v50, %v5852_v17  ;;  %3792 = vst [vmem:[%s5916_s26 + $0x20] sm:$0xff] %v2863_v10   ;;  %4177 = vmatpush3.bf16.msra.mxu1 %v2863_v10  ;;  %4155 = vmatprep.mubr.bf16.mxu0 %v2863_v10  ;;  %v2830_v22 = vmul.f32 %v5896_v1, %v2807_v61 }
 0x975   : > { %v4545_v12 = vpop.eup %4544  ;;  %4178 = vmatprep.subr.bf16.mxu1 %v4671_v0 }
 0x976   : > { %v2809_v63 = vmul.f32 %v4545_v12, %v5857_v2  ;;  %v2831_v37 = vmul.f32 %v5896_v1, %v2808_v24  ;;  %v2853_v55 = vadd.f32 %v5907_v23, %v2830_v22 }
 0x977   : > { %v4547_v4 = vpop.eup %4546 }
 0x978   : > { %v2810_v40 = vmul.f32 %v4547_v4, %v5865_v5  ;;  %v2854_v17 = vadd.f32 %v5907_v23, %v2831_v37  ;;  %v2832_v30 = vmul.f32 %v5896_v1, %v2809_v63 }
 0x97a   : > { %v4549_v15 = vpop.eup %4548  ;;  %v2864_v44 = vpack.c.bf16 %v2854_v17, %v2853_v55  ;;  %v2833_v54 = vmul.f32 %v5896_v1, %v2810_v40  ;;  %v2855_v2 = vadd.f32 %v5907_v23, %v2832_v30 }
 0x97b   : > { %v2811_v29 = vmul.f32 %v4549_v15, %v5875_v60 }
 0x97c   : > { %v4551_v8 = vpop.eup %4550  ;;  %3793 = vst [vmem:[%s5916_s26 + $0x28] sm:$0xff] %v2864_v44   ;;  %4180 = vmatpush3.bf16.msra.mxu1 %v2864_v44  ;;  %4156 = vmatmul.mubr.bf16.gmra.mrb[88].mxu0 %v2864_v44  ;;  %v2856_v5 = vadd.f32 %v5907_v23, %v2833_v54 }
 0x97d   : > { %v2812_v6 = vmul.f32 %v4551_v8, %v5878_v62  ;;  %4181 = vmatprep.subr.bf16.mxu1 %v4671_v0  ;;  %v2834_v9 = vmul.f32 %v5896_v1, %v2811_v29  ;;  %v4553_v35 = vpop.eup %4552 }
 0x97e   : > { %v2865_v32 = vpack.c.bf16 %v2856_v5, %v2855_v2  ;;  %v2950_v13 = vsel %vm4999_vm2, %v4553_v35, 0.0 }
 0x97f   : > { %v2835_v60 = vmul.f32 %v5896_v1, %v2812_v6  ;;  %v2857_v19 = vadd.f32 %v5907_v23, %v2834_v9  ;;  %v2960_v1 = vsel %vm2956_vm6, %v2950_v13, %v5948_v28 }
 0x980   : > { %3794 = vst [vmem:[%s5916_s26 + $0x30] sm:$0xff] %v2865_v32   ;;  %4183 = vmatpush3.bf16.msra.mxu1 %v2865_v32  ;;  %4159 = vmatprep.mubr.bf16.mxu0 %v2865_v32 }
 0x981   : > { %4184 = vmatprep.subr.bf16.mxu1 %v4671_v0  ;;  %v2858_v62 = vadd.f32 %v5907_v23, %v2835_v60 }
 0x983   : > { %v2866_v25 = vpack.c.bf16 %v2858_v62, %v2857_v19 }
 0x985   : > { %3795 = vst [vmem:[%s5916_s26 + $0x38] sm:$0xff] %v2866_v25   ;;  %4186 = vmatpush3.bf16.msra.mxu1 %v2866_v25  ;;  %4160 = vmatmul.mubr.bf16.gmra.mrb[92].mxu0 %v2866_v25 }
 0x988   : > { %4129 = vmatmul.mubr.msk.f32.vlgmr.msra.gmra.mrb[82].mxu1 %vm1104_vm1, %v2960_v1 }
 0x989   : > { %4584 = shalt.err (!%p4581_p8)
}
 0x98a   : > { %s4585_s26 = scalar_lea.hbm %s6006_s29, 1024  ;;  %s4589_s23 = scalar_lea.hbm %s6127_s12, 2048 }
 0x98b   : > { %p4586_p9 = scmp.ne.s32.totalorder %s6006_s29, %s4585_s26  ;;  %p4590_p0 = scmp.lt.u32.totalorder %s6006_s29, %s6127_s12 }
 0x98c   : > { %p4591_p1 = scmp.lt.u32.totalorder %s4589_s23, %s4585_s26  ;;  %p4593_p3 = scmp.lt.u32.totalorder %s4585_s26, %s6006_s29 }
 0x98d   : > { %p4587_p12 = pnand %p4586_p9, %p4794_p10 }
 0x98e   : > { %p4592_p2 = por %p4591_p1, %p4590_p0 }
 0x98f   : > { %p4588_p13 = pneg %p4587_p12 }
 0x990   : > { %p4594_p4 = por %p4593_p3, %p4592_p2 }
 0x992   : > { %p4595_p5 = pnand %p4594_p4, %p4588_p13 }
 0x994   : > { %4598 = shalt.err (!%p4595_p5)
}
 0x995   : > { %s4675_s22 = smov 64   ;;  %s4676_s19 = smov 4   ;;  %v3637_v0 = vld [vmem:[%s6126_s11] ss:$0 sm:$0xff] }
 0x996   : > { %4203 = dma.vmem_to_hbm [thread:$0]  (%p4794_p10), %s6009_s16, 1024, %s6006_s29, %s3358_s17, %s4675_s22, %s4675_s22, %s4676_s19  }
 0x997   : > { %s6148_s24 = sshll.u32 %s5900_s28, 6  ;;  %s3532_s29 = sshll.u32 %s4822_s30, 1 }
 0x998   : > { %s6043_s25 = scalar_lea.vmem [#allocation6], %s6148_s24  ;;  %s6051_s23 = scalar_lea.vmem %s6128_s13, %s3532_s29 }
 0x999   : > { %s3403_s30 = sshll.u32 %s6043_s25, 4  ;;  %s6149_s1 = sshll.u32 %s4777_s21, 10  ;;  %s6067_s30 = int_to_ptr.vmem [resolvable:$true] %s3403_s30 }
 0x99a   : > { %s6065_s24 = scalar_lea.hbm %s6129_s14, %s6149_s1  ;;  %s3368_s29 = scalar_lea.sflag [#allocation7], %s5900_s28 }
 0x99b   : > { %s4599_s16 = scalar_lea.vmem %s6067_s30, 1024  ;;  %s4677_s17 = smov [#allocation6]  }
 0x99c   : > { %p4600_p6 = scmp.ne.s32.totalorder %s6067_s30, %s4599_s16  ;;  %s4603_s21 = sshll.u32 %s4677_s17, 4  ;;  %s4604_s21 = int_to_ptr.vmem [resolvable:$false] %s4603_s21 }
 0x99d   : > { %p4606_p9 = scmp.lt.s32.totalorder %s6067_s30, %s4604_s21 }
 0x99e   : > { %p4601_p7 = pnand %p4600_p6, %p4794_p10 }
 0x9a0   : > { %p4602_p8 = pneg %p4601_p7 }
 0xa29   : > { %v4149_v27 = vpop.f32.mrb[80].mxu0 }
 0xa2a   : > { %v3214_v23 = vpop.f32.mrb[81].mxu0  ;;  %v3223_v3 = vadd.f32 %v4149_v27, %v3637_v0 }
 0xa2b   : > { %v4150_v14 = vpop.f32.mrb[82].mxu0  ;;  %v3215_v28 = vadd.f32 %v3637_v0, %v3214_v23 }
 0xa2c   : > { %v3226_v36 = vadd.f32 %v4150_v14, %v3637_v0  ;;  %v3217_v58 = vpop.f32.mrb[83].mxu0 }
 0xa2d   : > { %v3218_v47 = vadd.f32 %v3637_v0, %v3217_v58 }
 0xa2e   : > { %v3757_v48 = vpack.c.bf16 %v3226_v36, %v3223_v3 }
 0xa2f   : > { %v3752_v38 = vpack.c.bf16 %v3218_v47, %v3215_v28 }
 0xa30   : > { %3796 = vst [vmem:[%s6043_s25 + $0x8] sm:$0xff] %v3757_v48  }
 0xa31   : > { %3753 = vst [vmem:[%s6043_s25] sm:$0xff] %v3752_v38  }
 0xa3d   : > { %v4153_v18 = vpop.f32.mrb[84].mxu0 }
 0xa3e   : > { %v3230_v42 = vpop.f32.mrb[85].mxu0  ;;  %v3239_v43 = vadd.f32 %v4153_v18, %v3637_v0 }
 0xa3f   : > { %v4154_v21 = vpop.f32.mrb[86].mxu0  ;;  %v3231_v16 = vadd.f32 %v3637_v0, %v3230_v42 }
 0xa40   : > { %v3242_v33 = vadd.f32 %v4154_v21, %v3637_v0  ;;  %v3233_v39 = vpop.f32.mrb[87].mxu0  ;;  %v3030_v56 = vpop.f32.mrb[80].mxu1 }
 0xa41   : > { %v3234_v57 = vadd.f32 %v3637_v0, %v3233_v39  ;;  %3107 = vst [vmem:[%s6051_s23] sm:$0x3] %v3030_v56  ;;  %v4111_v51 = vpop.f32.mrb[81].mxu1 }
 0xa42   : > { %v3767_v7 = vpack.c.bf16 %v3242_v33, %v3239_v43 }
 0xa43   : > { %v3762_v31 = vpack.c.bf16 %v3234_v57, %v3231_v16 }
 0xa44   : > { %3798 = vst [vmem:[%s6043_s25 + $0x18] sm:$0xff] %v3767_v7  }
 0xa45   : > { %3797 = vst [vmem:[%s6043_s25 + $0x10] sm:$0xff] %v3762_v31  }
 0xa4f   : > { %v4157_v45 = vpop.f32.mrb[88].mxu0 }
 0xa50   : > { %v3246_v59 = vpop.f32.mrb[89].mxu0  ;;  %v3255_v41 = vadd.f32 %v4157_v45, %v3637_v0 }
 0xa51   : > { %v4158_v11 = vpop.f32.mrb[90].mxu0  ;;  %v3247_v52 = vadd.f32 %v3637_v0, %v3246_v59 }
 0xa52   : > { %v3258_v26 = vadd.f32 %v4158_v11, %v3637_v0  ;;  %v3249_v34 = vpop.f32.mrb[91].mxu0 }
 0xa53   : > { %v3250_v20 = vadd.f32 %v3637_v0, %v3249_v34 }
 0xa54   : > { %v3777_v53 = vpack.c.bf16 %v3258_v26, %v3255_v41 }
 0xa55   : > { %v3772_v46 = vpack.c.bf16 %v3250_v20, %v3247_v52 }
 0xa56   : > { %3800 = vst [vmem:[%s6043_s25 + $0x28] sm:$0xff] %v3777_v53  }
 0xa57   : > { %3799 = vst [vmem:[%s6043_s25 + $0x20] sm:$0xff] %v3772_v46  }
 0xa58   : > { %v4161_v49 = vpop.f32.mrb[92].mxu0 }
 0xa59   : > { %v3262_v61 = vpop.f32.mrb[93].mxu0  ;;  %v3271_v50 = vadd.f32 %v4161_v49, %v3637_v0 }
 0xa5a   : > { %v4162_v10 = vpop.f32.mrb[94].mxu0  ;;  %v3263_v63 = vadd.f32 %v3637_v0, %v3262_v61 }
 0xa5b   : > { %v3274_v24 = vadd.f32 %v4162_v10, %v3637_v0  ;;  %v3265_v22 = vpop.f32.mrb[95].mxu0  ;;  %v3103_v12 = vpop.f32.mrb[82].mxu1 }
 0xa5c   : > { %v3266_v37 = vadd.f32 %v3637_v0, %v3265_v22  ;;  %3108 = vst [vmem:[%s6051_s23 + $0x2] sm:$0x3] %v3103_v12  ;;  %v4130_v4 = vpop.f32.mrb[83].mxu1  ;;  %s4605_s23 = scalar_lea.vmem %s4604_s21, 2048 }
 0xa5d   : > { %v3787_v40 = vpack.c.bf16 %v3274_v24, %v3271_v50  ;;  %p4607_p12 = scmp.lt.s32.totalorder %s4605_s23, %s4599_s16 }
 0xa5e   : > { %v3782_v55 = vpack.c.bf16 %v3266_v37, %v3263_v63 }
 0xa5f   : > { %3802 = vst [vmem:[%s6043_s25 + $0x38] sm:$0xff] %v3787_v40   ;;  %p4608_p13 = por %p4607_p12, %p4606_p9 }
 0xa60   : > { %3801 = vst [vmem:[%s6043_s25 + $0x30] sm:$0xff] %v3782_v55  }
 0xa61   : > { %p4609_p0 = pnand %p4608_p13, %p4602_p8 }
 0xa63   : > { %4612 = shalt.err (!%p4609_p0)
}
 0xa64   : > { %s4613_s25 = scalar_lea.hbm %s6065_s24, 1024  ;;  %s4617_s26 = scalar_lea.hbm %s6129_s14, 2048 }
 0xa65   : > { %p4614_p1 = scmp.ne.s32.totalorder %s6065_s24, %s4613_s25  ;;  %p4618_p4 = scmp.lt.u32.totalorder %s6065_s24, %s6129_s14 }
 0xa66   : > { %p4619_p5 = scmp.lt.u32.totalorder %s4617_s26, %s4613_s25  ;;  %p4621_p7 = scmp.lt.u32.totalorder %s4613_s25, %s6065_s24 }
 0xa67   : > { %p4615_p2 = pnand %p4614_p1, %p4794_p10 }
 0xa68   : > { %p4620_p6 = por %p4619_p5, %p4618_p4 }
 0xa69   : > { %p4616_p3 = pneg %p4615_p2 }
 0xa6a   : > { %p4622_p8 = por %p4621_p7, %p4620_p6 }
 0xa6c   : > { %p4623_p9 = pnand %p4622_p8, %p4616_p3 }
 0xa6e   : > { %4626 = shalt.err (!%p4623_p9)
}
 0xa6f   : > { %4204 = dma.vmem_to_hbm [thread:$0]  (%p4794_p10), %s6067_s30, 1024, %s6065_s24, %s3368_s29, %s4675_s22, %s4675_s22, %s4676_s19  }
 0xa70 PF: > { %p4214_p12 = scmp.ge.s32.totalorder %s4667_s20, 2  ;;  %s3418_s23 = sand.u32 1, %s4655_s18  }
 0xa71   : > { %s3419_s25 = scalar_lea.sflag [#allocation5], %s3418_s23 }
 0xa72   : > { %p4208_p13 = pnand %p4214_p12, %p4798_p11 }
 0xa74   : > { %4646 = dma.done.wait (!%p4208_p13), %s3419_s25, 1024  }
 0xa75   : > { %4648 = vsyncadd (!%p4208_p13), %s3419_s25, 4294966272  ;;  %s3436_s27 = scalar_lea.sflag [#allocation7], %s3418_s23 }
 0xa76   : > { %4650 = dma.done.wait (!%p4208_p13), %s3436_s27, 1024  }
 0xa77   : > { %4652 = vsyncadd (!%p4208_p13), %s3436_s27, 4294966272  ;;  %s6151_s20 = sld [smem:[#allocation12_spill]]  ;;  %s6152_s28 = sld [smem:[#allocation11_spill]] }
 0xa78   : > { %s6153_s19 = sld [smem:[#allocation13_spill]]  ;;  %s6154_s18 = smov %s4659_s0 }
 0xa7d   : > { %p34_p10 = scmp.ge.s32.totalorder %s6151_s20, 4   ;;  %s6155_s0 = smov %s6152_s28 }
 0xa7f   :  { %36 = sbr.rel (!%p34_p10) target bundleno = 20 (0x14), region = 128 }
 0xa86   :  { %3441 = vsyncpa [#allocation5], 1 }
 0xa87   :  { %3443 = vsyncpa [#allocation5 + $0x1], 1 }
 0xa88   :  { %3444 = vsyncpa [#allocation7], 1 }
 0xa89   :  { %3446 = vsyncpa [#allocation7 + $0x1], 1 }

</bundles_post_ra>
